<compile_context>
chip_gen: v5e
topology: v5e:2x2
jax: 0.10.0
libtpu: 0.0.40
codegen_flags: <defaults>
</compile_context>

<pallas_src>
import jax
import jax.numpy as jnp
from jax.experimental import pallas as pl
from jax.experimental.pallas import tpu as pltpu

HIDDEN_DIMS = (1024, 512, 128, 32)
LANE = 128
SUBLANE = 8


def moldqn_kernel(x_ref, *refs):
    """Fused MLP: 4x (bf16 matmul -> f32 acc -> bias -> ReLU -> bf16), final matmul + bias."""
    o_ref = refs[-1]
    wb = refs[:-1]
    h = x_ref[...]  # bf16 activations feed the MXU
    for i in range(4):
        w_ref, b_ref = wb[2 * i], wb[2 * i + 1]
        acc = jnp.dot(h, w_ref[...], preferred_element_type=jnp.float32) + b_ref[...]
        h = jnp.maximum(acc, 0.0).astype(jnp.bfloat16)
    w_ref, b_ref = wb[8], wb[9]
    out = jnp.dot(h, w_ref[...], preferred_element_type=jnp.float32) + b_ref[...]
    o_ref[...] = out.astype(o_ref.dtype)


def _round_up(n, m):
    return ((n + m - 1) // m) * m


def _resident_spec(shape):
    # Whole-array block, same block for every grid step -> stays VMEM-resident.
    return pl.BlockSpec(shape, lambda i: (0,) * len(shape))


def moldqn_forward(x, params, output_length, *, max_batch_tile=128):
    """x: [B, input_length] (any float dtype); params: [w1,b1,...,w5,b5] from init_params.

    Returns f32 [B, output_length].
    """
    B, d_in = x.shape
    out_pad = params[-1].shape[-1]  # final layer N, already padded to a lane multiple

    # Batch tiling: tile rows in chunks of up to 128 (full MXU M on v5e), pad B
    # up to a sublane multiple so tiles are well-formed.
    tile_b = min(max_batch_tile, _round_up(B, SUBLANE))
    b_pad = _round_up(B, tile_b)

    x_bf = x.astype(jnp.bfloat16)
    if b_pad != B:
        x_bf = jnp.pad(x_bf, ((0, b_pad - B), (0, 0)))

    grid = (b_pad // tile_b,)

    in_specs = [pl.BlockSpec((tile_b, d_in), lambda i: (i, 0))]
    in_specs += [_resident_spec(p.shape) for p in params]
    out_spec = pl.BlockSpec((tile_b, out_pad), lambda i: (i, 0))

    out = pl.pallas_call(
        moldqn_kernel,
        out_shape=jax.ShapeDtypeStruct((b_pad, out_pad), jnp.float32),
        grid=grid,
        in_specs=in_specs,
        out_specs=out_spec,
        compiler_params=pltpu.CompilerParams(
            dimension_semantics=("parallel",),  # shards batch tiles across v7x's 2 TCs
        ),
    )(x_bf, *params)

    return out[:B, :output_length]


def init_params(key, input_length, output_length):
    """Init matching nn.Linear's default U(-1/sqrt(fan_in), +1/sqrt(fan_in)).

    Weights are [in, out] bf16; biases are [1, out] f32.  The final layer is
    zero-padded along its output dim up to a multiple of 128 lanes.
    """
    out_padded = _round_up(max(output_length, 1), LANE)
    dims = [input_length, *HIDDEN_DIMS, output_length]
    params = []
    for i in range(5):
        fan_in, fan_out = dims[i], dims[i + 1]
        key, kw, kb = jax.random.split(key, 3)
        bound = 1.0 / float(fan_in) ** 0.5
        w = jax.random.uniform(kw, (fan_in, fan_out), jnp.float32, -bound, bound)
        b = jax.random.uniform(kb, (1, fan_out), jnp.float32, -bound, bound)
        if i == 4 and fan_out != out_padded:
            w = jnp.pad(w, ((0, 0), (0, out_padded - fan_out)))
            b = jnp.pad(b, ((0, 0), (0, out_padded - fan_out)))
        params += [w.astype(jnp.bfloat16), b.astype(jnp.float32)]
    return params


def moldqn_reference(x, params, output_length):
    """Pure-JAX reference mirroring the kernel's bf16-weight / f32-accumulate math."""
    h = x.astype(jnp.bfloat16)
    for i in range(4):
        w, b = params[2 * i], params[2 * i + 1]
        acc = jnp.dot(h.astype(jnp.float32), w.astype(jnp.float32)) + b
        h = jnp.maximum(acc, 0.0).astype(jnp.bfloat16)
    w, b = params[8], params[9]
    out = jnp.dot(h.astype(jnp.float32), w.astype(jnp.float32)) + b
    return out[:, :output_length]


if __name__ == "__main__":
    input_length = 512   # e.g. fingerprint length (kept small)
    output_length = 32   # number of actions
    batch = 8

    key = jax.random.PRNGKey(0)
    key, kx, kp = jax.random.split(key, 3)
    x = jax.random.normal(kx, (batch, input_length), jnp.float32)
    params = init_params(kp, input_length, output_length)

    out = moldqn_forward(x, params, output_length)
    out = jax.block_until_ready(out)

    ref = moldqn_reference(x, params, output_length)
    assert out.shape == (batch, output_length)
    assert jnp.allclose(out, ref, atol=1e-2, rtol=1e-2), "mismatch vs pure-JAX reference"

    print("KERNEL_OK")
</pallas_src>

<mosaic_0001>
module attributes {stable_mosaic.version = 11 : i64} {
  func.func @moldqn_kernel(%arg0: i32, %arg1: memref<8x512xbf16, #tpu.memory_space<vmem>>, %arg2: memref<512x1024xbf16, #tpu.memory_space<vmem>>, %arg3: memref<1x1024xf32, #tpu.memory_space<vmem>>, %arg4: memref<1024x512xbf16, #tpu.memory_space<vmem>>, %arg5: memref<1x512xf32, #tpu.memory_space<vmem>>, %arg6: memref<512x128xbf16, #tpu.memory_space<vmem>>, %arg7: memref<1x128xf32, #tpu.memory_space<vmem>>, %arg8: memref<128x32xbf16, #tpu.memory_space<vmem>>, %arg9: memref<1x32xf32, #tpu.memory_space<vmem>>, %arg10: memref<32x128xbf16, #tpu.memory_space<vmem>>, %arg11: memref<1x128xf32, #tpu.memory_space<vmem>>, %arg12: memref<8x128xf32, #tpu.memory_space<vmem>>) attributes {dimension_semantics = [#tpu.dimension_semantics<parallel>], iteration_bounds = array<i64: 1>, scalar_prefetch = 0 : i64, scratch_operands = 0 : i64, tpu.core_type = #tpu.core_type<tc>, window_params = [{transform_indices = @transform_0, window_bounds = array<i64: 8, 512>}, {pipeline_mode = #tpu.pipeline_mode<synchronous>, transform_indices = @transform_1, window_bounds = array<i64: 512, 1024>}, {pipeline_mode = #tpu.pipeline_mode<synchronous>, transform_indices = @transform_2, window_bounds = array<i64: 1, 1024>}, {pipeline_mode = #tpu.pipeline_mode<synchronous>, transform_indices = @transform_3, window_bounds = array<i64: 1024, 512>}, {pipeline_mode = #tpu.pipeline_mode<synchronous>, transform_indices = @transform_4, window_bounds = array<i64: 1, 512>}, {pipeline_mode = #tpu.pipeline_mode<synchronous>, transform_indices = @transform_5, window_bounds = array<i64: 512, 128>}, {pipeline_mode = #tpu.pipeline_mode<synchronous>, transform_indices = @transform_6, window_bounds = array<i64: 1, 128>}, {pipeline_mode = #tpu.pipeline_mode<synchronous>, transform_indices = @transform_7, window_bounds = array<i64: 128, 32>}, {pipeline_mode = #tpu.pipeline_mode<synchronous>, transform_indices = @transform_8, window_bounds = array<i64: 1, 32>}, {pipeline_mode = #tpu.pipeline_mode<synchronous>, transform_indices = @transform_9, window_bounds = array<i64: 32, 128>}, {pipeline_mode = #tpu.pipeline_mode<synchronous>, transform_indices = @transform_10, window_bounds = array<i64: 1, 128>}, {transform_indices = @transform_11, window_bounds = array<i64: 8, 128>}]} {
    %c0 = arith.constant 0 : index
    %c0_0 = arith.constant 0 : index
    %0 = vector.load %arg1[%c0, %c0_0] : memref<8x512xbf16, #tpu.memory_space<vmem>>, vector<8x512xbf16>
    %c0_1 = arith.constant 0 : index
    %c0_2 = arith.constant 0 : index
    %1 = vector.load %arg2[%c0_1, %c0_2] : memref<512x1024xbf16, #tpu.memory_space<vmem>>, vector<512x1024xbf16>
    %cst = arith.constant dense<0.000000e+00> : vector<8x1024xf32>
    %2 = tpu.matmul %0, %1, %cst {dimension_numbers = #tpu.dot_dimension_numbers<[1], [0], [0], [1], [0, 0, 1, 1], [], []>} : vector<8x512xbf16>, vector<512x1024xbf16>, vector<8x1024xf32> -> vector<8x1024xf32>
    %c0_3 = arith.constant 0 : index
    %c0_4 = arith.constant 0 : index
    %3 = vector.load %arg3[%c0_3, %c0_4] : memref<1x1024xf32, #tpu.memory_space<vmem>>, vector<1x1024xf32>
    %4 = vector.broadcast %3 : vector<1x1024xf32> to vector<8x1024xf32>
    %5 = arith.addf %2, %4 : vector<8x1024xf32>
    %cst_5 = arith.constant 0.000000e+00 : f32
    %6 = vector.broadcast %cst_5 : f32 to vector<8x1024xf32>
    %7 = arith.maximumf %5, %6 : vector<8x1024xf32>
    %8 = arith.truncf %7 : vector<8x1024xf32> to vector<8x1024xbf16>
    %c0_6 = arith.constant 0 : index
    %c0_7 = arith.constant 0 : index
    %9 = vector.load %arg4[%c0_6, %c0_7] : memref<1024x512xbf16, #tpu.memory_space<vmem>>, vector<1024x512xbf16>
    %cst_8 = arith.constant dense<0.000000e+00> : vector<8x512xf32>
    %10 = tpu.matmul %8, %9, %cst_8 {dimension_numbers = #tpu.dot_dimension_numbers<[1], [0], [0], [1], [0, 0, 1, 1], [], []>} : vector<8x1024xbf16>, vector<1024x512xbf16>, vector<8x512xf32> -> vector<8x512xf32>
    %c0_9 = arith.constant 0 : index
    %c0_10 = arith.constant 0 : index
    %11 = vector.load %arg5[%c0_9, %c0_10] : memref<1x512xf32, #tpu.memory_space<vmem>>, vector<1x512xf32>
    %12 = vector.broadcast %11 : vector<1x512xf32> to vector<8x512xf32>
    %13 = arith.addf %10, %12 : vector<8x512xf32>
    %cst_11 = arith.constant 0.000000e+00 : f32
    %14 = vector.broadcast %cst_11 : f32 to vector<8x512xf32>
    %15 = arith.maximumf %13, %14 : vector<8x512xf32>
    %16 = arith.truncf %15 : vector<8x512xf32> to vector<8x512xbf16>
    %c0_12 = arith.constant 0 : index
    %c0_13 = arith.constant 0 : index
    %17 = vector.load %arg6[%c0_12, %c0_13] : memref<512x128xbf16, #tpu.memory_space<vmem>>, vector<512x128xbf16>
    %cst_14 = arith.constant dense<0.000000e+00> : vector<8x128xf32>
    %18 = tpu.matmul %16, %17, %cst_14 {dimension_numbers = #tpu.dot_dimension_numbers<[1], [0], [0], [1], [0, 0, 1, 1], [], []>} : vector<8x512xbf16>, vector<512x128xbf16>, vector<8x128xf32> -> vector<8x128xf32>
    %c0_15 = arith.constant 0 : index
    %c0_16 = arith.constant 0 : index
    %19 = vector.load %arg7[%c0_15, %c0_16] : memref<1x128xf32, #tpu.memory_space<vmem>>, vector<1x128xf32>
    %20 = vector.broadcast %19 : vector<1x128xf32> to vector<8x128xf32>
    %21 = arith.addf %18, %20 : vector<8x128xf32>
    %cst_17 = arith.constant 0.000000e+00 : f32
    %22 = vector.broadcast %cst_17 : f32 to vector<8x128xf32>
    %23 = arith.maximumf %21, %22 : vector<8x128xf32>
    %24 = arith.truncf %23 : vector<8x128xf32> to vector<8x128xbf16>
    %c0_18 = arith.constant 0 : index
    %c0_19 = arith.constant 0 : index
    %25 = vector.load %arg8[%c0_18, %c0_19] : memref<128x32xbf16, #tpu.memory_space<vmem>>, vector<128x32xbf16>
    %cst_20 = arith.constant dense<0.000000e+00> : vector<8x32xf32>
    %26 = tpu.matmul %24, %25, %cst_20 {dimension_numbers = #tpu.dot_dimension_numbers<[1], [0], [0], [1], [0, 0, 1, 1], [], []>} : vector<8x128xbf16>, vector<128x32xbf16>, vector<8x32xf32> -> vector<8x32xf32>
    %c0_21 = arith.constant 0 : index
    %c0_22 = arith.constant 0 : index
    %27 = vector.load %arg9[%c0_21, %c0_22] : memref<1x32xf32, #tpu.memory_space<vmem>>, vector<1x32xf32>
    %28 = vector.broadcast %27 : vector<1x32xf32> to vector<8x32xf32>
    %29 = arith.addf %26, %28 : vector<8x32xf32>
    %cst_23 = arith.constant 0.000000e+00 : f32
    %30 = vector.broadcast %cst_23 : f32 to vector<8x32xf32>
    %31 = arith.maximumf %29, %30 : vector<8x32xf32>
    %32 = arith.truncf %31 : vector<8x32xf32> to vector<8x32xbf16>
    %c0_24 = arith.constant 0 : index
    %c0_25 = arith.constant 0 : index
    %33 = vector.load %arg10[%c0_24, %c0_25] : memref<32x128xbf16, #tpu.memory_space<vmem>>, vector<32x128xbf16>
    %cst_26 = arith.constant dense<0.000000e+00> : vector<8x128xf32>
    %34 = tpu.matmul %32, %33, %cst_26 {dimension_numbers = #tpu.dot_dimension_numbers<[1], [0], [0], [1], [0, 0, 1, 1], [], []>} : vector<8x32xbf16>, vector<32x128xbf16>, vector<8x128xf32> -> vector<8x128xf32>
    %c0_27 = arith.constant 0 : index
    %c0_28 = arith.constant 0 : index
    %35 = vector.load %arg11[%c0_27, %c0_28] : memref<1x128xf32, #tpu.memory_space<vmem>>, vector<1x128xf32>
    %36 = vector.broadcast %35 : vector<1x128xf32> to vector<8x128xf32>
    %37 = arith.addf %34, %36 : vector<8x128xf32>
    %c0_29 = arith.constant 0 : index
    %c0_30 = arith.constant 0 : index
    %38 = vector.load %arg12[%c0_29, %c0_30] : memref<8x128xf32, #tpu.memory_space<vmem>>, vector<8x128xf32>
    tpu.vector_store %arg12[%c0_29, %c0_30], %37 {strides = array<i32>} : memref<8x128xf32, #tpu.memory_space<vmem>>, vector<8x128xf32>,
    return
  }
  func.func @transform_0(%arg0: i32) -> (i32, i32) {
    %c0_i32 = arith.constant 0 : i32
    %c0_i32_0 = arith.constant 0 : i32
    return %arg0, %c0_i32 : i32, i32
  }
  func.func @transform_1(%arg0: i32) -> (i32, i32) {
    %c0_i32 = arith.constant 0 : i32
    %c0_i32_0 = arith.constant 0 : i32
    %c0_i32_1 = arith.constant 0 : i32
    return %c0_i32, %c0_i32_0 : i32, i32
  }
  func.func @transform_2(%arg0: i32) -> (i32, i32) {
    %c0_i32 = arith.constant 0 : i32
    %c0_i32_0 = arith.constant 0 : i32
    %c0_i32_1 = arith.constant 0 : i32
    return %c0_i32, %c0_i32_0 : i32, i32
  }
  func.func @transform_3(%arg0: i32) -> (i32, i32) {
    %c0_i32 = arith.constant 0 : i32
    %c0_i32_0 = arith.constant 0 : i32
    %c0_i32_1 = arith.constant 0 : i32
    return %c0_i32, %c0_i32_0 : i32, i32
  }
  func.func @transform_4(%arg0: i32) -> (i32, i32) {
    %c0_i32 = arith.constant 0 : i32
    %c0_i32_0 = arith.constant 0 : i32
    %c0_i32_1 = arith.constant 0 : i32
    return %c0_i32, %c0_i32_0 : i32, i32
  }
  func.func @transform_5(%arg0: i32) -> (i32, i32) {
    %c0_i32 = arith.constant 0 : i32
    %c0_i32_0 = arith.constant 0 : i32
    %c0_i32_1 = arith.constant 0 : i32
    return %c0_i32, %c0_i32_0 : i32, i32
  }
  func.func @transform_6(%arg0: i32) -> (i32, i32) {
    %c0_i32 = arith.constant 0 : i32
    %c0_i32_0 = arith.constant 0 : i32
    %c0_i32_1 = arith.constant 0 : i32
    return %c0_i32, %c0_i32_0 : i32, i32
  }
  func.func @transform_7(%arg0: i32) -> (i32, i32) {
    %c0_i32 = arith.constant 0 : i32
    %c0_i32_0 = arith.constant 0 : i32
    %c0_i32_1 = arith.constant 0 : i32
    return %c0_i32, %c0_i32_0 : i32, i32
  }
  func.func @transform_8(%arg0: i32) -> (i32, i32) {
    %c0_i32 = arith.constant 0 : i32
    %c0_i32_0 = arith.constant 0 : i32
    %c0_i32_1 = arith.constant 0 : i32
    return %c0_i32, %c0_i32_0 : i32, i32
  }
  func.func @transform_9(%arg0: i32) -> (i32, i32) {
    %c0_i32 = arith.constant 0 : i32
    %c0_i32_0 = arith.constant 0 : i32
    %c0_i32_1 = arith.constant 0 : i32
    return %c0_i32, %c0_i32_0 : i32, i32
  }
  func.func @transform_10(%arg0: i32) -> (i32, i32) {
    %c0_i32 = arith.constant 0 : i32
    %c0_i32_0 = arith.constant 0 : i32
    %c0_i32_1 = arith.constant 0 : i32
    return %c0_i32, %c0_i32_0 : i32, i32
  }
  func.func @transform_11(%arg0: i32) -> (i32, i32) {
    %c0_i32 = arith.constant 0 : i32
    %c0_i32_0 = arith.constant 0 : i32
    return %arg0, %c0_i32 : i32, i32
  }
}

</mosaic_0001>

<bundles_post_ra>
// kernel: tpu_custom_call.1
= control target key start
LH: loop header
LB: loop body
LE: loop exit
PB: predicated region body
PF: predicated region fallthrough
CT: control target
= control target key end

     0   :  { %16 = vsyncpa [#allocation3], 0  ;;  %s7686_s0 = inlined_call_operand.vmem [shape: bf16[8,512], index: 0, kind: input, shape index: {}]   ;;  %s7687_s1 = inlined_call_operand.hbm [shape: bf16[512,1024], index: 1, kind: input, shape index: {}]   ;;  %s7688_s2 = inlined_call_operand.vmem [shape: f32[1,1024], index: 2, kind: input, shape index: {}]   ;;  %s7689_s3 = inlined_call_operand.hbm [shape: bf16[1024,512], index: 3, kind: input, shape index: {}]   ;;  %s7690_s4 = inlined_call_operand.vmem [shape: f32[1,512], index: 4, kind: input, shape index: {}]   ;;  %s7691_s5 = inlined_call_operand.hbm [shape: bf16[512,128], index: 5, kind: input, shape index: {}]   ;;  %s7692_s6 = inlined_call_operand.vmem [shape: f32[1,128], index: 6, kind: input, shape index: {}]   ;;  %s7693_s7 = inlined_call_operand.vmem [shape: bf16[128,32], index: 7, kind: input, shape index: {}]   ;;  %s7694_s8 = inlined_call_operand.vmem [shape: f32[1,32], index: 8, kind: input, shape index: {}]   ;;  %s7695_s9 = inlined_call_operand.vmem [shape: bf16[32,128], index: 9, kind: input, shape index: {}]   ;;  %s7696_s10 = inlined_call_operand.vmem [shape: f32[1,128], index: 10, kind: input, shape index: {}]   ;;  %s7697_s11 = inlined_call_operand.hbm [shape: f32[8,128], index: 11, kind: output, shape index: {}]  }
   0x1   :  { %17 = vsyncpa [#allocation6], 0  ;;  %s40_s19 = sshll.u32 %s7689_s3, 4  ;;  %s41_s19 = int_to_ptr.hbm [resolvable:$true] %s40_s19 }
   0x2   :  { %18 = vsyncpa [#allocation4], 0  ;;  %s7400_s20 = smov [#allocation5]   ;;  %s25_s24 = sshll.u32 %s7687_s1, 4  ;;  %s26_s24 = int_to_ptr.hbm [resolvable:$true] %s25_s24 }
   0x3   :  { %s42_s21 = sshll.u32 %s7400_s20, 4  ;;  %s7401_s25 = smov 256   ;;  %s43_s21 = int_to_ptr.vmem [resolvable:$true] %s42_s21 }
   0x4   :  { %s7402_s26 = smov 16   ;;  %s7403_s27 = smov [#allocation2]  }
   0x5   :  { %48 = dma.hbm_to_vmem [thread:$0]  %s41_s19, 32768, %s43_s21, [#allocation6], %s7401_s25, %s7401_s25, %s7402_s26  }
   0x6   :  { %s27_s28 = sshll.u32 %s7403_s27, 4  ;;  %s7404_s29 = smov 512   ;;  %s28_s28 = int_to_ptr.vmem [resolvable:$true] %s27_s28 }
   0x7   :  { %s7405_s30 = smov 32   ;;  %s55_s13 = sshll.u32 %s7691_s5, 4  ;;  %s56_s13 = int_to_ptr.hbm [resolvable:$true] %s55_s13 }
   0x8   :  { %33 = dma.hbm_to_vmem [thread:$0]  %s26_s24, 32768, %s28_s28, [#allocation3], %s7404_s29, %s7404_s29, %s7405_s30  }
   0x9   :  { %s7406_s14 = smov [#allocation7]   ;;  %s7407_s16 = smov 64  }
   0xa   :  { %s57_s15 = sshll.u32 %s7406_s14, 4  ;;  %s7408_s1 = smov 4   ;;  %s58_s15 = int_to_ptr.vmem [resolvable:$true] %s57_s15 }
   0xb   :  { %63 = dma.hbm_to_vmem [thread:$0]  %s56_s13, 4096, %s58_s15, [#allocation6], %s7407_s16, %s7407_s16, %s7408_s1  }
   0xc   :  { %7394 = dma.done.wait [#allocation3], 32768  }
   0xd   :  { %7395 = vsyncadd [#allocation3], 4294934528 }
   0xe   :  { %7396 = dma.done.wait [#allocation6], 36864  }
   0xf   :  { %7397 = vsyncadd [#allocation6], 4294930432  ;;  %v4738_v0 = vld [vmem:[#allocation2 + $0x1c0] sm:$0xf]  ;;  %vm4476_vm0 = vcmask 261120   ;;  %s7409_s24 = smov [#allocation8]  }
  0x10   :  { %v6789_v1 = vld [vmem:[#allocation2 + $0x1dc] sm:$0xf0]  ;;  %s4499_s25 = sshll.u32 %s7409_s24, 4  ;;  %s4501_s27 = sshll.u32 %s7697_s11, 4  ;;  %s4500_s25 = int_to_ptr.vmem [resolvable:$true] %s4499_s25  ;;  %s4502_s27 = int_to_ptr.hbm [resolvable:$true] %s4501_s27 }
  0x11   :  { %v4994_v2 = vld [vmem:[#allocation2 + $0x3c0] sm:$0xf]  ;;  %v4739_v3 = vor.u32 %v6789_v1, %v4738_v0 }
  0x12   :  { %v6853_v4 = vld [vmem:[#allocation2 + $0x3dc] sm:$0xf0] }
  0x13   :  { %v5250_v5 = vld [vmem:[#allocation2 + $0x5c0] sm:$0xf]  ;;  %v4995_v7 = vor.u32 %v6853_v4, %v4994_v2  ;;  %1657 = vmatpush.bf16.msra.mxu0 %v4739_v3 }
  0x14   :  { %v6917_v6 = vld [vmem:[#allocation2 + $0x5dc] sm:$0xf0] }
  0x15   :  { %v5251_v8 = vor.u32 %v6917_v6, %v5250_v5  ;;  %v5506_v9 = vld [vmem:[#allocation2 + $0x7c0] sm:$0xf]  ;;  %1670 = vmatpush.bf16.msra.mxu1 %v4995_v7 }
  0x16   :  { %v6981_v10 = vld [vmem:[#allocation2 + $0x7dc] sm:$0xf0] }
  0x17   :  { %v4706_v11 = vld [vmem:[#allocation2 + $0x180] sm:$0xf]  ;;  %v5507_v12 = vor.u32 %v6981_v10, %v5506_v9  ;;  %1683 = vmatpush.bf16.msra.mxu2 %v5251_v8 }
  0x18   :  { %v6781_v13 = vld [vmem:[#allocation2 + $0x19c] sm:$0xf0] }
  0x19   :  { %v4962_v14 = vld [vmem:[#allocation2 + $0x380] sm:$0xf]  ;;  %v4707_v16 = vor.u32 %v6781_v13, %v4706_v11  ;;  %1696 = vmatpush.bf16.msra.mxu3 %v5507_v12 }
  0x1a   :  { %v6845_v15 = vld [vmem:[#allocation2 + $0x39c] sm:$0xf0] }
  0x1b   :  { %v4963_v17 = vor.u32 %v6845_v15, %v4962_v14  ;;  %v5218_v18 = vld [vmem:[#allocation2 + $0x580] sm:$0xf]  ;;  %1658 = vmatpush.bf16.msra.mxu0 %v4707_v16 }
  0x1c   :  { %v6909_v19 = vld [vmem:[#allocation2 + $0x59c] sm:$0xf0] }
  0x1d   :  { %v5474_v20 = vld [vmem:[#allocation2 + $0x780] sm:$0xf]  ;;  %v5219_v21 = vor.u32 %v6909_v19, %v5218_v18  ;;  %1671 = vmatpush.bf16.msra.mxu1 %v4963_v17 }
  0x1e   :  { %v6973_v22 = vld [vmem:[#allocation2 + $0x79c] sm:$0xf0] }
  0x1f   :  { %v4674_v23 = vld [vmem:[#allocation2 + $0x140] sm:$0xf]  ;;  %v5475_v25 = vor.u32 %v6973_v22, %v5474_v20  ;;  %1684 = vmatpush.bf16.msra.mxu2 %v5219_v21 }
  0x20   :  { %v6773_v24 = vld [vmem:[#allocation2 + $0x15c] sm:$0xf0] }
  0x21   :  { %v4930_v26 = vld [vmem:[#allocation2 + $0x340] sm:$0xf]  ;;  %v4675_v29 = vor.u32 %v6773_v24, %v4674_v23  ;;  %1697 = vmatpush.bf16.msra.mxu3 %v5475_v25 }
  0x22   :  { %v6837_v27 = vld [vmem:[#allocation2 + $0x35c] sm:$0xf0] }
  0x23   :  { %v5186_v28 = vld [vmem:[#allocation2 + $0x540] sm:$0xf]  ;;  %v4931_v33 = vor.u32 %v6837_v27, %v4930_v26  ;;  %1659 = vmatpush.bf16.msra.mxu0 %v4675_v29  ;;  %v4740_v29 = vld [vmem:[#allocation2 + $0x1e0] sm:$0xf0] }
  0x24   :  { %v6901_v30 = vld [vmem:[#allocation2 + $0x55c] sm:$0xf0] }
  0x25   :  { %v5442_v31 = vld [vmem:[#allocation2 + $0x740] sm:$0xf]  ;;  %v5187_v34 = vor.u32 %v6901_v30, %v5186_v28  ;;  %1672 = vmatpush.bf16.msra.mxu1 %v4931_v33  ;;  %v6785_v28 = vld [vmem:[#allocation2 + $0x1c4] sm:$0xf] }
  0x26   :  { %v6965_v32 = vld [vmem:[#allocation2 + $0x75c] sm:$0xf0]  ;;  %v6849_v30 = vld [vmem:[#allocation2 + $0x3c4] sm:$0xf] }
  0x27   :  { %v4642_v35 = vld [vmem:[#allocation2 + $0x100] sm:$0xf]  ;;  %v5443_v38 = vor.u32 %v6965_v32, %v5442_v31  ;;  %1685 = vmatpush.bf16.msra.mxu2 %v5187_v34  ;;  %v4996_v32 = vld [vmem:[#allocation2 + $0x3e0] sm:$0xf0] }
  0x28   :  { %v6765_v36 = vld [vmem:[#allocation2 + $0x11c] sm:$0xf0]  ;;  %v6913_v33 = vld [vmem:[#allocation2 + $0x5c4] sm:$0xf] }
  0x29   :  { %v4898_v37 = vld [vmem:[#allocation2 + $0x300] sm:$0xf]  ;;  %v4643_v44 = vor.u32 %v6765_v36, %v4642_v35  ;;  %1698 = vmatpush.bf16.msra.mxu3 %v5443_v38  ;;  %v5252_v34 = vld [vmem:[#allocation2 + $0x5e0] sm:$0xf0] }
  0x2a   :  { %v6829_v39 = vld [vmem:[#allocation2 + $0x31c] sm:$0xf0]  ;;  %v5508_v38 = vld [vmem:[#allocation2 + $0x7e0] sm:$0xf0] }
  0x2b   :  { %v5154_v40 = vld [vmem:[#allocation2 + $0x500] sm:$0xf]  ;;  %v4899_v45 = vor.u32 %v6829_v39, %v4898_v37  ;;  %1660 = vmatpush.bf16.msra.mxu0 %v4643_v44  ;;  %v6977_v37 = vld [vmem:[#allocation2 + $0x7c4] sm:$0xf] }
  0x2c   :  { %v6893_v41 = vld [vmem:[#allocation2 + $0x51c] sm:$0xf0]  ;;  %v4708_v44 = vld [vmem:[#allocation2 + $0x1a0] sm:$0xf0] }
  0x2d   :  { %v5410_v42 = vld [vmem:[#allocation2 + $0x700] sm:$0xf]  ;;  %v5155_v46 = vor.u32 %v6893_v41, %v5154_v40  ;;  %1673 = vmatpush.bf16.msra.mxu1 %v4899_v45  ;;  %v4743_v40 = vor.u32 %v6785_v28, %v4740_v29  ;;  %v4999_v41 = vor.u32 %v6849_v30, %v4996_v32  ;;  %v6841_v45 = vld [vmem:[#allocation2 + $0x384] sm:$0xf] }
  0x2e   :  { %v6957_v43 = vld [vmem:[#allocation2 + $0x71c] sm:$0xf0]  ;;  %v4868_v29 = vld [vmem:[#allocation2 + $0x2e0] sm:$0xf0] }
  0x2f   :  { %v4610_v47 = vld [vmem:[#allocation2 + $0xc0] sm:$0xf]  ;;  %v5411_v50 = vor.u32 %v6957_v43, %v5410_v42  ;;  %1686 = vmatpush.bf16.msra.mxu2 %v5155_v46  ;;  %v5255_v42 = vor.u32 %v6913_v33, %v5252_v34  ;;  %v6777_v43 = vld [vmem:[#allocation2 + $0x184] sm:$0xf]  ;;  %v5511_v46 = vor.u32 %v6977_v37, %v5508_v38 }
  0x30   :  { %v6757_v48 = vld [vmem:[#allocation2 + $0xdc] sm:$0xf0]  ;;  %v6881_v30 = vld [vmem:[#allocation2 + $0x4c4] sm:$0xf] }
  0x31   :  { %v4866_v49 = vld [vmem:[#allocation2 + $0x2c0] sm:$0xf]  ;;  %v4611_v56 = vor.u32 %v6757_v48, %v4610_v47  ;;  %1699 = vmatpush.bf16.msra.mxu3 %v5411_v50  ;;  %v4964_v47 = vld [vmem:[#allocation2 + $0x3a0] sm:$0xf0] }
  0x32   :  { %v6821_v51 = vld [vmem:[#allocation2 + $0x2dc] sm:$0xf0]  ;;  %v6905_v48 = vld [vmem:[#allocation2 + $0x584] sm:$0xf] }
  0x33   :  { %v5122_v52 = vld [vmem:[#allocation2 + $0x4c0] sm:$0xf]  ;;  %v4867_v57 = vor.u32 %v6821_v51, %v4866_v49  ;;  %1661 = vmatpush.bf16.msra.mxu0 %v4611_v56  ;;  %v5220_v49 = vld [vmem:[#allocation2 + $0x5a0] sm:$0xf0] }
  0x34   :  { %v6885_v53 = vld [vmem:[#allocation2 + $0x4dc] sm:$0xf0]  ;;  %v6969_v50 = vld [vmem:[#allocation2 + $0x784] sm:$0xf] }
  0x35   :  { %v5378_v54 = vld [vmem:[#allocation2 + $0x6c0] sm:$0xf]  ;;  %v5123_v58 = vor.u32 %v6885_v53, %v5122_v52  ;;  %1674 = vmatpush.bf16.msra.mxu1 %v4867_v57  ;;  %v5476_v51 = vld [vmem:[#allocation2 + $0x7a0] sm:$0xf0]  ;;  %v4711_v52 = vor.u32 %v6777_v43, %v4708_v44 }
  0x36   :  { %v6949_v55 = vld [vmem:[#allocation2 + $0x6dc] sm:$0xf0]  ;;  %v6769_v53 = vld [vmem:[#allocation2 + $0x144] sm:$0xf] }
  0x37   :  { %v4578_v59 = vld [vmem:[#allocation2 + $0x80] sm:$0xf]  ;;  %v5379_v62 = vor.u32 %v6949_v55, %v5378_v54  ;;  %1687 = vmatpush.bf16.msra.mxu2 %v5123_v58  ;;  %v4967_v54 = vor.u32 %v6841_v45, %v4964_v47  ;;  %v5223_v55 = vor.u32 %v6905_v48, %v5220_v49  ;;  %v4676_v56 = vld [vmem:[#allocation2 + $0x160] sm:$0xf0] }
  0x38   :  { %v6749_v60 = vld [vmem:[#allocation2 + $0x9c] sm:$0xf0]  ;;  %v6833_v57 = vld [vmem:[#allocation2 + $0x344] sm:$0xf] }
  0x39   :  { %v4834_v61 = vld [vmem:[#allocation2 + $0x280] sm:$0xf]  ;;  %v4579_v4 = vor.u32 %v6749_v60, %v4578_v59  ;;  %1700 = vmatpush.bf16.msra.mxu3 %v5379_v62  ;;  %v4932_v58 = vld [vmem:[#allocation2 + $0x360] sm:$0xf0]  ;;  %v5479_v59 = vor.u32 %v6969_v50, %v5476_v51 }
  0x3a   :  { %v6813_v63 = vld [vmem:[#allocation2 + $0x29c] sm:$0xf0]  ;;  %v6897_v60 = vld [vmem:[#allocation2 + $0x544] sm:$0xf] }
  0x3b   :  { %v5090_v0 = vld [vmem:[#allocation2 + $0x480] sm:$0xf]  ;;  %v4835_v5 = vor.u32 %v6813_v63, %v4834_v61  ;;  %1662 = vmatpush.bf16.msra.mxu0 %v4579_v4  ;;  %v5188_v61 = vld [vmem:[#allocation2 + $0x560] sm:$0xf0] }
  0x3c   :  { %v6877_v1 = vld [vmem:[#allocation2 + $0x49c] sm:$0xf0]  ;;  %v6961_v62 = vld [vmem:[#allocation2 + $0x744] sm:$0xf]  ;;  %v5191_v4 = vor.u32 %v6897_v60, %v5188_v61 }
  0x3d   :  { %v5346_v2 = vld [vmem:[#allocation2 + $0x680] sm:$0xf]  ;;  %v5091_v6 = vor.u32 %v6877_v1, %v5090_v0  ;;  %1675 = vmatpush.bf16.msra.mxu1 %v4835_v5  ;;  %v5444_v63 = vld [vmem:[#allocation2 + $0x760] sm:$0xf0]  ;;  %v4679_v0 = vor.u32 %v6769_v53, %v4676_v56  ;;  %v4935_v1 = vor.u32 %v6833_v57, %v4932_v58 }
  0x3e   :  { %v6941_v3 = vld [vmem:[#allocation2 + $0x69c] sm:$0xf0]  ;;  %v6761_v5 = vld [vmem:[#allocation2 + $0x104] sm:$0xf] }
  0x3f   :  { %v4546_v7 = vld [vmem:[#allocation2 + $0x40] sm:$0xf]  ;;  %v5347_v10 = vor.u32 %v6941_v3, %v5346_v2  ;;  %1688 = vmatpush.bf16.msra.mxu2 %v5091_v6  ;;  %v88_v2 = vld [vmem:[%s7686_s0 + $0x8] sm:$0xff]  ;;  %v4644_v6 = vld [vmem:[#allocation2 + $0x120] sm:$0xf0] }
  0x40   :  { %v6741_v8 = vld [vmem:[#allocation2 + $0x5c] sm:$0xf0]  ;;  %v6945_v32 = vld [vmem:[#allocation2 + $0x6c4] sm:$0xf] }
  0x41   :  { %v4802_v9 = vld [vmem:[#allocation2 + $0x240] sm:$0xf]  ;;  %v4547_v16 = vor.u32 %v6741_v8, %v4546_v7  ;;  %1701 = vmatpush.bf16.msra.mxu3 %v5347_v10  ;;  %v6825_v7 = vld [vmem:[#allocation2 + $0x304] sm:$0xf]  ;;  %v367_v8 = vunpack.c.l.b16 %v88_v2  ;;  %v368_v10 = vunpack.c.h.b16 %v88_v2 }
  0x42   :  { %v6805_v11 = vld [vmem:[#allocation2 + $0x25c] sm:$0xf0]  ;;  %v5380_v33 = vld [vmem:[#allocation2 + $0x6e0] sm:$0xf0] }
  0x43   :  { %v5058_v12 = vld [vmem:[#allocation2 + $0x440] sm:$0xf]  ;;  %v4803_v19 = vor.u32 %v6805_v11, %v4802_v9  ;;  %1663 = vmatpush.bf16.msra.mxu0 %v4547_v16  ;;  %v5447_v11 = vor.u32 %v6961_v62, %v5444_v63  ;;  %v6953_v16 = vld [vmem:[#allocation2 + $0x704] sm:$0xf] }
  0x44   :  { %v6869_v13 = vld [vmem:[#allocation2 + $0x45c] sm:$0xf0]  ;;  %v6745_v37 = vld [vmem:[#allocation2 + $0x84] sm:$0xf] }
  0x45   :  { %v5314_v14 = vld [vmem:[#allocation2 + $0x640] sm:$0xf]  ;;  %v5059_v20 = vor.u32 %v6869_v13, %v5058_v12  ;;  %1676 = vmatpush.bf16.msra.mxu1 %v4803_v19  ;;  %v4900_v12 = vld [vmem:[#allocation2 + $0x320] sm:$0xf0] }
  0x46   :  { %v6933_v15 = vld [vmem:[#allocation2 + $0x65c] sm:$0xf0]  ;;  %v6889_v13 = vld [vmem:[#allocation2 + $0x504] sm:$0xf] }
  0x47   :  { %v4514_v17 = vld [vmem:[#allocation2] sm:$0xf]  ;;  %v5315_v24 = vor.u32 %v6933_v15, %v5314_v14  ;;  %1689 = vmatpush.bf16.msra.mxu2 %v5059_v20  ;;  %v5156_v14 = vld [vmem:[#allocation2 + $0x520] sm:$0xf0]  ;;  %v7489_v20 = vpack.c.b16 %v368_v10, %v368_v10  ;;  %v6854_v10 = vld [vmem:[#allocation2 + $0x3e4] sm:$0xf0] }
  0x48   :  { %v6733_v18 = vld [vmem:[#allocation2 + $0x1c] sm:$0xf0]  ;;  %v4580_v38 = vld [vmem:[#allocation2 + $0xa0] sm:$0xf0] }
  0x49   :  { %v4770_v21 = vld [vmem:[#allocation2 + $0x200] sm:$0xf]  ;;  %v4515_v31 = vor.u32 %v6733_v18, %v4514_v17  ;;  %1702 = vmatpush.bf16.msra.mxu3 %v5315_v24  ;;  %v5412_v17 = vld [vmem:[#allocation2 + $0x720] sm:$0xf0]  ;;  %v7485_v18 = vpack.c.b16 %v367_v8, %v367_v8  ;;  %v5159_v24 = vor.u32 %v6889_v13, %v5156_v14  ;;  %v5002_v8 = vld [vmem:[#allocation2 + $0x3c8] sm:$0xf] }
  0x4a   :  { %v6797_v22 = vld [vmem:[#allocation2 + $0x21c] sm:$0xf0]  ;;  %v5415_v28 = vor.u32 %v6953_v16, %v5412_v17  ;;  %v5092_v43 = vld [vmem:[#allocation2 + $0x4a0] sm:$0xf0]  ;;  %v6982_v16 = vld [vmem:[#allocation2 + $0x7e4] sm:$0xf0] }
  0x4b   :  { %v5026_v23 = vld [vmem:[#allocation2 + $0x400] sm:$0xf]  ;;  %v4771_v35 = vor.u32 %v6797_v22, %v4770_v21  ;;  %1664 = vmatpush.bf16.msra.mxu0 %v4515_v31  ;;  %v4647_v21 = vor.u32 %v6761_v5, %v4644_v6  ;;  %v5124_v31 = vld [vmem:[#allocation2 + $0x4e0] sm:$0xf0]  ;;  %v4746_v6 = vld [vmem:[#allocation2 + $0x1c8] sm:$0xf] }
  0x4c   :  { %v6861_v25 = vld [vmem:[#allocation2 + $0x41c] sm:$0xf0]  ;;  %v6937_v44 = vld [vmem:[#allocation2 + $0x684] sm:$0xf] }
  0x4d   :  { %v5282_v26 = vld [vmem:[#allocation2 + $0x600] sm:$0xf]  ;;  %v5027_v36 = vor.u32 %v6861_v25, %v5026_v23  ;;  %1677 = vmatpush.bf16.msra.mxu1 %v4771_v35  ;;  %v4903_v23 = vor.u32 %v6825_v7, %v4900_v12  ;;  %v6753_v25 = vld [vmem:[#allocation2 + $0xc4] sm:$0xf]  ;;  %v6790_v7 = vld [vmem:[#allocation2 + $0x1e4] sm:$0xf0] }
  0x4e   :  { %v6925_v27 = vld [vmem:[#allocation2 + $0x61c] sm:$0xf0]  ;;  %v5348_v45 = vld [vmem:[#allocation2 + $0x6a0] sm:$0xf0]  ;;  %v6918_v12 = vld [vmem:[#allocation2 + $0x5e4] sm:$0xf0] }
  0x4f   :  { %v5283_v39 = vor.u32 %v6925_v27, %v5282_v26  ;;  %1690 = vmatpush.bf16.msra.mxu2 %v5027_v36  ;;  %1709 = vmatpush.bf16.msrb.mxu0 %v4743_v40  ;;  %v87_v3 = vld [vmem:[%s7686_s0] sm:$0xff]  ;;  %v5127_v36 = vor.u32 %v6881_v30, %v5124_v31  ;;  %v5383_v40 = vor.u32 %v6945_v32, %v5380_v33  ;;  %v5226_v30 = vld [vmem:[#allocation2 + $0x588] sm:$0xf] }
  0x50   :  { %v365_v9 = vunpack.c.l.b16 %v87_v3  ;;  %v366_v15 = vunpack.c.h.b16 %v87_v3  ;;  %v4612_v26 = vld [vmem:[#allocation2 + $0xe0] sm:$0xf0]  ;;  %v6910_v31 = vld [vmem:[#allocation2 + $0x5a4] sm:$0xf0] }
  0x51   :  { %1703 = vmatpush.bf16.msra.mxu3 %v5283_v39  ;;  %1722 = vmatpush.bf16.msrb.mxu1 %v4999_v41  ;;  %v6817_v27 = vld [vmem:[#allocation2 + $0x2c4] sm:$0xf]  ;;  %v4615_v34 = vor.u32 %v6753_v25, %v4612_v26  ;;  %v4714_v25 = vld [vmem:[#allocation2 + $0x188] sm:$0xf] }
  0x52   :  { %v7487_v19 = vpack.c.b16 %v365_v9, %v365_v9  ;;  %v7491_v22 = vpack.c.b16 %v366_v15, %v366_v15  ;;  %1691 = vmatmul.bf16.vlgmr.msra.gmra.mxu2 %v7485_v18  ;;  %v4871_v35 = vor.u32 %v6817_v27, %v4868_v29  ;;  %v6809_v39 = vld [vmem:[#allocation2 + $0x284] sm:$0xf]  ;;  %v5514_v15 = vld [vmem:[#allocation2 + $0x7c8] sm:$0xf] }
  0x53   :  { %1735 = vmatpush.bf16.msrb.mxu2 %v5255_v42  ;;  %1710 = vmatpush.bf16.msrb.mxu0 %v4711_v52  ;;  %v4836_v41 = vld [vmem:[#allocation2 + $0x2a0] sm:$0xf0]  ;;  %v5351_v52 = vor.u32 %v6937_v44, %v5348_v45  ;;  %v6782_v26 = vld [vmem:[#allocation2 + $0x1a4] sm:$0xf0] }
  0x54   :  { %1665 = vmatmul.bf16.vlgmr.msra.gmra.mxu0 %v7487_v19  ;;  %1704 = vmatmul.bf16.vlgmr.msra.gmra.mxu3 %v7489_v20  ;;  %v6873_v42 = vld [vmem:[#allocation2 + $0x484] sm:$0xf]  ;;  %v4839_v47 = vor.u32 %v6809_v39, %v4836_v41  ;;  %v4970_v27 = vld [vmem:[#allocation2 + $0x388] sm:$0xf] }
  0x55   :  { %1748 = vmatpush.bf16.msrb.mxu3 %v5511_v46  ;;  %1723 = vmatpush.bf16.msrb.mxu1 %v4967_v54  ;;  %v4583_v46 = vor.u32 %v6745_v37, %v4580_v38  ;;  %v5095_v48 = vor.u32 %v6873_v42, %v5092_v43  ;;  %v6737_v49 = vld [vmem:[#allocation2 + $0x44] sm:$0xf]  ;;  %v6846_v29 = vld [vmem:[#allocation2 + $0x3a4] sm:$0xf0] }
  0x56   :  { %1678 = vmatmul.bf16.vlgmr.msra.gmra.mxu1 %v7491_v22  ;;  %v4548_v50 = vld [vmem:[#allocation2 + $0x60] sm:$0xf0]  ;;  %v5482_v32 = vld [vmem:[#allocation2 + $0x788] sm:$0xf] }
  0x57   :  { %1736 = vmatpush.bf16.msrb.mxu2 %v5223_v55  ;;  %1711 = vmatpush.bf16.msrb.mxu0 %v4679_v0  ;;  %v6801_v51 = vld [vmem:[#allocation2 + $0x244] sm:$0xf]  ;;  %v4551_v58 = vor.u32 %v6737_v49, %v4548_v50  ;;  %v6974_v33 = vld [vmem:[#allocation2 + $0x7a4] sm:$0xf0] }
  0x58   :  { %v4804_v53 = vld [vmem:[#allocation2 + $0x260] sm:$0xf0]  ;;  %v4682_v37 = vld [vmem:[#allocation2 + $0x148] sm:$0xf] }
  0x59   :  { %1749 = vmatpush.bf16.msrb.mxu3 %v5479_v59  ;;  %1724 = vmatpush.bf16.msrb.mxu1 %v4935_v1  ;;  %v6865_v54 = vld [vmem:[#allocation2 + $0x444] sm:$0xf]  ;;  %v4807_v61 = vor.u32 %v6801_v51, %v4804_v53  ;;  %v6774_v38 = vld [vmem:[#allocation2 + $0x164] sm:$0xf0] }
  0x5a   :  { %v5060_v55 = vld [vmem:[#allocation2 + $0x460] sm:$0xf0]  ;;  %v4938_v39 = vld [vmem:[#allocation2 + $0x348] sm:$0xf] }
  0x5b   :  { %1737 = vmatpush.bf16.msrb.mxu2 %v5191_v4  ;;  %1712 = vmatpush.bf16.msrb.mxu0 %v4647_v21  ;;  %v6929_v56 = vld [vmem:[#allocation2 + $0x644] sm:$0xf]  ;;  %v5063_v62 = vor.u32 %v6865_v54, %v5060_v55  ;;  %v4747_v21 = vor.u32 %v6790_v7, %v4746_v6  ;;  %v6838_v41 = vld [vmem:[#allocation2 + $0x364] sm:$0xf0] }
  0x5c   :  { %v5316_v57 = vld [vmem:[#allocation2 + $0x660] sm:$0xf0]  ;;  %v5194_v42 = vld [vmem:[#allocation2 + $0x548] sm:$0xf] }
  0x5d   :  { %1750 = vmatpush.bf16.msrb.mxu3 %v5447_v11  ;;  %1725 = vmatpush.bf16.msrb.mxu1 %v4903_v23  ;;  %v6729_v59 = vld [vmem:[#allocation2 + $0x4] sm:$0xf]  ;;  %v5319_v2 = vor.u32 %v6929_v56, %v5316_v57  ;;  %v5258_v11 = vld [vmem:[#allocation2 + $0x5c8] sm:$0xf]  ;;  %v5003_v23 = vor.u32 %v6854_v10, %v5002_v8 }
  0x5e   :  { %v4516_v60 = vld [vmem:[#allocation2 + $0x20] sm:$0xf0]  ;;  %v6902_v43 = vld [vmem:[#allocation2 + $0x564] sm:$0xf0] }
  0x5f   :  { %1738 = vmatpush.bf16.msrb.mxu2 %v5159_v24  ;;  %1713 = vmatpush.bf16.msrb.mxu0 %v4615_v34  ;;  %v6793_v63 = vld [vmem:[#allocation2 + $0x204] sm:$0xf]  ;;  %v4519_v9 = vor.u32 %v6729_v59, %v4516_v60  ;;  %v5259_v24 = vor.u32 %v6918_v12, %v5258_v11  ;;  %v4715_v34 = vor.u32 %v6782_v26, %v4714_v25  ;;  %v5450_v44 = vld [vmem:[#allocation2 + $0x748] sm:$0xf] }
  0x60   :  { %v4772_v0 = vld [vmem:[#allocation2 + $0x220] sm:$0xf0]  ;;  %v6966_v45 = vld [vmem:[#allocation2 + $0x764] sm:$0xf0] }
  0x61   :  { %1751 = vmatpush.bf16.msrb.mxu3 %v5415_v28  ;;  %1726 = vmatpush.bf16.msrb.mxu1 %v4871_v35  ;;  %v6857_v1 = vld [vmem:[#allocation2 + $0x404] sm:$0xf]  ;;  %v4775_v13 = vor.u32 %v6793_v63, %v4772_v0  ;;  %v5515_v28 = vor.u32 %v6982_v16, %v5514_v15  ;;  %v4971_v35 = vor.u32 %v6846_v29, %v4970_v27  ;;  %v4650_v49 = vld [vmem:[#allocation2 + $0x108] sm:$0xf] }
  0x62   :  { %v5028_v3 = vld [vmem:[#allocation2 + $0x420] sm:$0xf0]  ;;  %v6766_v50 = vld [vmem:[#allocation2 + $0x124] sm:$0xf0] }
  0x63   :  { %1739 = vmatpush.bf16.msrb.mxu2 %v5127_v36  ;;  %1714 = vmatpush.bf16.msrb.mxu0 %v4583_v46  ;;  %v6921_v4 = vld [vmem:[#allocation2 + $0x604] sm:$0xf]  ;;  %v5031_v14 = vor.u32 %v6857_v1, %v5028_v3  ;;  %v5227_v36 = vor.u32 %v6910_v31, %v5226_v30  ;;  %v4683_v46 = vor.u32 %v6774_v38, %v4682_v37  ;;  %v4906_v51 = vld [vmem:[#allocation2 + $0x308] sm:$0xf] }
  0x64   :  { %v5284_v5 = vld [vmem:[#allocation2 + $0x620] sm:$0xf0]  ;;  %v6830_v53 = vld [vmem:[#allocation2 + $0x324] sm:$0xf0] }
  0x65   :  { %1752 = vmatpush.bf16.msrb.mxu3 %v5383_v40  ;;  %1727 = vmatpush.bf16.msrb.mxu1 %v4839_v47  ;;  %v5287_v17 = vor.u32 %v6921_v4, %v5284_v5  ;;  %v5483_v40 = vor.u32 %v6974_v33, %v5482_v32  ;;  %v4939_v47 = vor.u32 %v6838_v41, %v4938_v39  ;;  %v5162_v54 = vld [vmem:[#allocation2 + $0x508] sm:$0xf] }
  0x66   :  { %v6894_v55 = vld [vmem:[#allocation2 + $0x524] sm:$0xf0]  ;;  %v4907_v59 = vor.u32 %v6830_v53, %v4906_v51  ;;  %v6914_v51 = vld [vmem:[#allocation2 + $0x5cc] sm:$0xf] }
  0x67   :  { %1740 = vmatpush.bf16.msrb.mxu2 %v5095_v48  ;;  %1715 = vmatpush.bf16.msrb.mxu0 %v4551_v58  ;;  %v5195_v48 = vor.u32 %v6902_v43, %v5194_v42  ;;  %v5418_v56 = vld [vmem:[#allocation2 + $0x708] sm:$0xf]  ;;  %v4651_v58 = vor.u32 %v6766_v50, %v4650_v49  ;;  %v5163_v60 = vor.u32 %v6894_v55, %v5162_v54  ;;  %v5004_v50 = vld [vmem:[#allocation2 + $0x3e8] sm:$0xf0] }
  0x68   :  { %v6958_v57 = vld [vmem:[#allocation2 + $0x724] sm:$0xf0]  ;;  %v6978_v55 = vld [vmem:[#allocation2 + $0x7cc] sm:$0xf] }
  0x69   :  { %1753 = vmatpush.bf16.msrb.mxu3 %v5351_v52  ;;  %1728 = vmatpush.bf16.msrb.mxu1 %v4807_v61  ;;  %v5451_v52 = vor.u32 %v6966_v45, %v5450_v44  ;;  %v4618_v61 = vld [vmem:[#allocation2 + $0xc8] sm:$0xf]  ;;  %v5419_v0 = vor.u32 %v6958_v57, %v5418_v56  ;;  %v5516_v56 = vld [vmem:[#allocation2 + $0x7e8] sm:$0xf0] }
  0x6a   :  { %v4874_v63 = vld [vmem:[#allocation2 + $0x2c8] sm:$0xf] }
  0x6b   :  { %1741 = vmatpush.bf16.msrb.mxu2 %v5063_v62  ;;  %1716 = vmatpush.bf16.msrb.mxu0 %v4519_v9  ;;  %v6758_v62 = vld [vmem:[#allocation2 + $0xe4] sm:$0xf0] }
  0x6c   :  { %v6822_v1 = vld [vmem:[#allocation2 + $0x2e4] sm:$0xf0]  ;;  %v4619_v6 = vor.u32 %v6758_v62, %v4618_v61  ;;  %v6778_v61 = vld [vmem:[#allocation2 + $0x18c] sm:$0xf] }
  0x6d   :  { %1754 = vmatpush.bf16.msrb.mxu3 %v5319_v2  ;;  %1729 = vmatpush.bf16.msrb.mxu1 %v4775_v13  ;;  %v5130_v2 = vld [vmem:[#allocation2 + $0x4c8] sm:$0xf]  ;;  %v4875_v9 = vor.u32 %v6822_v1, %v4874_v63  ;;  %v4716_v62 = vld [vmem:[#allocation2 + $0x1a8] sm:$0xf0] }
  0x6e   :  { %1717 = vmatmul.bf16.vlgmr.msrb.gmra.mxu0 %v7487_v19  ;;  %v6886_v3 = vld [vmem:[#allocation2 + $0x4e4] sm:$0xf0]  ;;  %v6842_v63 = vld [vmem:[#allocation2 + $0x38c] sm:$0xf] }
  0x6f   :  { %1742 = vmatpush.bf16.msrb.mxu2 %v5031_v14  ;;  %1761 = vmatpush.bf16.msra.mxu0 %v4747_v21  ;;  %v5386_v4 = vld [vmem:[#allocation2 + $0x6c8] sm:$0xf]  ;;  %v5131_v10 = vor.u32 %v6886_v3, %v5130_v2  ;;  %v4972_v1 = vld [vmem:[#allocation2 + $0x3a8] sm:$0xf0] }
  0x70   :  { %1730 = vmatmul.bf16.vlgmr.msrb.gmra.mxu1 %v7491_v22  ;;  %v6950_v5 = vld [vmem:[#allocation2 + $0x6e4] sm:$0xf0]  ;;  %v6906_v2 = vld [vmem:[#allocation2 + $0x58c] sm:$0xf] }
  0x71   :  { %1755 = vmatpush.bf16.msrb.mxu3 %v5287_v17  ;;  %1774 = vmatpush.bf16.msra.mxu1 %v5003_v23  ;;  %v4586_v7 = vld [vmem:[#allocation2 + $0x88] sm:$0xf]  ;;  %v5387_v14 = vor.u32 %v6950_v5, %v5386_v4  ;;  %v5228_v3 = vld [vmem:[#allocation2 + $0x5a8] sm:$0xf0] }
  0x72   :  { %1743 = vmatmul.bf16.vlgmr.msrb.gmra.mxu2 %v7485_v18  ;;  %v6750_v8 = vld [vmem:[#allocation2 + $0xa4] sm:$0xf0]  ;;  %v6970_v4 = vld [vmem:[#allocation2 + $0x78c] sm:$0xf] }
  0x73   :  { %1787 = vmatpush.bf16.msra.mxu2 %v5259_v24  ;;  %1762 = vmatpush.bf16.msra.mxu0 %v4715_v34  ;;  %v4842_v11 = vld [vmem:[#allocation2 + $0x288] sm:$0xf]  ;;  %v4587_v21 = vor.u32 %v6750_v8, %v4586_v7  ;;  %v5484_v5 = vld [vmem:[#allocation2 + $0x7a8] sm:$0xf0]  ;;  %v4975_v7 = vor.u32 %v6842_v63, %v4972_v1  ;;  %v5231_v8 = vor.u32 %v6906_v2, %v5228_v3 }
  0x74   :  { %1756 = vmatmul.bf16.vlgmr.msrb.gmra.mxu3 %v7489_v20  ;;  %v6814_v12 = vld [vmem:[#allocation2 + $0x2a4] sm:$0xf0]  ;;  %v6802_v63 = vld [vmem:[#allocation2 + $0x24c] sm:$0xf] }
  0x75   :  { %1800 = vmatpush.bf16.msra.mxu3 %v5515_v28  ;;  %1775 = vmatpush.bf16.msra.mxu1 %v4971_v35  ;;  %v5098_v13 = vld [vmem:[#allocation2 + $0x488] sm:$0xf]  ;;  %v4843_v23 = vor.u32 %v6814_v12, %v4842_v11  ;;  %v6834_v11 = vld [vmem:[#allocation2 + $0x34c] sm:$0xf]  ;;  %v5487_v12 = vor.u32 %v6970_v4, %v5484_v5 }
  0x76   :  { %v6878_v15 = vld [vmem:[#allocation2 + $0x4a4] sm:$0xf0]  ;;  %v4812_v1 = vld [vmem:[#allocation2 + $0x268] sm:$0xf0] }
  0x77   :  { %1788 = vmatpush.bf16.msra.mxu2 %v5227_v36  ;;  %1763 = vmatpush.bf16.msra.mxu0 %v4683_v46  ;;  %v5354_v16 = vld [vmem:[#allocation2 + $0x688] sm:$0xf]  ;;  %v5099_v24 = vor.u32 %v6878_v15, %v5098_v13  ;;  %v6786_v46 = vld [vmem:[#allocation2 + $0x1cc] sm:$0xf] }
  0x78   :  { %v6942_v17 = vld [vmem:[#allocation2 + $0x6a4] sm:$0xf0]  ;;  %v4940_v13 = vld [vmem:[#allocation2 + $0x368] sm:$0xf0] }
  0x79   :  { %1801 = vmatpush.bf16.msra.mxu3 %v5483_v40  ;;  %1776 = vmatpush.bf16.msra.mxu1 %v4939_v47  ;;  %v4554_v25 = vld [vmem:[#allocation2 + $0x48] sm:$0xf]  ;;  %v5355_v28 = vor.u32 %v6942_v17, %v5354_v16  ;;  %v4748_v47 = vld [vmem:[#allocation2 + $0x1e8] sm:$0xf0] }
  0x7a   :  { %v6742_v26 = vld [vmem:[#allocation2 + $0x64] sm:$0xf0]  ;;  %v5196_v15 = vld [vmem:[#allocation2 + $0x568] sm:$0xf0] }
  0x7b   :  { %1789 = vmatpush.bf16.msra.mxu2 %v5195_v48  ;;  %1764 = vmatpush.bf16.msra.mxu0 %v4651_v58  ;;  %v4810_v27 = vld [vmem:[#allocation2 + $0x248] sm:$0xf]  ;;  %v4555_v34 = vor.u32 %v6742_v26, %v4554_v25  ;;  %v6850_v48 = vld [vmem:[#allocation2 + $0x3cc] sm:$0xf]  ;;  %v4751_v58 = vor.u32 %v6786_v46, %v4748_v47 }
  0x7c   :  { %v6806_v29 = vld [vmem:[#allocation2 + $0x264] sm:$0xf0]  ;;  %v6962_v16 = vld [vmem:[#allocation2 + $0x74c] sm:$0xf] }
  0x7d   :  { %1802 = vmatpush.bf16.msra.mxu3 %v5451_v52  ;;  %1777 = vmatpush.bf16.msra.mxu1 %v4907_v59  ;;  %v5066_v30 = vld [vmem:[#allocation2 + $0x448] sm:$0xf]  ;;  %v4811_v37 = vor.u32 %v6806_v29, %v4810_v27  ;;  %v5260_v52 = vld [vmem:[#allocation2 + $0x5e8] sm:$0xf0]  ;;  %v5007_v59 = vor.u32 %v6850_v48, %v5004_v50 }
  0x7e   :  { %v6870_v31 = vld [vmem:[#allocation2 + $0x464] sm:$0xf0]  ;;  %v5452_v17 = vld [vmem:[#allocation2 + $0x768] sm:$0xf0] }
  0x7f   :  { %1790 = vmatpush.bf16.msra.mxu2 %v5163_v60  ;;  %1765 = vmatpush.bf16.msra.mxu0 %v4619_v6  ;;  %v5322_v32 = vld [vmem:[#allocation2 + $0x648] sm:$0xf]  ;;  %v5067_v38 = vor.u32 %v6870_v31, %v5066_v30  ;;  %v5263_v60 = vor.u32 %v6914_v51, %v5260_v52  ;;  %v4719_v6 = vor.u32 %v6778_v61, %v4716_v62  ;;  %v6762_v25 = vld [vmem:[#allocation2 + $0x10c] sm:$0xf] }
  0x80   :  { %v6934_v33 = vld [vmem:[#allocation2 + $0x664] sm:$0xf0]  ;;  %v4652_v26 = vld [vmem:[#allocation2 + $0x128] sm:$0xf0] }
  0x81   :  { %1803 = vmatpush.bf16.msra.mxu3 %v5419_v0  ;;  %1778 = vmatpush.bf16.msra.mxu1 %v4875_v9  ;;  %v4522_v35 = vld [vmem:[#allocation2 + $0x8] sm:$0xf]  ;;  %v5323_v42 = vor.u32 %v6934_v33, %v5322_v32  ;;  %v5519_v0 = vor.u32 %v6978_v55, %v5516_v56  ;;  %v6770_v9 = vld [vmem:[#allocation2 + $0x14c] sm:$0xf] }
  0x82   :  { %v6734_v36 = vld [vmem:[#allocation2 + $0x24] sm:$0xf0]  ;;  %v6826_v27 = vld [vmem:[#allocation2 + $0x30c] sm:$0xf] }
  0x83   :  { %1791 = vmatpush.bf16.msra.mxu2 %v5131_v10  ;;  %1766 = vmatpush.bf16.msra.mxu0 %v4587_v21  ;;  %v4778_v39 = vld [vmem:[#allocation2 + $0x208] sm:$0xf]  ;;  %v4523_v49 = vor.u32 %v6734_v36, %v4522_v35  ;;  %v4684_v10 = vld [vmem:[#allocation2 + $0x168] sm:$0xf0] }
  0x84   :  { %v6798_v40 = vld [vmem:[#allocation2 + $0x224] sm:$0xf0]  ;;  %v4687_v21 = vor.u32 %v6770_v9, %v4684_v10  ;;  %v4908_v29 = vld [vmem:[#allocation2 + $0x328] sm:$0xf0]  ;;  %v4815_v9 = vor.u32 %v6802_v63, %v4812_v1  ;;  %v4914_v63 = vld [vmem:[#allocation2 + $0x310] sm:$0xf] }
  0x85   :  { %1804 = vmatpush.bf16.msra.mxu3 %v5387_v14  ;;  %1779 = vmatpush.bf16.msra.mxu1 %v4843_v23  ;;  %v5034_v41 = vld [vmem:[#allocation2 + $0x408] sm:$0xf]  ;;  %v4779_v53 = vor.u32 %v6798_v40, %v4778_v39  ;;  %v6898_v14 = vld [vmem:[#allocation2 + $0x54c] sm:$0xf]  ;;  %v4943_v23 = vor.u32 %v6834_v11, %v4940_v13  ;;  %v4911_v35 = vor.u32 %v6826_v27, %v4908_v29  ;;  %v5266_v27 = vld [vmem:[#allocation2 + $0x5d0] sm:$0xf] }
  0x86   :  { %v6862_v43 = vld [vmem:[#allocation2 + $0x424] sm:$0xf0]  ;;  %v6890_v30 = vld [vmem:[#allocation2 + $0x50c] sm:$0xf]  ;;  %v6831_v1 = vld [vmem:[#allocation2 + $0x32c] sm:$0xf0] }
  0x87   :  { %1792 = vmatpush.bf16.msra.mxu2 %v5099_v24  ;;  %v5290_v44 = vld [vmem:[#allocation2 + $0x608] sm:$0xf]  ;;  %1767 = vmatpush.bf16.msra.mxu0 %v4555_v34  ;;  %v5035_v54 = vor.u32 %v6862_v43, %v5034_v41  ;;  %v5199_v24 = vor.u32 %v6898_v14, %v5196_v15  ;;  %v5164_v31 = vld [vmem:[#allocation2 + $0x528] sm:$0xf0]  ;;  %v4655_v34 = vor.u32 %v6762_v25, %v4652_v26  ;;  %v6855_v26 = vld [vmem:[#allocation2 + $0x3ec] sm:$0xf0] }
  0x88   :  { %v6926_v45 = vld [vmem:[#allocation2 + $0x624] sm:$0xf0]  ;;  %v6954_v32 = vld [vmem:[#allocation2 + $0x70c] sm:$0xf]  ;;  %v5167_v36 = vor.u32 %v6890_v30, %v5164_v31  ;;  %v5522_v31 = vld [vmem:[#allocation2 + $0x7d0] sm:$0xf] }
  0x89   :  { %1805 = vmatpush.bf16.msra.mxu3 %v5355_v28  ;;  %1780 = vmatpush.bf16.msra.mxu1 %v4811_v37  ;;  %v5291_v57 = vor.u32 %v6926_v45, %v5290_v44  ;;  %v5455_v28 = vor.u32 %v6962_v16, %v5452_v17  ;;  %v5420_v33 = vld [vmem:[#allocation2 + $0x728] sm:$0xf0] }
  0x8a   :  { %v6754_v37 = vld [vmem:[#allocation2 + $0xcc] sm:$0xf]  ;;  %v5423_v40 = vor.u32 %v6954_v32, %v5420_v33  ;;  %v6983_v32 = vld [vmem:[#allocation2 + $0x7ec] sm:$0xf0] }
  0x8b   :  { %1793 = vmatpush.bf16.msra.mxu2 %v5067_v38  ;;  %1768 = vmatpush.bf16.msra.mxu0 %v4523_v49  ;;  %v4620_v38 = vld [vmem:[#allocation2 + $0xe8] sm:$0xf0] }
  0x8c   :  { %v6818_v39 = vld [vmem:[#allocation2 + $0x2cc] sm:$0xf]  ;;  %v4623_v46 = vor.u32 %v6754_v37, %v4620_v38  ;;  %v4722_v37 = vld [vmem:[#allocation2 + $0x190] sm:$0xf] }
  0x8d   :  { %1806 = vmatpush.bf16.msra.mxu3 %v5323_v42  ;;  %1781 = vmatpush.bf16.msra.mxu1 %v4779_v53  ;;  %v4876_v41 = vld [vmem:[#allocation2 + $0x2e8] sm:$0xf0]  ;;  %v6783_v38 = vld [vmem:[#allocation2 + $0x1ac] sm:$0xf0] }
  0x8e   :  { %1769 = vmatmul.bf16.vlgmr.msra.gmra.mxu0 %v7487_v19  ;;  %v6882_v42 = vld [vmem:[#allocation2 + $0x4cc] sm:$0xf]  ;;  %v4879_v47 = vor.u32 %v6818_v39, %v4876_v41  ;;  %v4978_v39 = vld [vmem:[#allocation2 + $0x390] sm:$0xf] }
  0x8f   :  { %1794 = vmatpush.bf16.msra.mxu2 %v5035_v54  ;;  %1813 = vmatpush.bf16.msrb.mxu0 %v4751_v58  ;;  %v5132_v43 = vld [vmem:[#allocation2 + $0x4e8] sm:$0xf0]  ;;  %v6847_v41 = vld [vmem:[#allocation2 + $0x3ac] sm:$0xf0] }
  0x90   :  { %1782 = vmatmul.bf16.vlgmr.msra.gmra.mxu1 %v7491_v22  ;;  %v6946_v44 = vld [vmem:[#allocation2 + $0x6cc] sm:$0xf]  ;;  %v5135_v48 = vor.u32 %v6882_v42, %v5132_v43  ;;  %v5234_v42 = vld [vmem:[#allocation2 + $0x590] sm:$0xf] }
  0x91   :  { %1807 = vmatpush.bf16.msra.mxu3 %v5291_v57  ;;  %1826 = vmatpush.bf16.msrb.mxu1 %v5007_v59  ;;  %v5388_v45 = vld [vmem:[#allocation2 + $0x6e8] sm:$0xf0]  ;;  %v6911_v43 = vld [vmem:[#allocation2 + $0x5ac] sm:$0xf0] }
  0x92   :  { %1795 = vmatmul.bf16.vlgmr.msra.gmra.mxu2 %v7485_v18  ;;  %v6746_v49 = vld [vmem:[#allocation2 + $0x8c] sm:$0xf]  ;;  %v5391_v52 = vor.u32 %v6946_v44, %v5388_v45  ;;  %v5490_v44 = vld [vmem:[#allocation2 + $0x790] sm:$0xf] }
  0x93   :  { %1839 = vmatpush.bf16.msrb.mxu2 %v5263_v60  ;;  %1814 = vmatpush.bf16.msrb.mxu0 %v4719_v6  ;;  %v4588_v50 = vld [vmem:[#allocation2 + $0xa8] sm:$0xf0]  ;;  %v6975_v45 = vld [vmem:[#allocation2 + $0x7ac] sm:$0xf0] }
  0x94   :  { %1808 = vmatmul.bf16.vlgmr.msra.gmra.mxu3 %v7489_v20  ;;  %v6810_v51 = vld [vmem:[#allocation2 + $0x28c] sm:$0xf]  ;;  %v4591_v58 = vor.u32 %v6746_v49, %v4588_v50  ;;  %v4690_v49 = vld [vmem:[#allocation2 + $0x150] sm:$0xf] }
  0x95   :  { %1852 = vmatpush.bf16.msrb.mxu3 %v5519_v0  ;;  %1827 = vmatpush.bf16.msrb.mxu1 %v4975_v7  ;;  %v4844_v53 = vld [vmem:[#allocation2 + $0x2a8] sm:$0xf0]  ;;  %v6775_v50 = vld [vmem:[#allocation2 + $0x16c] sm:$0xf0] }
  0x96   :  { %v6874_v54 = vld [vmem:[#allocation2 + $0x48c] sm:$0xf]  ;;  %v4847_v59 = vor.u32 %v6810_v51, %v4844_v53  ;;  %v4946_v51 = vld [vmem:[#allocation2 + $0x350] sm:$0xf] }
  0x97   :  { %1840 = vmatpush.bf16.msrb.mxu2 %v5231_v8  ;;  %1815 = vmatpush.bf16.msrb.mxu0 %v4687_v21  ;;  %v5100_v55 = vld [vmem:[#allocation2 + $0x4a8] sm:$0xf0]  ;;  %v4754_v21 = vld [vmem:[#allocation2 + $0x1d0] sm:$0xf] }
  0x98   :  { %v6938_v56 = vld [vmem:[#allocation2 + $0x68c] sm:$0xf]  ;;  %v5103_v60 = vor.u32 %v6874_v54, %v5100_v55  ;;  %v6839_v53 = vld [vmem:[#allocation2 + $0x36c] sm:$0xf0] }
  0x99   :  { %1853 = vmatpush.bf16.msrb.mxu3 %v5487_v12  ;;  %1828 = vmatpush.bf16.msrb.mxu1 %v4943_v23  ;;  %v5356_v57 = vld [vmem:[#allocation2 + $0x6a8] sm:$0xf0]  ;;  %v6791_v23 = vld [vmem:[#allocation2 + $0x1ec] sm:$0xf0] }
  0x9a   :  { %v6738_v61 = vld [vmem:[#allocation2 + $0x4c] sm:$0xf]  ;;  %v5359_v0 = vor.u32 %v6938_v56, %v5356_v57  ;;  %v5202_v54 = vld [vmem:[#allocation2 + $0x550] sm:$0xf] }
  0x9b   :  { %1841 = vmatpush.bf16.msrb.mxu2 %v5199_v24  ;;  %1816 = vmatpush.bf16.msrb.mxu0 %v4655_v34  ;;  %v4556_v62 = vld [vmem:[#allocation2 + $0x68] sm:$0xf0]  ;;  %v5010_v24 = vld [vmem:[#allocation2 + $0x3d0] sm:$0xf]  ;;  %v4755_v34 = vor.u32 %v6791_v23, %v4754_v21 }
  0x9c   :  { %v6866_v2 = vld [vmem:[#allocation2 + $0x44c] sm:$0xf]  ;;  %v4559_v6 = vor.u32 %v6738_v61, %v4556_v62  ;;  %v6903_v55 = vld [vmem:[#allocation2 + $0x56c] sm:$0xf0] }
  0x9d   :  { %1854 = vmatpush.bf16.msrb.mxu3 %v5455_v28  ;;  %1829 = vmatpush.bf16.msrb.mxu1 %v4911_v35  ;;  %v5068_v3 = vld [vmem:[#allocation2 + $0x468] sm:$0xf0]  ;;  %v6919_v28 = vld [vmem:[#allocation2 + $0x5ec] sm:$0xf0]  ;;  %v5011_v35 = vor.u32 %v6855_v26, %v5010_v24 }
  0x9e   :  { %v6930_v4 = vld [vmem:[#allocation2 + $0x64c] sm:$0xf]  ;;  %v5071_v10 = vor.u32 %v6866_v2, %v5068_v3  ;;  %v5458_v56 = vld [vmem:[#allocation2 + $0x750] sm:$0xf] }
  0x9f   :  { %1842 = vmatpush.bf16.msrb.mxu2 %v5167_v36  ;;  %1817 = vmatpush.bf16.msrb.mxu0 %v4623_v46  ;;  %v5324_v5 = vld [vmem:[#allocation2 + $0x668] sm:$0xf0]  ;;  %v5267_v36 = vor.u32 %v6919_v28, %v5266_v27  ;;  %v4723_v46 = vor.u32 %v6783_v38, %v4722_v37  ;;  %v6967_v57 = vld [vmem:[#allocation2 + $0x76c] sm:$0xf0] }
  0xa0   :  { %v6730_v7 = vld [vmem:[#allocation2 + $0xc] sm:$0xf]  ;;  %v5327_v14 = vor.u32 %v6930_v4, %v5324_v5  ;;  %v4658_v61 = vld [vmem:[#allocation2 + $0x110] sm:$0xf] }
  0xa1   :  { %1855 = vmatpush.bf16.msrb.mxu3 %v5423_v40  ;;  %1830 = vmatpush.bf16.msrb.mxu1 %v4879_v47  ;;  %v4524_v8 = vld [vmem:[#allocation2 + $0x28] sm:$0xf0]  ;;  %v5523_v40 = vor.u32 %v6983_v32, %v5522_v31  ;;  %v4979_v47 = vor.u32 %v6847_v41, %v4978_v39  ;;  %v6767_v62 = vld [vmem:[#allocation2 + $0x12c] sm:$0xf0] }
  0xa2   :  { %v6794_v11 = vld [vmem:[#allocation2 + $0x20c] sm:$0xf]  ;;  %v4527_v25 = vor.u32 %v6730_v7, %v4524_v8  ;;  %v5170_v2 = vld [vmem:[#allocation2 + $0x510] sm:$0xf]  ;;  %v4915_v7 = vor.u32 %v6831_v1, %v4914_v63  ;;  %v6915_v63 = vld [vmem:[#allocation2 + $0x5d4] sm:$0xf] }
  0xa3   :  { %1843 = vmatpush.bf16.msrb.mxu2 %v5135_v48  ;;  %1818 = vmatpush.bf16.msrb.mxu0 %v4591_v58  ;;  %v4780_v12 = vld [vmem:[#allocation2 + $0x228] sm:$0xf0]  ;;  %v5235_v48 = vor.u32 %v6911_v43, %v5234_v42  ;;  %v4691_v58 = vor.u32 %v6775_v50, %v4690_v49  ;;  %v6895_v3 = vld [vmem:[#allocation2 + $0x52c] sm:$0xf0] }
  0xa4   :  { %v6858_v13 = vld [vmem:[#allocation2 + $0x40c] sm:$0xf]  ;;  %v4783_v29 = vor.u32 %v6794_v11, %v4780_v12  ;;  %v5426_v4 = vld [vmem:[#allocation2 + $0x710] sm:$0xf]  ;;  %v5171_v8 = vor.u32 %v6895_v3, %v5170_v2  ;;  %v6979_v3 = vld [vmem:[#allocation2 + $0x7d4] sm:$0xf] }
  0xa5   :  { %1856 = vmatpush.bf16.msrb.mxu3 %v5391_v52  ;;  %1831 = vmatpush.bf16.msrb.mxu1 %v4847_v59  ;;  %v5036_v15 = vld [vmem:[#allocation2 + $0x428] sm:$0xf0]  ;;  %v5491_v52 = vor.u32 %v6975_v45, %v5490_v44  ;;  %v4947_v59 = vor.u32 %v6839_v53, %v4946_v51  ;;  %v6959_v5 = vld [vmem:[#allocation2 + $0x72c] sm:$0xf0] }
  0xa6   :  { %v6922_v16 = vld [vmem:[#allocation2 + $0x60c] sm:$0xf]  ;;  %v5039_v30 = vor.u32 %v6858_v13, %v5036_v15  ;;  %v4882_v11 = vld [vmem:[#allocation2 + $0x2d0] sm:$0xf]  ;;  %v5427_v12 = vor.u32 %v6959_v5, %v5426_v4  ;;  %v5524_v4 = vld [vmem:[#allocation2 + $0x7f0] sm:$0xf0] }
  0xa7   :  { %1844 = vmatpush.bf16.msrb.mxu2 %v5103_v60  ;;  %v5292_v17 = vld [vmem:[#allocation2 + $0x628] sm:$0xf0]  ;;  %1819 = vmatpush.bf16.msrb.mxu0 %v4559_v6  ;;  %v5203_v60 = vor.u32 %v6903_v55, %v5202_v54  ;;  %v4659_v6 = vor.u32 %v6767_v62, %v4658_v61  ;;  %v6823_v13 = vld [vmem:[#allocation2 + $0x2ec] sm:$0xf0]  ;;  %v5012_v62 = vld [vmem:[#allocation2 + $0x3f0] sm:$0xf0] }
  0xa8   :  { %v5295_v33 = vor.u32 %v6922_v16, %v5292_v17  ;;  %v6887_v15 = vld [vmem:[#allocation2 + $0x4ec] sm:$0xf0]  ;;  %v4883_v23 = vor.u32 %v6823_v13, %v4882_v11  ;;  %v6843_v11 = vld [vmem:[#allocation2 + $0x394] sm:$0xf] }
  0xa9   :  { %1857 = vmatpush.bf16.msrb.mxu3 %v5359_v0  ;;  %1832 = vmatpush.bf16.msrb.mxu1 %v4815_v9  ;;  %v5459_v0 = vor.u32 %v6967_v57, %v5458_v56  ;;  %v4626_v9 = vld [vmem:[#allocation2 + $0xd0] sm:$0xf]  ;;  %v4980_v13 = vld [vmem:[#allocation2 + $0x3b0] sm:$0xf0] }
  0xaa   :  { %v5394_v16 = vld [vmem:[#allocation2 + $0x6d0] sm:$0xf] }
  0xab   :  { %1845 = vmatpush.bf16.msrb.mxu2 %v5071_v10  ;;  %1820 = vmatpush.bf16.msrb.mxu0 %v4527_v25  ;;  %v6759_v10 = vld [vmem:[#allocation2 + $0xec] sm:$0xf0] }
  0xac   :  { %v6951_v17 = vld [vmem:[#allocation2 + $0x6ec] sm:$0xf0]  ;;  %v4627_v21 = vor.u32 %v6759_v10, %v4626_v9  ;;  %v6779_v9 = vld [vmem:[#allocation2 + $0x194] sm:$0xf] }
  0xad   :  { %1858 = vmatpush.bf16.msrb.mxu3 %v5327_v14  ;;  %1833 = vmatpush.bf16.msrb.mxu1 %v4783_v29  ;;  %v5138_v14 = vld [vmem:[#allocation2 + $0x4d0] sm:$0xf]  ;;  %v5395_v28 = vor.u32 %v6951_v17, %v5394_v16  ;;  %v4724_v10 = vld [vmem:[#allocation2 + $0x1b0] sm:$0xf0] }
  0xae   :  { %1821 = vmatmul.bf16.vlgmr.msrb.gmra.mxu0 %v7487_v19  ;;  %v5139_v24 = vor.u32 %v6887_v15, %v5138_v14  ;;  %v4594_v25 = vld [vmem:[#allocation2 + $0x90] sm:$0xf]  ;;  %v6907_v14 = vld [vmem:[#allocation2 + $0x594] sm:$0xf] }
  0xaf   :  { %1846 = vmatpush.bf16.msrb.mxu2 %v5039_v30  ;;  %1865 = vmatpush.bf16.msra.mxu0 %v4755_v34  ;;  %v6751_v26 = vld [vmem:[#allocation2 + $0xac] sm:$0xf0]  ;;  %v5236_v15 = vld [vmem:[#allocation2 + $0x5b0] sm:$0xf0] }
  0xb0   :  { %1834 = vmatmul.bf16.vlgmr.msrb.gmra.mxu1 %v7491_v22  ;;  %v4850_v27 = vld [vmem:[#allocation2 + $0x290] sm:$0xf]  ;;  %v4595_v34 = vor.u32 %v6751_v26, %v4594_v25  ;;  %v6971_v16 = vld [vmem:[#allocation2 + $0x794] sm:$0xf] }
  0xb1   :  { %1859 = vmatpush.bf16.msrb.mxu3 %v5295_v33  ;;  %1878 = vmatpush.bf16.msra.mxu1 %v5011_v35  ;;  %v6815_v29 = vld [vmem:[#allocation2 + $0x2ac] sm:$0xf0]  ;;  %v5492_v17 = vld [vmem:[#allocation2 + $0x7b0] sm:$0xf0] }
  0xb2   :  { %1847 = vmatmul.bf16.vlgmr.msrb.gmra.mxu2 %v7485_v18  ;;  %v5106_v30 = vld [vmem:[#allocation2 + $0x490] sm:$0xf]  ;;  %v4851_v35 = vor.u32 %v6815_v29, %v4850_v27  ;;  %v6771_v25 = vld [vmem:[#allocation2 + $0x154] sm:$0xf] }
  0xb3   :  { %1891 = vmatpush.bf16.msra.mxu2 %v5267_v36  ;;  %1866 = vmatpush.bf16.msra.mxu0 %v4723_v46  ;;  %v6879_v31 = vld [vmem:[#allocation2 + $0x4ac] sm:$0xf0]  ;;  %v4692_v26 = vld [vmem:[#allocation2 + $0x170] sm:$0xf0] }
  0xb4   :  { %1860 = vmatmul.bf16.vlgmr.msrb.gmra.mxu3 %v7489_v20  ;;  %v5362_v32 = vld [vmem:[#allocation2 + $0x690] sm:$0xf]  ;;  %v5107_v36 = vor.u32 %v6879_v31, %v5106_v30  ;;  %v6835_v27 = vld [vmem:[#allocation2 + $0x354] sm:$0xf] }
  0xb5   :  { %1904 = vmatpush.bf16.msra.mxu3 %v5523_v40  ;;  %1879 = vmatpush.bf16.msra.mxu1 %v4979_v47  ;;  %v6943_v33 = vld [vmem:[#allocation2 + $0x6ac] sm:$0xf0]  ;;  %v4948_v29 = vld [vmem:[#allocation2 + $0x370] sm:$0xf0] }
  0xb6   :  { %v4562_v37 = vld [vmem:[#allocation2 + $0x50] sm:$0xf]  ;;  %v5363_v40 = vor.u32 %v6943_v33, %v5362_v32  ;;  %v6899_v30 = vld [vmem:[#allocation2 + $0x554] sm:$0xf] }
  0xb7   :  { %1892 = vmatpush.bf16.msra.mxu2 %v5235_v48  ;;  %1867 = vmatpush.bf16.msra.mxu0 %v4691_v58  ;;  %v6743_v38 = vld [vmem:[#allocation2 + $0x6c] sm:$0xf0]  ;;  %v6787_v58 = vld [vmem:[#allocation2 + $0x1d4] sm:$0xf] }
  0xb8   :  { %v4818_v39 = vld [vmem:[#allocation2 + $0x250] sm:$0xf]  ;;  %v4563_v46 = vor.u32 %v6743_v38, %v4562_v37  ;;  %v5204_v31 = vld [vmem:[#allocation2 + $0x570] sm:$0xf0] }
  0xb9   :  { %1905 = vmatpush.bf16.msra.mxu3 %v5491_v52  ;;  %1880 = vmatpush.bf16.msra.mxu1 %v4947_v59  ;;  %v6807_v41 = vld [vmem:[#allocation2 + $0x26c] sm:$0xf0]  ;;  %v4756_v59 = vld [vmem:[#allocation2 + $0x1f0] sm:$0xf0] }
  0xba   :  { %v5074_v42 = vld [vmem:[#allocation2 + $0x450] sm:$0xf]  ;;  %v4819_v49 = vor.u32 %v6807_v41, %v4818_v39  ;;  %v6963_v32 = vld [vmem:[#allocation2 + $0x754] sm:$0xf] }
  0xbb   :  { %1893 = vmatpush.bf16.msra.mxu2 %v5203_v60  ;;  %1868 = vmatpush.bf16.msra.mxu0 %v4659_v6  ;;  %v6871_v43 = vld [vmem:[#allocation2 + $0x46c] sm:$0xf0]  ;;  %v6851_v60 = vld [vmem:[#allocation2 + $0x3d4] sm:$0xf]  ;;  %v4759_v6 = vor.u32 %v6787_v58, %v4756_v59 }
  0xbc   :  { %v5330_v44 = vld [vmem:[#allocation2 + $0x650] sm:$0xf]  ;;  %v5075_v50 = vor.u32 %v6871_v43, %v5074_v42  ;;  %v5460_v33 = vld [vmem:[#allocation2 + $0x770] sm:$0xf0] }
  0xbd   :  { %1906 = vmatpush.bf16.msra.mxu3 %v5459_v0  ;;  %1881 = vmatpush.bf16.msra.mxu1 %v4915_v7  ;;  %v6935_v45 = vld [vmem:[#allocation2 + $0x66c] sm:$0xf0]  ;;  %v5268_v0 = vld [vmem:[#allocation2 + $0x5f0] sm:$0xf0]  ;;  %v5015_v7 = vor.u32 %v6851_v60, %v5012_v62 }
  0xbe   :  { %v4530_v47 = vld [vmem:[#allocation2 + $0x10] sm:$0xf]  ;;  %v5331_v54 = vor.u32 %v6935_v45, %v5330_v44  ;;  %v6763_v37 = vld [vmem:[#allocation2 + $0x114] sm:$0xf] }
  0xbf   :  { %1894 = vmatpush.bf16.msra.mxu2 %v5171_v8  ;;  %1869 = vmatpush.bf16.msra.mxu0 %v4627_v21  ;;  %v6735_v48 = vld [vmem:[#allocation2 + $0x2c] sm:$0xf0]  ;;  %v5271_v8 = vor.u32 %v6915_v63, %v5268_v0  ;;  %v4727_v21 = vor.u32 %v6779_v9, %v4724_v10  ;;  %v4660_v38 = vld [vmem:[#allocation2 + $0x130] sm:$0xf0] }
  0xc0   :  { %v4786_v51 = vld [vmem:[#allocation2 + $0x210] sm:$0xf]  ;;  %v4531_v61 = vor.u32 %v6735_v48, %v4530_v47  ;;  %v6827_v39 = vld [vmem:[#allocation2 + $0x314] sm:$0xf] }
  0xc1   :  { %1907 = vmatpush.bf16.msra.mxu3 %v5427_v12  ;;  %1882 = vmatpush.bf16.msra.mxu1 %v4883_v23  ;;  %v6799_v52 = vld [vmem:[#allocation2 + $0x22c] sm:$0xf0]  ;;  %v5527_v12 = vor.u32 %v6979_v3, %v5524_v4  ;;  %v4983_v23 = vor.u32 %v6843_v11, %v4980_v13  ;;  %v4916_v41 = vld [vmem:[#allocation2 + $0x330] sm:$0xf0] }
  0xc2   :  { %v5042_v53 = vld [vmem:[#allocation2 + $0x410] sm:$0xf]  ;;  %v4787_v1 = vor.u32 %v6799_v52, %v4786_v51  ;;  %v6891_v42 = vld [vmem:[#allocation2 + $0x514] sm:$0xf]  ;;  %v4919_v48 = vor.u32 %v6827_v39, %v4916_v41 }
  0xc3   :  { %1895 = vmatpush.bf16.msra.mxu2 %v5139_v24  ;;  %1870 = vmatpush.bf16.msra.mxu0 %v4595_v34  ;;  %v6863_v55 = vld [vmem:[#allocation2 + $0x42c] sm:$0xf0]  ;;  %v5239_v24 = vor.u32 %v6907_v14, %v5236_v15  ;;  %v4695_v34 = vor.u32 %v6771_v25, %v4692_v26  ;;  %v5172_v43 = vld [vmem:[#allocation2 + $0x530] sm:$0xf0] }
  0xc4   :  { %v5298_v56 = vld [vmem:[#allocation2 + $0x610] sm:$0xf]  ;;  %v5043_v2 = vor.u32 %v6863_v55, %v5042_v53  ;;  %v6955_v44 = vld [vmem:[#allocation2 + $0x714] sm:$0xf] }
  0xc5   :  { %1908 = vmatpush.bf16.msra.mxu3 %v5395_v28  ;;  %1883 = vmatpush.bf16.msra.mxu1 %v4851_v35  ;;  %v6927_v57 = vld [vmem:[#allocation2 + $0x62c] sm:$0xf0]  ;;  %v5495_v28 = vor.u32 %v6971_v16, %v5492_v17  ;;  %v4951_v35 = vor.u32 %v6835_v27, %v4948_v29  ;;  %v5428_v45 = vld [vmem:[#allocation2 + $0x730] sm:$0xf0] }
  0xc6   :  { %v5299_v5 = vor.u32 %v6927_v57, %v5298_v56  ;;  %v6755_v47 = vld [vmem:[#allocation2 + $0xd4] sm:$0xf]  ;;  %v5431_v53 = vor.u32 %v6955_v44, %v5428_v45  ;;  %v7516_v56 = vld [vmem:[%s7688_s2] sm:$0xff]  ;;  %v6792_v44 = vld [vmem:[#allocation2 + $0x1f4] sm:$0xf0] }
  0xc7   :  { %1896 = vmatpush.bf16.msra.mxu2 %v5107_v36  ;;  %1871 = vmatpush.bf16.msra.mxu0 %v4563_v46  ;;  %v5207_v36 = vor.u32 %v6899_v30, %v5204_v31  ;;  %v4663_v46 = vor.u32 %v6763_v37, %v4660_v38  ;;  %v6819_v51 = vld [vmem:[#allocation2 + $0x2d4] sm:$0xf]  ;;  %v5018_v45 = vld [vmem:[#allocation2 + $0x3d8] sm:$0xf] }
  0xc8   :  { %v4884_v52 = vld [vmem:[#allocation2 + $0x2f0] sm:$0xf0] }
  0xc9   :  { %1909 = vmatpush.bf16.msra.mxu3 %v5363_v40  ;;  %1884 = vmatpush.bf16.msra.mxu1 %v4819_v49  ;;  %v5463_v40 = vor.u32 %v6963_v32, %v5460_v33  ;;  %v5175_v49 = vor.u32 %v6891_v42, %v5172_v43  ;;  %v5140_v55 = vld [vmem:[#allocation2 + $0x4f0] sm:$0xf0]  ;;  %v4762_v43 = vld [vmem:[#allocation2 + $0x1d8] sm:$0xf] }
  0xca   :  { %v6947_v57 = vld [vmem:[#allocation2 + $0x6d4] sm:$0xf] }
  0xcb   :  { %1897 = vmatpush.bf16.msra.mxu2 %v5075_v50  ;;  %1872 = vmatpush.bf16.msra.mxu0 %v4531_v61  ;;  %v4628_v50 = vld [vmem:[#allocation2 + $0xf0] sm:$0xf0]  ;;  %v4887_v61 = vor.u32 %v6819_v51, %v4884_v52 }
  0xcc   :  { %v5396_v58 = vld [vmem:[#allocation2 + $0x6f0] sm:$0xf0]  ;;  %v4631_v59 = vor.u32 %v6755_v47, %v4628_v50  ;;  %v6856_v47 = vld [vmem:[#allocation2 + $0x3f4] sm:$0xf0] }
  0xcd   :  { %1910 = vmatpush.bf16.msra.mxu3 %v5331_v54  ;;  %1885 = vmatpush.bf16.msra.mxu1 %v4787_v1  ;;  %v6883_v54 = vld [vmem:[#allocation2 + $0x4d4] sm:$0xf]  ;;  %v347_v1 = vperm.slane %v7516_v56, 0 }
  0xce   :  { %1873 = vmatmul.bf16.vlgmr.msra.gmra.mxu0 %v7487_v19  ;;  %v6747_v60 = vld [vmem:[#allocation2 + $0x94] sm:$0xf]  ;;  %v5143_v62 = vor.u32 %v6883_v54, %v5140_v55  ;;  %v5530_v54 = vld [vmem:[#allocation2 + $0x7d8] sm:$0xf] }
  0xcf   :  { %1898 = vmatpush.bf16.msra.mxu2 %v5043_v2  ;;  %1917 = vmatpush.bf16.msrb.mxu0 %v4759_v6  ;;  %v4596_v63 = vld [vmem:[#allocation2 + $0xb0] sm:$0xf0]  ;;  %v5399_v2 = vor.u32 %v6947_v57, %v5396_v58  ;;  %v6984_v55 = vld [vmem:[#allocation2 + $0x7f4] sm:$0xf0] }
  0xd0   :  { %1886 = vmatmul.bf16.vlgmr.msra.gmra.mxu1 %v7491_v22  ;;  %v6811_v0 = vld [vmem:[#allocation2 + $0x294] sm:$0xf] }
  0xd1   :  { %1911 = vmatpush.bf16.msra.mxu3 %v5299_v5  ;;  %1930 = vmatpush.bf16.msrb.mxu1 %v5015_v7  ;;  %v4852_v3 = vld [vmem:[#allocation2 + $0x2b0] sm:$0xf0]  ;;  %v1666_v9 = vpop.f32.mrf.mxu0 }
  0xd2   :  { %1899 = vmatmul.bf16.vlgmr.msra.gmra.mxu2 %v7485_v18  ;;  %v6875_v4 = vld [vmem:[#allocation2 + $0x494] sm:$0xf]  ;;  %v4855_v10 = vor.u32 %v6811_v0, %v4852_v3  ;;  %v1667_v15 = vadd.f32 %v1666_v9, %v347_v1  ;;  %v4986_v0 = vld [vmem:[#allocation2 + $0x398] sm:$0xf]  ;;  %v5531_v1 = vor.u32 %v6984_v55, %v5530_v54 }
  0xd3   :  { %1943 = vmatpush.bf16.msrb.mxu2 %v5271_v8  ;;  %1918 = vmatpush.bf16.msrb.mxu0 %v4727_v21  ;;  %v5108_v5 = vld [vmem:[#allocation2 + $0x4b0] sm:$0xf0]  ;;  %v4599_v8 = vor.u32 %v6747_v60, %v4596_v63  ;;  %v1679_v16 = vpop.f32.mrf.mxu1  ;;  %v5019_v60 = vor.u32 %v6856_v47, %v5018_v45  ;;  %v6784_v63 = vld [vmem:[#allocation2 + $0x1b4] sm:$0xf0] }
  0xd4   :  { %1912 = vmatmul.bf16.vlgmr.msra.gmra.mxu3 %v7489_v20  ;;  %v6939_v6 = vld [vmem:[#allocation2 + $0x694] sm:$0xf]  ;;  %v5111_v11 = vor.u32 %v6875_v4, %v5108_v5  ;;  %v1680_v27 = vadd.f32 %v1679_v16, %v1667_v15  ;;  %v5242_v3 = vld [vmem:[#allocation2 + $0x598] sm:$0xf] }
  0xd5   :  { %1956 = vmatpush.bf16.msrb.mxu3 %v5527_v12  ;;  %1931 = vmatpush.bf16.msrb.mxu1 %v4983_v23  ;;  %v5364_v7 = vld [vmem:[#allocation2 + $0x6b0] sm:$0xf0]  ;;  %v6912_v4 = vld [vmem:[#allocation2 + $0x5b4] sm:$0xf0] }
  0xd6   :  { %v6739_v12 = vld [vmem:[#allocation2 + $0x54] sm:$0xf]  ;;  %v5367_v17 = vor.u32 %v6939_v6, %v5364_v7  ;;  %v5498_v5 = vld [vmem:[#allocation2 + $0x798] sm:$0xf] }
  0xd7   :  { %1944 = vmatpush.bf16.msrb.mxu2 %v5239_v24  ;;  %1919 = vmatpush.bf16.msrb.mxu0 %v4695_v34  ;;  %v4564_v13 = vld [vmem:[#allocation2 + $0x70] sm:$0xf0]  ;;  %v1705_v42 = vpop.f32.mrf.mxu3  ;;  %v6976_v6 = vld [vmem:[#allocation2 + $0x7b4] sm:$0xf0] }
  0xd8   :  { %v6803_v14 = vld [vmem:[#allocation2 + $0x254] sm:$0xf]  ;;  %v5499_v15 = vor.u32 %v6976_v6, %v5498_v5  ;;  %v6840_v16 = vld [vmem:[#allocation2 + $0x374] sm:$0xf0] }
  0xd9   :  { %1957 = vmatpush.bf16.msrb.mxu3 %v5495_v28  ;;  %1932 = vmatpush.bf16.msrb.mxu1 %v4951_v35  ;;  %v4820_v21 = vld [vmem:[#allocation2 + $0x270] sm:$0xf0]  ;;  %v4567_v28 = vor.u32 %v6739_v12, %v4564_v13  ;;  %v1668_v51 = vpop.f32.mrf.mxu0  ;;  %v4698_v12 = vld [vmem:[#allocation2 + $0x158] sm:$0xf] }
  0xda   :  { %v6867_v23 = vld [vmem:[#allocation2 + $0x454] sm:$0xf]  ;;  %v4823_v31 = vor.u32 %v6803_v14, %v4820_v21  ;;  %v6776_v13 = vld [vmem:[#allocation2 + $0x174] sm:$0xf0] }
  0xdb   :  { %1945 = vmatpush.bf16.msrb.mxu2 %v5207_v36  ;;  %1920 = vmatpush.bf16.msrb.mxu0 %v4663_v46  ;;  %v5076_v24 = vld [vmem:[#allocation2 + $0x470] sm:$0xf0]  ;;  %v1692_v36 = vpop.f32.mrf.mxu2  ;;  %v1681_v57 = vpop.f32.mrf.mxu1  ;;  %v4954_v14 = vld [vmem:[#allocation2 + $0x358] sm:$0xf] }
  0xdc   :  { %v6931_v25 = vld [vmem:[#allocation2 + $0x654] sm:$0xf]  ;;  %v5079_v32 = vor.u32 %v6867_v23, %v5076_v24  ;;  %v1693_v41 = vadd.f32 %v1692_v36, %v1680_v27  ;;  %v6904_v21 = vld [vmem:[#allocation2 + $0x574] sm:$0xf0]  ;;  %v4955_v27 = vor.u32 %v6840_v16, %v4954_v14 }
  0xdd   :  { %1958 = vmatpush.bf16.msrb.mxu3 %v5463_v40  ;;  %1933 = vmatpush.bf16.msrb.mxu1 %v4919_v48  ;;  %v5332_v26 = vld [vmem:[#allocation2 + $0x670] sm:$0xf0]  ;;  %v5274_v48 = vld [vmem:[#allocation2 + $0x5d8] sm:$0xf] }
  0xde   :  { %v6731_v29 = vld [vmem:[#allocation2 + $0x14] sm:$0xf]  ;;  %v5335_v37 = vor.u32 %v6931_v25, %v5332_v26  ;;  %v7519_v50 = vadd.f32 %v1705_v42, %v1693_v41  ;;  %v5466_v23 = vld [vmem:[#allocation2 + $0x758] sm:$0xf]  ;;  %v4699_v25 = vor.u32 %v6776_v13, %v4698_v12 }
  0xdf   :  { %1946 = vmatpush.bf16.msrb.mxu2 %v5175_v49  ;;  %1921 = vmatpush.bf16.msrb.mxu0 %v4631_v59  ;;  %v4532_v30 = vld [vmem:[#allocation2 + $0x30] sm:$0xf0]  ;;  %v6920_v49 = vld [vmem:[#allocation2 + $0x5f4] sm:$0xf0]  ;;  %v4763_v59 = vor.u32 %v6792_v44, %v4762_v43  ;;  %v1707_v9 = vpop.f32.mrf.mxu3 }
  0xe0   :  { %v6795_v33 = vld [vmem:[#allocation2 + $0x214] sm:$0xf]  ;;  %v4535_v46 = vor.u32 %v6731_v29, %v4532_v30  ;;  %v6968_v24 = vld [vmem:[#allocation2 + $0x774] sm:$0xf0] }
  0xe1   :  { %1959 = vmatpush.bf16.msrb.mxu3 %v5431_v53  ;;  %1934 = vmatpush.bf16.msrb.mxu1 %v4887_v61  ;;  %v4788_v34 = vld [vmem:[#allocation2 + $0x230] sm:$0xf0]  ;;  %v5275_v61 = vor.u32 %v6920_v49, %v5274_v48  ;;  %v4666_v26 = vld [vmem:[#allocation2 + $0x118] sm:$0xf] }
  0xe2   :  { %v6859_v35 = vld [vmem:[#allocation2 + $0x414] sm:$0xf]  ;;  %v4791_v52 = vor.u32 %v6795_v33, %v4788_v34  ;;  %v6768_v29 = vld [vmem:[#allocation2 + $0x134] sm:$0xf0] }
  0xe3   :  { %1947 = vmatpush.bf16.msrb.mxu2 %v5143_v62  ;;  %1922 = vmatpush.bf16.msrb.mxu0 %v4599_v8  ;;  %v5044_v38 = vld [vmem:[#allocation2 + $0x430] sm:$0xf0]  ;;  %v4730_v62 = vld [vmem:[#allocation2 + $0x198] sm:$0xf]  ;;  %v1694_v7 = vpop.f32.mrf.mxu2 }
  0xe4   :  { %v6923_v39 = vld [vmem:[#allocation2 + $0x614] sm:$0xf]  ;;  %v5047_v53 = vor.u32 %v6859_v35, %v5044_v38  ;;  %v4731_v8 = vor.u32 %v6784_v63, %v4730_v62  ;;  %v4922_v30 = vld [vmem:[#allocation2 + $0x318] sm:$0xf]  ;;  %v4667_v38 = vor.u32 %v6768_v29, %v4666_v26 }
  0xe5   :  { %1960 = vmatpush.bf16.msrb.mxu3 %v5399_v2  ;;  %1935 = vmatpush.bf16.msrb.mxu1 %v4855_v10  ;;  %v5300_v40 = vld [vmem:[#allocation2 + $0x630] sm:$0xf0]  ;;  %v6848_v2 = vld [vmem:[#allocation2 + $0x3b4] sm:$0xf0] }
  0xe6   :  { %v5303_v58 = vor.u32 %v6923_v39, %v5300_v40  ;;  %v4987_v10 = vor.u32 %v6848_v2, %v4986_v0  ;;  %v6832_v33 = vld [vmem:[#allocation2 + $0x334] sm:$0xf0] }
  0xe7   :  { %1948 = vmatpush.bf16.msrb.mxu2 %v5111_v11  ;;  %1923 = vmatpush.bf16.msrb.mxu0 %v4567_v28  ;;  %v5243_v11 = vor.u32 %v6912_v4, %v5242_v3  ;;  %v5178_v34 = vld [vmem:[#allocation2 + $0x518] sm:$0xf]  ;;  %v4923_v40 = vor.u32 %v6832_v33, %v4922_v30 }
  0xe8   :  { %v6896_v35 = vld [vmem:[#allocation2 + $0x534] sm:$0xf0] }
  0xe9   :  { %1961 = vmatpush.bf16.msrb.mxu3 %v5367_v17  ;;  %1936 = vmatpush.bf16.msrb.mxu1 %v4823_v31  ;;  %v5210_v17 = vld [vmem:[#allocation2 + $0x558] sm:$0xf]  ;;  %v348_v31 = vperm.slane %v7516_v56, 1  ;;  %v5179_v41 = vor.u32 %v6896_v35, %v5178_v34 }
  0xea   :  { %v5211_v28 = vor.u32 %v6904_v21, %v5210_v17  ;;  %v5434_v36 = vld [vmem:[#allocation2 + $0x718] sm:$0xf] }
  0xeb   :  { %1949 = vmatpush.bf16.msrb.mxu2 %v5079_v32  ;;  %1924 = vmatpush.bf16.msrb.mxu0 %v4535_v46  ;;  %v5467_v32 = vor.u32 %v6968_v24, %v5466_v23  ;;  %v1718_v39 = vpop.f32.mrf.mxu0  ;;  %v4634_v42 = vld [vmem:[#allocation2 + $0xd8] sm:$0xf] }
  0xec   :  { %v6760_v43 = vld [vmem:[#allocation2 + $0xf4] sm:$0xf0]  ;;  %v1719_v45 = vadd.f32 %v1718_v39, %v348_v31 }
  0xed   :  { %1962 = vmatpush.bf16.msrb.mxu3 %v5335_v37  ;;  %1937 = vmatpush.bf16.msrb.mxu1 %v4791_v52  ;;  %v6960_v37 = vld [vmem:[#allocation2 + $0x734] sm:$0xf0]  ;;  %v1731_v46 = vpop.f32.mrf.mxu1  ;;  %v4635_v55 = vor.u32 %v6760_v43, %v4634_v42  ;;  %v6852_v42 = vld [vmem:[#allocation2 + $0x3dc] sm:$0xf] }
  0xee   :  { %1925 = vmatmul.bf16.vlgmr.msrb.gmra.mxu0 %v7487_v19  ;;  %v4890_v44 = vld [vmem:[#allocation2 + $0x2d8] sm:$0xf]  ;;  %v5435_v47 = vor.u32 %v6960_v37, %v5434_v36  ;;  %v1732_v54 = vadd.f32 %v1731_v46, %v1719_v45  ;;  %v6916_v45 = vld [vmem:[#allocation2 + $0x5dc] sm:$0xf] }
  0xef   :  { %1950 = vmatpush.bf16.msrb.mxu2 %v5047_v53  ;;  %1969 = vmatpush.bf16.msra.mxu0 %v4763_v59  ;;  %v6824_v48 = vld [vmem:[#allocation2 + $0x2f4] sm:$0xf0]  ;;  %v5276_v46 = vld [vmem:[#allocation2 + $0x5f8] sm:$0xf0] }
  0xf0   :  { %1938 = vmatmul.bf16.vlgmr.msrb.gmra.mxu1 %v7491_v22  ;;  %v5146_v49 = vld [vmem:[#allocation2 + $0x4d8] sm:$0xf]  ;;  %v4891_v57 = vor.u32 %v6824_v48, %v4890_v44  ;;  %v5020_v44 = vld [vmem:[#allocation2 + $0x3f8] sm:$0xf0] }
  0xf1   :  { %1963 = vmatpush.bf16.msrb.mxu3 %v5303_v58  ;;  %1982 = vmatpush.bf16.msra.mxu1 %v5019_v60  ;;  %v6888_v51 = vld [vmem:[#allocation2 + $0x4f4] sm:$0xf0] }
  0xf2   :  { %1951 = vmatmul.bf16.vlgmr.msrb.gmra.mxu2 %v7485_v18  ;;  %v5402_v52 = vld [vmem:[#allocation2 + $0x6d8] sm:$0xf]  ;;  %v5147_v58 = vor.u32 %v6888_v51, %v5146_v49  ;;  %v6980_v49 = vld [vmem:[#allocation2 + $0x7dc] sm:$0xf] }
  0xf3   :  { %1995 = vmatpush.bf16.msra.mxu2 %v5275_v61  ;;  %1970 = vmatpush.bf16.msra.mxu0 %v4731_v8  ;;  %v6952_v53 = vld [vmem:[#allocation2 + $0x6f4] sm:$0xf0]  ;;  %v1720_v9 = vpop.f32.mrf.mxu0  ;;  %v5532_v51 = vld [vmem:[#allocation2 + $0x7f8] sm:$0xf0] }
  0xf4   :  { %1964 = vmatmul.bf16.vlgmr.msrb.gmra.mxu3 %v7489_v20  ;;  %v4602_v59 = vld [vmem:[#allocation2 + $0x98] sm:$0xf]  ;;  %v5403_v63 = vor.u32 %v6952_v53, %v5402_v52 }
  0xf5   :  { %2008 = vmatpush.bf16.msra.mxu3 %v5531_v1  ;;  %1983 = vmatpush.bf16.msra.mxu1 %v4987_v10  ;;  %v6752_v60 = vld [vmem:[#allocation2 + $0xb4] sm:$0xf0]  ;;  %v1744_v62 = vpop.f32.mrf.mxu2 }
  0xf6   :  { %v4858_v61 = vld [vmem:[#allocation2 + $0x298] sm:$0xf]  ;;  %v1745_v3 = vadd.f32 %v1744_v62, %v1732_v54  ;;  %v4603_v7 = vor.u32 %v6752_v60, %v4602_v59  ;;  %v5023_v54 = vor.u32 %v6852_v42, %v5020_v44  ;;  %v6844_v59 = vld [vmem:[#allocation2 + $0x39c] sm:$0xf]  ;;  %v5535_v60 = vor.u32 %v6980_v49, %v5532_v51 }
  0xf7   :  { %1996 = vmatpush.bf16.msra.mxu2 %v5243_v11  ;;  %1971 = vmatpush.bf16.msra.mxu0 %v4699_v25  ;;  %v6816_v0 = vld [vmem:[#allocation2 + $0x2b4] sm:$0xf0]  ;;  %v1757_v4 = vpop.f32.mrf.mxu3  ;;  %v6908_v62 = vld [vmem:[#allocation2 + $0x59c] sm:$0xf] }
  0xf8   :  { %v5114_v1 = vld [vmem:[#allocation2 + $0x498] sm:$0xf]  ;;  %v7526_v8 = vadd.f32 %v1757_v4, %v1745_v3  ;;  %v4859_v10 = vor.u32 %v6816_v0, %v4858_v61  ;;  %v4988_v61 = vld [vmem:[#allocation2 + $0x3b8] sm:$0xf0] }
  0xf9   :  { %2009 = vmatpush.bf16.msra.mxu3 %v5499_v15  ;;  %1984 = vmatpush.bf16.msra.mxu1 %v4955_v27  ;;  %v6880_v2 = vld [vmem:[#allocation2 + $0x4b4] sm:$0xf0]  ;;  %v1733_v15 = vpop.f32.mrf.mxu1  ;;  %v6972_v0 = vld [vmem:[#allocation2 + $0x79c] sm:$0xf]  ;;  %v4991_v3 = vor.u32 %v6844_v59, %v4988_v61 }
  0xfa   :  { %v5370_v5 = vld [vmem:[#allocation2 + $0x698] sm:$0xf]  ;;  %v5115_v11 = vor.u32 %v6880_v2, %v5114_v1  ;;  %v5500_v1 = vld [vmem:[#allocation2 + $0x7b8] sm:$0xf0] }
  0xfb   :  { %1997 = vmatpush.bf16.msra.mxu2 %v5211_v28  ;;  %1972 = vmatpush.bf16.msra.mxu0 %v4667_v38  ;;  %v6944_v6 = vld [vmem:[#allocation2 + $0x6b4] sm:$0xf0]  ;;  %v5503_v9 = vor.u32 %v6972_v0, %v5500_v1  ;;  %v5148_v42 = vld [vmem:[#allocation2 + $0x4f8] sm:$0xf0] }
  0xfc   :  { %v4570_v12 = vld [vmem:[#allocation2 + $0x58] sm:$0xf]  ;;  %v5371_v16 = vor.u32 %v6944_v6, %v5370_v5  ;;  %v6772_v5 = vld [vmem:[#allocation2 + $0x15c] sm:$0xf] }
  0xfd   :  { %2010 = vmatpush.bf16.msra.mxu3 %v5467_v32  ;;  %1985 = vmatpush.bf16.msra.mxu1 %v4923_v40  ;;  %v6744_v13 = vld [vmem:[#allocation2 + $0x74] sm:$0xf0]  ;;  %v1746_v34 = vpop.f32.mrf.mxu2  ;;  %v6788_v40 = vld [vmem:[#allocation2 + $0x1dc] sm:$0xf] }
  0xfe   :  { %v4826_v14 = vld [vmem:[#allocation2 + $0x258] sm:$0xf]  ;;  %v4571_v26 = vor.u32 %v6744_v13, %v4570_v12  ;;  %v4700_v6 = vld [vmem:[#allocation2 + $0x178] sm:$0xf0] }
  0xff   :  { %1998 = vmatpush.bf16.msra.mxu2 %v5179_v41  ;;  %1973 = vmatpush.bf16.msra.mxu0 %v4635_v55  ;;  %v6808_v17 = vld [vmem:[#allocation2 + $0x274] sm:$0xf0]  ;;  %v1759_v39 = vpop.f32.mrf.mxu3  ;;  %v4764_v41 = vld [vmem:[#allocation2 + $0x1f8] sm:$0xf0]  ;;  %v5279_v55 = vor.u32 %v6916_v45, %v5276_v46  ;;  %v4703_v15 = vor.u32 %v6772_v5, %v4700_v6 }
 0x100   :  { %v5082_v21 = vld [vmem:[#allocation2 + $0x458] sm:$0xf]  ;;  %v4827_v29 = vor.u32 %v6808_v17, %v4826_v14  ;;  %v4767_v53 = vor.u32 %v6788_v40, %v4764_v41  ;;  %v5212_v12 = vld [vmem:[#allocation2 + $0x578] sm:$0xf0] }
 0x101   :  { %2011 = vmatpush.bf16.msra.mxu3 %v5435_v47  ;;  %1986 = vmatpush.bf16.msra.mxu1 %v4891_v57  ;;  %v6872_v23 = vld [vmem:[#allocation2 + $0x474] sm:$0xf0]  ;;  %v6780_v57 = vld [vmem:[#allocation2 + $0x19c] sm:$0xf] }
 0x102   :  { %v5338_v24 = vld [vmem:[#allocation2 + $0x658] sm:$0xf]  ;;  %v5083_v30 = vor.u32 %v6872_v23, %v5082_v21  ;;  %v6964_v13 = vld [vmem:[#allocation2 + $0x75c] sm:$0xf] }
 0x103   :  { %1999 = vmatpush.bf16.msra.mxu2 %v5147_v58  ;;  %v6936_v25 = vld [vmem:[#allocation2 + $0x674] sm:$0xf0]  ;;  %1974 = vmatpush.bf16.msra.mxu0 %v4603_v7  ;;  %v4732_v58 = vld [vmem:[#allocation2 + $0x1b8] sm:$0xf0] }
 0x104   :  { %v4538_v27 = vld [vmem:[#allocation2 + $0x18] sm:$0xf]  ;;  %v5339_v35 = vor.u32 %v6936_v25, %v5338_v24  ;;  %v4735_v2 = vor.u32 %v6780_v57, %v4732_v58  ;;  %v6836_v7 = vld [vmem:[#allocation2 + $0x35c] sm:$0xf] }
 0x105   :  { %2012 = vmatpush.bf16.msra.mxu3 %v5403_v63  ;;  %v6736_v28 = vld [vmem:[#allocation2 + $0x34] sm:$0xf0]  ;;  %1987 = vmatpush.bf16.msra.mxu1 %v4859_v10  ;;  %v5244_v63 = vld [vmem:[#allocation2 + $0x5b8] sm:$0xf0] }
 0x106   :  { %v4794_v31 = vld [vmem:[#allocation2 + $0x218] sm:$0xf]  ;;  %v4539_v43 = vor.u32 %v6736_v28, %v4538_v27  ;;  %v5247_v4 = vor.u32 %v6908_v62, %v5244_v63  ;;  %v4956_v10 = vld [vmem:[#allocation2 + $0x378] sm:$0xf0] }
 0x107   :  { %2000 = vmatpush.bf16.msra.mxu2 %v5115_v11  ;;  %v6800_v32 = vld [vmem:[#allocation2 + $0x234] sm:$0xf0]  ;;  %1975 = vmatpush.bf16.msra.mxu0 %v4571_v26  ;;  %v6900_v11 = vld [vmem:[#allocation2 + $0x55c] sm:$0xf] }
 0x108   :  { %v5050_v33 = vld [vmem:[#allocation2 + $0x418] sm:$0xf]  ;;  %v4795_v47 = vor.u32 %v6800_v32, %v4794_v31  ;;  %v5468_v14 = vld [vmem:[#allocation2 + $0x778] sm:$0xf0]  ;;  %v5215_v17 = vor.u32 %v6900_v11, %v5212_v12 }
 0x109   :  { %2013 = vmatpush.bf16.msra.mxu3 %v5371_v16  ;;  %v6864_v36 = vld [vmem:[#allocation2 + $0x434] sm:$0xf0]  ;;  %1988 = vmatpush.bf16.msra.mxu1 %v4827_v29  ;;  %v4959_v16 = vor.u32 %v6836_v7, %v4956_v10  ;;  %v6764_v21 = vld [vmem:[#allocation2 + $0x11c] sm:$0xf]  ;;  %v5471_v25 = vor.u32 %v6964_v13, %v5468_v14 }
 0x10a   :  { %v5306_v37 = vld [vmem:[#allocation2 + $0x618] sm:$0xf]  ;;  %v5051_v48 = vor.u32 %v6864_v36, %v5050_v33  ;;  %v4668_v23 = vld [vmem:[#allocation2 + $0x138] sm:$0xf0] }
 0x10b   :  { %v6928_v38 = vld [vmem:[#allocation2 + $0x634] sm:$0xf0]  ;;  %2001 = vmatpush.bf16.msra.mxu2 %v5083_v30  ;;  %1976 = vmatpush.bf16.msra.mxu0 %v4539_v43  ;;  %v6828_v24 = vld [vmem:[#allocation2 + $0x31c] sm:$0xf]  ;;  %v4671_v31 = vor.u32 %v6764_v21, %v4668_v23  ;;  %v7532_v32 = vpop.f32.mrf.mxu0 }
 0x10c   :  { %v5307_v52 = vor.u32 %v6928_v38, %v5306_v37  ;;  %v4924_v26 = vld [vmem:[#allocation2 + $0x338] sm:$0xf0] }
 0x10d   :  { %2014 = vmatpush.bf16.msra.mxu3 %v5339_v35  ;;  %1989 = vmatpush.bf16.msra.mxu1 %v4795_v47  ;;  %v6892_v27 = vld [vmem:[#allocation2 + $0x51c] sm:$0xf]  ;;  %v4927_v33 = vor.u32 %v6828_v24, %v4924_v26  ;;  %v7534_v38 = vpop.f32.mrf.mxu1 }
 0x10e   :  { %1977 = vmatmul.bf16.vlgmr.msra.gmra.mxu0 %v7487_v19  ;;  %v5180_v28 = vld [vmem:[#allocation2 + $0x538] sm:$0xf0] }
 0x10f   :  { %2002 = vmatpush.bf16.msra.mxu2 %v5051_v48  ;;  %2021 = vmatpush.bf16.msrb.mxu0 %v4767_v53  ;;  %v6956_v29 = vld [vmem:[#allocation2 + $0x71c] sm:$0xf]  ;;  %v5183_v34 = vor.u32 %v6892_v27, %v5180_v28 }
 0x110   :  { %1990 = vmatmul.bf16.vlgmr.msra.gmra.mxu1 %v7491_v22  ;;  %v5436_v30 = vld [vmem:[#allocation2 + $0x738] sm:$0xf0] }
 0x111   :  { %2015 = vmatpush.bf16.msra.mxu3 %v5307_v52  ;;  %2034 = vmatpush.bf16.msrb.mxu1 %v5023_v54  ;;  %v6756_v35 = vld [vmem:[#allocation2 + $0xdc] sm:$0xf]  ;;  %v5439_v39 = vor.u32 %v6956_v29, %v5436_v30  ;;  %v5650_v30 = vld [vmem:[#allocation5 + $0xe0] sm:$0xf] }
 0x112   :  { %2003 = vmatmul.bf16.vlgmr.msra.gmra.mxu2 %v7485_v18  ;;  %v4636_v36 = vld [vmem:[#allocation2 + $0xf8] sm:$0xf0] }
 0x113   :  { %2047 = vmatpush.bf16.msrb.mxu2 %v5279_v55  ;;  %2022 = vmatpush.bf16.msrb.mxu0 %v4735_v2  ;;  %v6820_v37 = vld [vmem:[#allocation2 + $0x2dc] sm:$0xf]  ;;  %v4639_v45 = vor.u32 %v6756_v35, %v4636_v36  ;;  %v1772_v62 = vpop.f32.mrf.mxu0  ;;  %v7047_v35 = vld [vmem:[#allocation5 + $0x1ec] sm:$0xf0]  ;;  %v5906_v36 = vld [vmem:[#allocation5 + $0x2e0] sm:$0xf] }
 0x114   :  { %2016 = vmatmul.bf16.vlgmr.msra.gmra.mxu3 %v7489_v20  ;;  %v4892_v40 = vld [vmem:[#allocation2 + $0x2f8] sm:$0xf0] }
 0x115   :  { %2060 = vmatpush.bf16.msrb.mxu3 %v5535_v60  ;;  %2035 = vmatpush.bf16.msrb.mxu1 %v4991_v3  ;;  %v6884_v41 = vld [vmem:[#allocation2 + $0x4dc] sm:$0xf]  ;;  %v4895_v46 = vor.u32 %v6820_v37, %v4892_v40  ;;  %v7536_v52 = vpop.f32.mrf.mxu2  ;;  %v7079_v37 = vld [vmem:[#allocation5 + $0x2ec] sm:$0xf0] }
 0x116   :  { %v6948_v43 = vld [vmem:[#allocation2 + $0x6dc] sm:$0xf]  ;;  %v5151_v47 = vor.u32 %v6884_v41, %v5148_v42 }
 0x117   :  { %2048 = vmatpush.bf16.msrb.mxu2 %v5247_v4  ;;  %2023 = vmatpush.bf16.msrb.mxu0 %v4703_v15  ;;  %v5404_v44 = vld [vmem:[#allocation2 + $0x6f8] sm:$0xf0]  ;;  %v7538_v58 = vpop.f32.mrf.mxu3  ;;  %v1785_v4 = vpop.f32.mrf.mxu1 }
 0x118   :  { %v6748_v48 = vld [vmem:[#allocation2 + $0x9c] sm:$0xf]  ;;  %v5407_v53 = vor.u32 %v6948_v43, %v5404_v44  ;;  %v6034_v43 = vld [vmem:[#allocation5 + $0x3e0] sm:$0xf]  ;;  %v7111_v44 = vld [vmem:[#allocation5 + $0x3ec] sm:$0xf0] }
 0x119   :  { %2061 = vmatpush.bf16.msrb.mxu3 %v5503_v9  ;;  %2036 = vmatpush.bf16.msrb.mxu1 %v4959_v16  ;;  %v4604_v49 = vld [vmem:[#allocation2 + $0xb8] sm:$0xf0]  ;;  %v7071_v4 = vld [vmem:[#allocation5 + $0x2ac] sm:$0xf0] }
 0x11a   :  { %v6812_v51 = vld [vmem:[#allocation2 + $0x29c] sm:$0xf]  ;;  %v4607_v61 = vor.u32 %v6748_v48, %v4604_v49  ;;  %v7011_v48 = vld [vmem:[#allocation5 + $0xcc] sm:$0xf0]  ;;  %v5762_v49 = vld [vmem:[#allocation5 + $0x1c0] sm:$0xf] }
 0x11b   :  { %2049 = vmatpush.bf16.msrb.mxu2 %v5215_v17  ;;  %2024 = vmatpush.bf16.msrb.mxu0 %v4671_v31  ;;  %v4860_v54 = vld [vmem:[#allocation2 + $0x2b8] sm:$0xf0]  ;;  %v7015_v31 = vld [vmem:[#allocation5 + $0xec] sm:$0xf0] }
 0x11c   :  { %v6876_v55 = vld [vmem:[#allocation2 + $0x49c] sm:$0xf]  ;;  %v4863_v63 = vor.u32 %v6812_v51, %v4860_v54  ;;  %v5651_v42 = vor.u32 %v7015_v31, %v5650_v30  ;;  %v7043_v51 = vld [vmem:[#allocation5 + $0x1cc] sm:$0xf0] }
 0x11d   :  { %2062 = vmatpush.bf16.msrb.mxu3 %v5471_v25  ;;  %2037 = vmatpush.bf16.msrb.mxu1 %v4927_v33  ;;  %v5116_v57 = vld [vmem:[#allocation2 + $0x4b8] sm:$0xf0]  ;;  %v1798_v24 = vpop.f32.mrf.mxu2  ;;  %v5778_v33 = vld [vmem:[#allocation5 + $0x1e0] sm:$0xf]  ;;  %v7075_v54 = vld [vmem:[#allocation5 + $0x2cc] sm:$0xf0] }
 0x11e   :  { %v6940_v59 = vld [vmem:[#allocation2 + $0x69c] sm:$0xf]  ;;  %v5119_v0 = vor.u32 %v6876_v55, %v5116_v57  ;;  %v6035_v55 = vor.u32 %v7111_v44, %v6034_v43  ;;  %v7031_v31 = vld [vmem:[#allocation5 + $0x16c] sm:$0xf0]  ;;  %v5570_v43 = vld [vmem:[#allocation5 + $0x40] sm:$0xf] }
 0x11f   :  { %2050 = vmatpush.bf16.msrb.mxu2 %v5183_v34  ;;  %v5372_v60 = vld [vmem:[#allocation2 + $0x6b8] sm:$0xf0]  ;;  %2025 = vmatpush.bf16.msrb.mxu0 %v4639_v45  ;;  %v1811_v29 = vpop.f32.mrf.mxu3  ;;  %v5779_v45 = vor.u32 %v7047_v35, %v5778_v33  ;;  %v5842_v33 = vld [vmem:[#allocation5 + $0x260] sm:$0xf]  ;;  %v6995_v44 = vld [vmem:[#allocation5 + $0x4c] sm:$0xf0] }
 0x120   :  { %v6740_v1 = vld [vmem:[#allocation2 + $0x5c] sm:$0xf]  ;;  %v5375_v5 = vor.u32 %v6940_v59, %v5372_v60  ;;  %v6018_v59 = vld [vmem:[#allocation5 + $0x3c0] sm:$0xf]  ;;  %v7107_v60 = vld [vmem:[#allocation5 + $0x3cc] sm:$0xf0] }
 0x121   :  { %2063 = vmatpush.bf16.msrb.mxu3 %v5439_v39  ;;  %2038 = vmatpush.bf16.msrb.mxu1 %v4895_v46  ;;  %v4572_v2 = vld [vmem:[#allocation2 + $0x78] sm:$0xf0]  ;;  %v5907_v46 = vor.u32 %v7079_v37, %v5906_v36  ;;  %v5714_v29 = vld [vmem:[#allocation5 + $0x160] sm:$0xf] }
 0x122   :  { %v6804_v3 = vld [vmem:[#allocation2 + $0x25c] sm:$0xf]  ;;  %v4575_v12 = vor.u32 %v6740_v1, %v4572_v2  ;;  %v5746_v1 = vld [vmem:[#allocation5 + $0x1a0] sm:$0xf]  ;;  %v7039_v2 = vld [vmem:[#allocation5 + $0x1ac] sm:$0xf0] }
 0x123   :  { %2051 = vmatpush.bf16.msrb.mxu2 %v5151_v47  ;;  %v4828_v6 = vld [vmem:[#allocation2 + $0x278] sm:$0xf0]  ;;  %2026 = vmatpush.bf16.msrb.mxu0 %v4607_v61  ;;  %v5634_v47 = vld [vmem:[#allocation5 + $0xc0] sm:$0xf]  ;;  %v5763_v61 = vor.u32 %v7043_v51, %v5762_v49  ;;  %v7059_v49 = vld [vmem:[#allocation5 + $0x24c] sm:$0xf0] }
 0x124   :  { %v6868_v7 = vld [vmem:[#allocation2 + $0x45c] sm:$0xf]  ;;  %v4831_v15 = vor.u32 %v6804_v3, %v4828_v6  ;;  %v5635_v57 = vor.u32 %v7011_v48, %v5634_v47  ;;  %v5874_v3 = vld [vmem:[#allocation5 + $0x2a0] sm:$0xf]  ;;  %v7027_v47 = vld [vmem:[#allocation5 + $0x14c] sm:$0xf0] }
 0x125   :  { %2064 = vmatpush.bf16.msrb.mxu3 %v5407_v53  ;;  %v5084_v9 = vld [vmem:[#allocation2 + $0x478] sm:$0xf0]  ;;  %2039 = vmatpush.bf16.msrb.mxu1 %v4863_v63  ;;  %v5890_v53 = vld [vmem:[#allocation5 + $0x2c0] sm:$0xf] }
 0x126   :  { %v6932_v10 = vld [vmem:[#allocation2 + $0x65c] sm:$0xf]  ;;  %v5087_v16 = vor.u32 %v6868_v7, %v5084_v9  ;;  %v5891_v62 = vor.u32 %v7075_v54, %v5890_v53  ;;  %v5618_v63 = vld [vmem:[#allocation5 + $0xa0] sm:$0xf]  ;;  %v7103_v9 = vld [vmem:[#allocation5 + $0x3ac] sm:$0xf0] }
 0x127   :  { %v5340_v11 = vld [vmem:[#allocation2 + $0x678] sm:$0xf0]  ;;  %2052 = vmatpush.bf16.msrb.mxu2 %v5119_v0  ;;  %2027 = vmatpush.bf16.msrb.mxu0 %v4575_v12  ;;  %v7007_v0 = vld [vmem:[#allocation5 + $0xac] sm:$0xf0]  ;;  %v6002_v7 = vld [vmem:[#allocation5 + $0x3a0] sm:$0xf] }
 0x128   :  { %v6732_v13 = vld [vmem:[#allocation2 + $0x1c] sm:$0xf]  ;;  %v5343_v25 = vor.u32 %v6932_v10, %v5340_v11  ;;  %v5619_v6 = vor.u32 %v7007_v0, %v5618_v63  ;;  %v5747_v10 = vor.u32 %v7039_v2, %v5746_v1  ;;  %v5875_v11 = vor.u32 %v7071_v4, %v5874_v3  ;;  %v7003_v12 = vld [vmem:[#allocation5 + $0x8c] sm:$0xf0]  ;;  %v5826_v48 = vld [vmem:[#allocation5 + $0x240] sm:$0xf] }
 0x129   :  { %v4540_v14 = vld [vmem:[#allocation2 + $0x38] sm:$0xf0]  ;;  %2065 = vmatpush.bf16.msrb.mxu3 %v5375_v5  ;;  %2040 = vmatpush.bf16.msrb.mxu1 %v4831_v15  ;;  %v6019_v5 = vor.u32 %v7107_v60, %v6018_v59  ;;  %v7067_v15 = vld [vmem:[#allocation5 + $0x28c] sm:$0xf0]  ;;  %v5554_v63 = vld [vmem:[#allocation5 + $0x20] sm:$0xf] }
 0x12a   :  { %v6796_v17 = vld [vmem:[#allocation2 + $0x21c] sm:$0xf]  ;;  %v4543_v34 = vor.u32 %v6732_v13, %v4540_v14  ;;  %v7035_v13 = vld [vmem:[#allocation5 + $0x18c] sm:$0xf0]  ;;  %v5858_v14 = vld [vmem:[#allocation5 + $0x280] sm:$0xf] }
 0x12b   :  { %v4796_v21 = vld [vmem:[#allocation2 + $0x238] sm:$0xf0]  ;;  %2053 = vmatpush.bf16.msrb.mxu2 %v5087_v16  ;;  %v6003_v16 = vor.u32 %v7103_v9, %v6002_v7  ;;  %v1822_v24 = vpop.f32.mrf.mxu0  ;;  %v7091_v59 = vld [vmem:[#allocation5 + $0x34c] sm:$0xf0]  ;;  %v5682_v1 = vld [vmem:[#allocation5 + $0x120] sm:$0xf] }
 0x12c   :  { %v6860_v23 = vld [vmem:[#allocation2 + $0x41c] sm:$0xf]  ;;  %v4799_v39 = vor.u32 %v6796_v17, %v4796_v21  ;;  %2028 = vmatpush.bf16.msrb.mxu0 %v4543_v34  ;;  %v5986_v21 = vld [vmem:[#allocation5 + $0x380] sm:$0xf]  ;;  %v7063_v34 = vld [vmem:[#allocation5 + $0x26c] sm:$0xf0] }
 0x12d   :  { %v5052_v26 = vld [vmem:[#allocation2 + $0x438] sm:$0xf0]  ;;  %2066 = vmatpush.bf16.msrb.mxu3 %v5343_v25  ;;  %v1835_v30 = vpop.f32.mrf.mxu1  ;;  %v6991_v0 = vld [vmem:[#allocation5 + $0x2c] sm:$0xf0]  ;;  %v5810_v4 = vld [vmem:[#allocation5 + $0x220] sm:$0xf] }
 0x12e   :  { %v6924_v27 = vld [vmem:[#allocation2 + $0x61c] sm:$0xf]  ;;  %v5055_v40 = vor.u32 %v6860_v23, %v5052_v26  ;;  %2041 = vmatpush.bf16.msrb.mxu1 %v4799_v39  ;;  %v7099_v23 = vld [vmem:[#allocation5 + $0x38c] sm:$0xf0]  ;;  %v5859_v26 = vor.u32 %v7067_v15, %v5858_v14  ;;  %v5970_v39 = vld [vmem:[#allocation5 + $0x360] sm:$0xf]  ;;  %v5555_v9 = vor.u32 %v6991_v0, %v5554_v63 }
 0x12f   :  { %v5308_v28 = vld [vmem:[#allocation2 + $0x638] sm:$0xf0]  ;;  %2029 = vmatmul.bf16.vlgmr.msrb.gmra.mxu0 %v7487_v19  ;;  %v5602_v19 = vld [vmem:[#allocation5 + $0x80] sm:$0xf]  ;;  %v5987_v36 = vor.u32 %v7099_v23, %v5986_v21  ;;  %v7023_v3 = vld [vmem:[#allocation5 + $0x12c] sm:$0xf0] }
 0x130   :  { %v5311_v41 = vor.u32 %v6924_v27, %v5308_v28  ;;  %2054 = vmatpush.bf16.msrb.mxu2 %v5055_v40  ;;  %3635 = vmatpush.bf16.msra.mxu0 %v5651_v42  ;;  %v5603_v17 = vor.u32 %v7003_v12, %v5602_v19  ;;  %v5586_v27 = vld [vmem:[#allocation5 + $0x60] sm:$0xf]  ;;  %v6999_v28 = vld [vmem:[#allocation5 + $0x6c] sm:$0xf0]  ;;  %v5843_v42 = vor.u32 %v7063_v34, %v5842_v33 }
 0x131   :  { %2042 = vmatmul.bf16.vlgmr.msrb.gmra.mxu1 %v7491_v22  ;;  %v5730_v22 = vld [vmem:[#allocation5 + $0x180] sm:$0xf]  ;;  %v5587_v37 = vor.u32 %v6999_v28, %v5586_v27  ;;  %v7095_v40 = vld [vmem:[#allocation5 + $0x36c] sm:$0xf0]  ;;  %v5683_v12 = vor.u32 %v7023_v3, %v5682_v1 }
 0x132   :  { %2067 = vmatpush.bf16.msrb.mxu3 %v5311_v41  ;;  %3648 = vmatpush.bf16.msra.mxu1 %v5779_v45  ;;  %v5731_v25 = vor.u32 %v7035_v13, %v5730_v22  ;;  %v5715_v41 = vor.u32 %v7031_v31, %v5714_v29  ;;  %v5698_v45 = vld [vmem:[#allocation5 + $0x140] sm:$0xf]  ;;  %v5971_v54 = vor.u32 %v7095_v40, %v5970_v39  ;;  %v6987_v13 = vld [vmem:[#allocation5 + $0xc] sm:$0xf0]  ;;  %v2073_v31 = vmax.f32 %v7519_v50, 0.0 }
 0x133   :  { %2055 = vmatmul.bf16.vlgmr.msrb.gmra.mxu2 %v7485_v18  ;;  %v349_v18 = vperm.slane %v7516_v56, 2  ;;  %v1824_v60 = vpop.f32.mrf.mxu0  ;;  %v5538_v19 = vld [vmem:[#allocation5] sm:$0xf]  ;;  %v7019_v15 = vld [vmem:[#allocation5 + $0x10c] sm:$0xf0] }
 0x134   :  { %3661 = vmatpush.bf16.msra.mxu2 %v5907_v46  ;;  %3636 = vmatpush.bf16.msra.mxu0 %v5635_v57  ;;  %v5954_v57 = vld [vmem:[#allocation5 + $0x340] sm:$0xf]  ;;  %v5539_v28 = vor.u32 %v6987_v13, %v5538_v19  ;;  %v7139_v40 = vld [vmem:[#allocation5 + $0x4cc] sm:$0xf0] }
 0x135   :  { %2068 = vmatmul.bf16.vlgmr.msrb.gmra.mxu3 %v7489_v20  ;;  %v350_v20 = vperm.slane %v7516_v56, 3  ;;  %v1771_v56 = vadd.f32 %v7532_v32, %v349_v18  ;;  %v1848_v46 = vpop.f32.mrf.mxu2  ;;  %v1837_v2 = vpop.f32.mrf.mxu1  ;;  %v5955_v7 = vor.u32 %v7091_v59, %v5954_v57  ;;  %v5666_v14 = vld [vmem:[#allocation5 + $0x100] sm:$0xf]  ;;  %v7167_v59 = vld [vmem:[#allocation5 + $0x5ac] sm:$0xf0] }
 0x136   :  { %3674 = vmatpush.bf16.msra.mxu3 %v6035_v55  ;;  %3649 = vmatpush.bf16.msra.mxu1 %v5763_v61  ;;  %v5571_v55 = vor.u32 %v6995_v44, %v5570_v43  ;;  %v5699_v61 = vor.u32 %v7027_v47, %v5698_v45  ;;  %v6418_v29 = vld [vmem:[#allocation5 + $0x6e0] sm:$0xf]  ;;  %v5667_v33 = vor.u32 %v7019_v15, %v5666_v14  ;;  %v7171_v44 = vld [vmem:[#allocation5 + $0x5cc] sm:$0xf0] }
 0x137   :  { %v1823_v35 = vadd.f32 %v1822_v24, %v350_v20  ;;  %v1861_v51 = vpop.f32.mrf.mxu3  ;;  %v1784_v32 = vadd.f32 %v7534_v38, %v1771_v56  ;;  %v5794_v20 = vld [vmem:[#allocation5 + $0x200] sm:$0xf]  ;;  %v7143_v24 = vld [vmem:[#allocation5 + $0x4ec] sm:$0xf0] }
 0x138   :  { %3662 = vmatpush.bf16.msra.mxu2 %v5891_v62  ;;  %3637 = vmatpush.bf16.msra.mxu0 %v5619_v6  ;;  %v5827_v62 = vor.u32 %v7059_v49, %v5826_v48  ;;  %v5922_v56 = vld [vmem:[#allocation5 + $0x300] sm:$0xf]  ;;  %v7203_v47 = vld [vmem:[#allocation5 + $0x6cc] sm:$0xf0]  ;;  %v7552_v48 = vpack.c.bf16 %v2073_v31, %v2073_v31 }
 0x139   :  { %v1836_v53 = vadd.f32 %v1835_v30, %v1823_v35  ;;  %v1797_v38 = vadd.f32 %v7536_v52, %v1784_v32  ;;  %v7207_v30 = vld [vmem:[#allocation5 + $0x6ec] sm:$0xf0]  ;;  %v6146_v39 = vld [vmem:[#allocation5 + $0x4c0] sm:$0xf] }
 0x13a   :  { %3675 = vmatpush.bf16.msra.mxu3 %v6019_v5  ;;  %3650 = vmatpush.bf16.msra.mxu1 %v5747_v10  ;;  %v7055_v5 = vld [vmem:[#allocation5 + $0x22c] sm:$0xf0]  ;;  %v5938_v10 = vld [vmem:[#allocation5 + $0x320] sm:$0xf]  ;;  %v6419_v45 = vor.u32 %v7207_v30, %v6418_v29 }
 0x13b   :  { %v1849_v6 = vadd.f32 %v1848_v46, %v1836_v53  ;;  %v5811_v22 = vor.u32 %v7055_v5, %v5810_v4  ;;  %v1810_v21 = vadd.f32 %v7538_v58, %v1797_v38  ;;  %v7083_v35 = vld [vmem:[#allocation5 + $0x30c] sm:$0xf0]  ;;  %v2074_v58 = vmax.f32 %v7526_v8, 0.0  ;;  %v6274_v43 = vld [vmem:[#allocation5 + $0x5c0] sm:$0xf] }
 0x13c   :  { %3663 = vmatpush.bf16.msra.mxu2 %v5875_v11  ;;  %3638 = vmatpush.bf16.msra.mxu0 %v5603_v17  ;;  %v7087_v11 = vld [vmem:[#allocation5 + $0x32c] sm:$0xf0]  ;;  %v6162_v17 = vld [vmem:[#allocation5 + $0x4e0] sm:$0xf]  ;;  %v5923_v50 = vor.u32 %v7083_v35, %v5922_v56  ;;  %v6147_v8 = vor.u32 %v7139_v40, %v6146_v39 }
 0x13d   :  { %v1850_v18 = vpop.f32.mrf.mxu2  ;;  %v1862_v23 = vadd.f32 %v1861_v51, %v1849_v6  ;;  %v5939_v27 = vor.u32 %v7087_v11, %v5938_v10  ;;  %v6402_v46 = vld [vmem:[#allocation5 + $0x6c0] sm:$0xf]  ;;  %v7554_v49 = vpack.c.bf16 %v2074_v58, %v2074_v58  ;;  %v6275_v51 = vor.u32 %v7171_v44, %v6274_v43  ;;  %v7131_v2 = vld [vmem:[#allocation5 + $0x48c] sm:$0xf0] }
 0x13e   :  { %3676 = vmatpush.bf16.msra.mxu3 %v6003_v16  ;;  %3651 = vmatpush.bf16.msra.mxu1 %v5731_v25  ;;  %v7051_v16 = vld [vmem:[#allocation5 + $0x20c] sm:$0xf0]  ;;  %v6290_v25 = vld [vmem:[#allocation5 + $0x5e0] sm:$0xf]  ;;  %v6403_v60 = vor.u32 %v7203_v47, %v6402_v46 }
 0x13f   :  { %v1863_v52 = vpop.f32.mrf.mxu3  ;;  %v5795_v34 = vor.u32 %v7051_v16, %v5794_v20  ;;  %v6130_v32 = vld [vmem:[#allocation5 + $0x4a0] sm:$0xf]  ;;  %v7163_v4 = vld [vmem:[#allocation5 + $0x58c] sm:$0xf0] }
 0x140   :  { %3664 = vmatpush.bf16.msra.mxu2 %v5859_v26  ;;  %3639 = vmatpush.bf16.msra.mxu0 %v5587_v37  ;;  %v7175_v26 = vld [vmem:[#allocation5 + $0x5ec] sm:$0xf0]  ;;  %v6258_v57 = vld [vmem:[#allocation5 + $0x5a0] sm:$0xf] }
 0x141   :  { %v6291_v37 = vor.u32 %v7175_v26, %v6290_v25  ;;  %v6259_v0 = vor.u32 %v7167_v59, %v6258_v57  ;;  %v6114_v1 = vld [vmem:[#allocation5 + $0x480] sm:$0xf]  ;;  %v7159_v14 = vld [vmem:[#allocation5 + $0x56c] sm:$0xf0] }
 0x142   :  { %3677 = vmatpush.bf16.msra.mxu3 %v5987_v36  ;;  %3652 = vmatpush.bf16.msra.mxu1 %v5715_v41  ;;  %v6163_v36 = vor.u32 %v7143_v24, %v6162_v17  ;;  %v2075_v41 = vmax.f32 %v1810_v21, 0.0  ;;  %v6242_v3 = vld [vmem:[#allocation5 + $0x580] sm:$0xf]  ;;  %v6115_v10 = vor.u32 %v7131_v2, %v6114_v1  ;;  %v7191_v17 = vld [vmem:[#allocation5 + $0x66c] sm:$0xf0] }
 0x143   :  { %v7567_v5 = vld [vmem:[%s7688_s2] sm:$0xff]  ;;  %v6243_v11 = vor.u32 %v7163_v4, %v6242_v3  ;;  %v7123_v25 = vld [vmem:[#allocation5 + $0x44c] sm:$0xf0] }
 0x144   :  { %3665 = vmatpush.bf16.msra.mxu2 %v5843_v42  ;;  %3640 = vmatpush.bf16.msra.mxu0 %v5571_v55  ;;  %v2076_v42 = vmax.f32 %v1862_v23, 0.0  ;;  %v7556_v53 = vpack.c.bf16 %v2075_v41, %v2075_v41  ;;  %v7135_v55 = vld [vmem:[#allocation5 + $0x4ac] sm:$0xf0]  ;;  %v351_v38 = vperm.slane %v7567_v5, 4  ;;  %v6098_v19 = vld [vmem:[#allocation5 + $0x460] sm:$0xf] }
 0x145   :  { %v6131_v63 = vor.u32 %v7135_v55, %v6130_v32  ;;  %v6226_v13 = vld [vmem:[#allocation5 + $0x560] sm:$0xf]  ;;  %v7151_v40 = vld [vmem:[#allocation5 + $0x52c] sm:$0xf0]  ;;  %v7013_v55 = vld [vmem:[#allocation5 + $0xe4] sm:$0xf] }
 0x146   :  { %3678 = vmatpush.bf16.msra.mxu3 %v5971_v54  ;;  %3653 = vmatpush.bf16.msra.mxu1 %v5699_v61  ;;  %v7558_v54 = vpack.c.bf16 %v2076_v42, %v2076_v42  ;;  %v6386_v61 = vld [vmem:[#allocation5 + $0x6a0] sm:$0xf]  ;;  %v6227_v23 = vor.u32 %v7159_v14, %v6226_v13  ;;  %v7183_v44 = vld [vmem:[#allocation5 + $0x62c] sm:$0xf0]  ;;  %v5636_v14 = vld [vmem:[#allocation5 + $0xd0] sm:$0xf0] }
 0x147   :  { %v6354_v16 = vld [vmem:[#allocation5 + $0x660] sm:$0xf]  ;;  %v7147_v32 = vld [vmem:[#allocation5 + $0x50c] sm:$0xf0] }
 0x148   :  { %3666 = vmatpush.bf16.msra.mxu2 %v5827_v62  ;;  %3641 = vmatpush.bf16.msra.mxu0 %v5555_v9  ;;  %v7199_v62 = vld [vmem:[#allocation5 + $0x6ac] sm:$0xf0]  ;;  %v6082_v24 = vld [vmem:[#allocation5 + $0x440] sm:$0xf]  ;;  %v6355_v29 = vor.u32 %v7191_v17, %v6354_v16 }
 0x149   :  { %v6387_v6 = vor.u32 %v7199_v62, %v6386_v61  ;;  %v7195_v9 = vld [vmem:[#allocation5 + $0x68c] sm:$0xf0]  ;;  %v6210_v26 = vld [vmem:[#allocation5 + $0x540] sm:$0xf]  ;;  %v6083_v56 = vor.u32 %v7123_v25, %v6082_v24  ;;  %v5652_v62 = vld [vmem:[#allocation5 + $0xf0] sm:$0xf0] }
 0x14a   :  { %3679 = vmatpush.bf16.msra.mxu3 %v5955_v7  ;;  %3654 = vmatpush.bf16.msra.mxu1 %v5683_v12  ;;  %v6370_v7 = vld [vmem:[#allocation5 + $0x680] sm:$0xf]  ;;  %v7239_v61 = vld [vmem:[#allocation5 + $0x7ec] sm:$0xf0] }
 0x14b   :  { %v1874_v12 = vpop.f32.mrf.mxu0  ;;  %v6371_v20 = vor.u32 %v7195_v9, %v6370_v7  ;;  %v6338_v31 = vld [vmem:[#allocation5 + $0x640] sm:$0xf]  ;;  %v7077_v9 = vld [vmem:[#allocation5 + $0x2e4] sm:$0xf]  ;;  %v7235_v13 = vld [vmem:[#allocation5 + $0x7cc] sm:$0xf0] }
 0x14c   :  { %3667 = vmatpush.bf16.msra.mxu2 %v5811_v22  ;;  %3642 = vmatpush.bf16.msra.mxu0 %v5539_v28  ;;  %v7127_v22 = vld [vmem:[#allocation5 + $0x46c] sm:$0xf0]  ;;  %v1875_v15 = vadd.f32 %v1874_v12, %v351_v38  ;;  %v6066_v58 = vld [vmem:[#allocation5 + $0x420] sm:$0xf]  ;;  %v7009_v12 = vld [vmem:[#allocation5 + $0xc4] sm:$0xf] }
 0x14d   :  { %v1887_v18 = vpop.f32.mrf.mxu1  ;;  %v6099_v21 = vor.u32 %v7127_v22, %v6098_v19  ;;  %v6194_v39 = vld [vmem:[#allocation5 + $0x520] sm:$0xf]  ;;  %v7179_v38 = vld [vmem:[#allocation5 + $0x60c] sm:$0xf0]  ;;  %v5639_v24 = vor.u32 %v7009_v12, %v5636_v14  ;;  %v7025_v12 = vld [vmem:[#allocation5 + $0x144] sm:$0xf] }
 0x14e   :  { %3680 = vmatpush.bf16.msra.mxu3 %v5939_v27  ;;  %3655 = vmatpush.bf16.msra.mxu1 %v5667_v33  ;;  %v1888_v52 = vadd.f32 %v1887_v18, %v1875_v15  ;;  %v7155_v27 = vld [vmem:[#allocation5 + $0x54c] sm:$0xf0]  ;;  %v6322_v43 = vld [vmem:[#allocation5 + $0x620] sm:$0xf]  ;;  %v6195_v47 = vor.u32 %v7151_v40, %v6194_v39  ;;  %v7041_v15 = vld [vmem:[#allocation5 + $0x1c4] sm:$0xf] }
 0x14f   :  { %3643 = vmatmul.bf16.vlgmr.msra.gmra.mxu0 %v7552_v48  ;;  %v7187_v33 = vld [vmem:[#allocation5 + $0x64c] sm:$0xf0]  ;;  %v6211_v35 = vor.u32 %v7155_v27, %v6210_v26  ;;  %v6323_v59 = vor.u32 %v7183_v44, %v6322_v43  ;;  %v6306_v4 = vld [vmem:[#allocation5 + $0x600] sm:$0xf]  ;;  %v5764_v18 = vld [vmem:[#allocation5 + $0x1d0] sm:$0xf0] }
 0x150   :  { %3668 = vmatpush.bf16.msra.mxu2 %v5795_v34  ;;  %3687 = vmatpush.bf16.msrb.mxu0 %v6163_v36  ;;  %v6339_v42 = vor.u32 %v7187_v33, %v6338_v31  ;;  %v6530_v22 = vld [vmem:[#allocation5 + $0x7c0] sm:$0xf]  ;;  %v5767_v25 = vor.u32 %v7041_v15, %v5764_v18  ;;  %v7005_v26 = vld [vmem:[#allocation5 + $0xa4] sm:$0xf]  ;;  %v5748_v31 = vld [vmem:[#allocation5 + $0x1b0] sm:$0xf0] }
 0x151   :  { %3656 = vmatmul.bf16.vlgmr.msra.gmra.mxu1 %v7554_v49  ;;  %v6531_v16 = vor.u32 %v7235_v13, %v6530_v22  ;;  %v6514_v27 = vld [vmem:[#allocation5 + $0x7a0] sm:$0xf]  ;;  %v7227_v40 = vld [vmem:[#allocation5 + $0x78c] sm:$0xf0]  ;;  %v5732_v43 = vld [vmem:[#allocation5 + $0x190] sm:$0xf0] }
 0x152   :  { %3700 = vmatpush.bf16.msrb.mxu1 %v6291_v37  ;;  %3681 = vmatpush.bf16.msra.mxu3 %v5923_v50  ;;  %v7119_v37 = vld [vmem:[#allocation5 + $0x42c] sm:$0xf0]  ;;  %v6050_v50 = vld [vmem:[#allocation5 + $0x400] sm:$0xf]  ;;  %v5700_v22 = vld [vmem:[#allocation5 + $0x150] sm:$0xf0] }
 0x153   :  { %3669 = vmatmul.bf16.vlgmr.msra.gmra.mxu2 %v7556_v53  ;;  %v1876_v36 = vpop.f32.mrf.mxu0  ;;  %v6067_v46 = vor.u32 %v7119_v37, %v6066_v58  ;;  %v7001_v37 = vld [vmem:[#allocation5 + $0x84] sm:$0xf]  ;;  %v6498_v39 = vld [vmem:[#allocation5 + $0x780] sm:$0xf] }
 0x154   :  { %3713 = vmatpush.bf16.msrb.mxu2 %v6419_v45  ;;  %3688 = vmatpush.bf16.msrb.mxu0 %v6147_v8  ;;  %v7115_v8 = vld [vmem:[#allocation5 + $0x40c] sm:$0xf0]  ;;  %v6499_v44 = vor.u32 %v7227_v40, %v6498_v39  ;;  %v7053_v39 = vld [vmem:[#allocation5 + $0x224] sm:$0xf]  ;;  %v5812_v40 = vld [vmem:[#allocation5 + $0x230] sm:$0xf0] }
 0x155   :  { %3682 = vmatmul.bf16.vlgmr.msra.gmra.mxu3 %v7558_v54  ;;  %v1900_v28 = vpop.f32.mrf.mxu2  ;;  %v1889_v41 = vpop.f32.mrf.mxu1 }
 0x156   :  { %3701 = vmatpush.bf16.msrb.mxu1 %v6275_v51  ;;  %v1901_v34 = vadd.f32 %v1900_v28, %v1888_v52  ;;  %v6178_v51 = vld [vmem:[#allocation5 + $0x500] sm:$0xf]  ;;  %v7231_v28 = vld [vmem:[#allocation5 + $0x7ac] sm:$0xf0]  ;;  %v5604_v41 = vld [vmem:[#allocation5 + $0x90] sm:$0xf0] }
 0x157   :  { %v1913_v30 = vpop.f32.mrf.mxu3  ;;  %v6179_v7 = vor.u32 %v7147_v32, %v6178_v51  ;;  %v6515_v33 = vor.u32 %v7231_v28, %v6514_v27  ;;  %v6997_v32 = vld [vmem:[#allocation5 + $0x64] sm:$0xf]  ;;  %v5556_v28 = vld [vmem:[#allocation5 + $0x30] sm:$0xf0] }
 0x158   :  { %3714 = vmatpush.bf16.msrb.mxu2 %v6403_v60  ;;  %3689 = vmatpush.bf16.msrb.mxu0 %v6131_v63  ;;  %v1914_v45 = vadd.f32 %v1913_v30, %v1901_v34  ;;  %v6546_v60 = vld [vmem:[#allocation5 + $0x7e0] sm:$0xf]  ;;  %v7045_v63 = vld [vmem:[#allocation5 + $0x1e4] sm:$0xf] }
 0x159   :  { %v6547_v2 = vor.u32 %v7239_v61, %v6546_v60  ;;  %v7037_v30 = vld [vmem:[#allocation5 + $0x1a4] sm:$0xf]  ;;  %v5588_v60 = vld [vmem:[#allocation5 + $0x70] sm:$0xf0] }
 0x15a   :  { %3702 = vmatpush.bf16.msrb.mxu1 %v6259_v0  ;;  %v5780_v0 = vld [vmem:[#allocation5 + $0x1f0] sm:$0xf0]  ;;  %v2077_v3 = vmax.f32 %v1914_v45, 0.0  ;;  %v5751_v36 = vor.u32 %v7037_v30, %v5748_v31  ;;  %v352_v45 = vperm.slane %v7567_v5, 5  ;;  %v7029_v61 = vld [vmem:[#allocation5 + $0x164] sm:$0xf] }
 0x15b   :  { %v5783_v19 = vor.u32 %v7045_v63, %v5780_v0  ;;  %3726 = vmatpush.bf16.msrb.mxu3 %v6547_v2  ;;  %v5684_v30 = vld [vmem:[#allocation5 + $0x130] sm:$0xf0] }
 0x15c   :  { %3715 = vmatpush.bf16.msrb.mxu2 %v6387_v6  ;;  %3690 = vmatpush.bf16.msrb.mxu0 %v6115_v10  ;;  %v6051_v6 = vor.u32 %v7115_v8, %v6050_v50  ;;  %v5908_v10 = vld [vmem:[#allocation5 + $0x2f0] sm:$0xf0]  ;;  %v7570_v17 = vpack.c.bf16 %v2077_v3, %v2077_v3  ;;  %v5607_v8 = vor.u32 %v7001_v37, %v5604_v41  ;;  %v7061_v3 = vld [vmem:[#allocation5 + $0x264] sm:$0xf] }
 0x15d   :  { %v1902_v57 = vpop.f32.mrf.mxu2  ;;  %v5911_v52 = vor.u32 %v7077_v9, %v5908_v10  ;;  %v6993_v9 = vld [vmem:[#allocation5 + $0x44] sm:$0xf]  ;;  %v6466_v10 = vld [vmem:[#allocation5 + $0x740] sm:$0xf] }
 0x15e   :  { %3703 = vmatpush.bf16.msrb.mxu1 %v6243_v11  ;;  %v5655_v11 = vor.u32 %v7013_v55, %v5652_v62  ;;  %v6482_v55 = vld [vmem:[#allocation5 + $0x760] sm:$0xf]  ;;  %v7223_v57 = vld [vmem:[#allocation5 + $0x76c] sm:$0xf0]  ;;  %v5716_v62 = vld [vmem:[#allocation5 + $0x170] sm:$0xf0] }
 0x15f   :  { %v1915_v1 = vpop.f32.mrf.mxu3  ;;  %3727 = vmatpush.bf16.msrb.mxu3 %v6531_v16  ;;  %v6483_v63 = vor.u32 %v7223_v57, %v6482_v55  ;;  %v7057_v16 = vld [vmem:[#allocation5 + $0x244] sm:$0xf]  ;;  %v5815_v55 = vor.u32 %v7053_v39, %v5812_v40  ;;  %v6228_v40 = vld [vmem:[#allocation5 + $0x570] sm:$0xf0] }
 0x160   :  { %3716 = vmatpush.bf16.msrb.mxu2 %v6371_v20  ;;  %3691 = vmatpush.bf16.msrb.mxu0 %v6099_v21  ;;  %v6307_v20 = vor.u32 %v7179_v38, %v6306_v4  ;;  %v7073_v21 = vld [vmem:[#allocation5 + $0x2c4] sm:$0xf]  ;;  %v5844_v4 = vld [vmem:[#allocation5 + $0x270] sm:$0xf0] }
 0x161   :  { %v5847_v15 = vor.u32 %v7061_v3, %v5844_v4  ;;  %v7017_v37 = vld [vmem:[#allocation5 + $0x104] sm:$0xf] }
 0x162   :  { %3704 = vmatpush.bf16.msrb.mxu1 %v6227_v23  ;;  %v5892_v23 = vld [vmem:[#allocation5 + $0x2d0] sm:$0xf0]  ;;  %v7157_v39 = vld [vmem:[#allocation5 + $0x564] sm:$0xf] }
 0x163   :  { %v5895_v34 = vor.u32 %v7073_v21, %v5892_v23  ;;  %3728 = vmatpush.bf16.msrb.mxu3 %v6515_v33  ;;  %v5703_v23 = vor.u32 %v7025_v12, %v5700_v22 }
 0x164   :  { %3717 = vmatpush.bf16.msrb.mxu2 %v6355_v29  ;;  %3692 = vmatpush.bf16.msrb.mxu0 %v6083_v56  ;;  %v5620_v29 = vld [vmem:[#allocation5 + $0xb0] sm:$0xf0]  ;;  %v7069_v56 = vld [vmem:[#allocation5 + $0x2a4] sm:$0xf] }
 0x165   :  { %v5623_v58 = vor.u32 %v7005_v26, %v5620_v29  ;;  %v7215_v26 = vld [vmem:[#allocation5 + $0x72c] sm:$0xf0]  ;;  %v7021_v29 = vld [vmem:[#allocation5 + $0x124] sm:$0xf] }
 0x166   :  { %3705 = vmatpush.bf16.msrb.mxu1 %v6211_v35  ;;  %v5876_v35 = vld [vmem:[#allocation5 + $0x2b0] sm:$0xf0] }
 0x167   :  { %v5879_v50 = vor.u32 %v7069_v56, %v5876_v35  ;;  %3729 = vmatpush.bf16.msrb.mxu3 %v6499_v44  ;;  %v7141_v44 = vld [vmem:[#allocation5 + $0x4e4] sm:$0xf] }
 0x168   :  { %3718 = vmatpush.bf16.msrb.mxu2 %v6339_v42  ;;  %3693 = vmatpush.bf16.msrb.mxu0 %v6067_v46  ;;  %v7033_v42 = vld [vmem:[#allocation5 + $0x184] sm:$0xf] }
 0x169   :  { %v7065_v46 = vld [vmem:[#allocation5 + $0x284] sm:$0xf]  ;;  %v5735_v51 = vor.u32 %v7033_v42, %v5732_v43  ;;  %v5687_v42 = vor.u32 %v7021_v29, %v5684_v30  ;;  %v5668_v43 = vld [vmem:[#allocation5 + $0x110] sm:$0xf0] }
 0x16a   :  { %3706 = vmatpush.bf16.msrb.mxu1 %v6195_v47  ;;  %v5860_v47 = vld [vmem:[#allocation5 + $0x290] sm:$0xf0]  ;;  %v7161_v29 = vld [vmem:[#allocation5 + $0x584] sm:$0xf] }
 0x16b   :  { %v5863_v2 = vor.u32 %v7065_v46, %v5860_v47  ;;  %3730 = vmatpush.bf16.msrb.mxu3 %v6483_v63  ;;  %v6164_v46 = vld [vmem:[#allocation5 + $0x4f0] sm:$0xf0]  ;;  %v7173_v47 = vld [vmem:[#allocation5 + $0x5e4] sm:$0xf] }
 0x16c   :  { %3719 = vmatpush.bf16.msrb.mxu2 %v6323_v59  ;;  %3694 = vmatpush.bf16.msrb.mxu0 %v6051_v6  ;;  %v1926_v59 = vpop.f32.mrf.mxu0  ;;  %v5591_v6 = vor.u32 %v6997_v32, %v5588_v60  ;;  %v6036_v60 = vld [vmem:[#allocation5 + $0x3f0] sm:$0xf0]  ;;  %v6167_v3 = vor.u32 %v7141_v44, %v6164_v46  ;;  %v6231_v46 = vor.u32 %v7157_v39, %v6228_v40  ;;  %v5642_v39 = vld [vmem:[#allocation5 + $0xc8] sm:$0xf] }
 0x16d   :  { %v1927_v0 = vadd.f32 %v1926_v59, %v352_v45  ;;  %v1939_v1 = vpop.f32.mrf.mxu1  ;;  %v6434_v45 = vld [vmem:[#allocation5 + $0x700] sm:$0xf]  ;;  %v7109_v59 = vld [vmem:[#allocation5 + $0x3e4] sm:$0xf]  ;;  %v5796_v63 = vld [vmem:[#allocation5 + $0x210] sm:$0xf0] }
 0x16e   :  { %3707 = vmatpush.bf16.msrb.mxu1 %v6179_v7  ;;  %v5719_v7 = vor.u32 %v7029_v61, %v5716_v62  ;;  %v7049_v62 = vld [vmem:[#allocation5 + $0x204] sm:$0xf]  ;;  %v6244_v30 = vld [vmem:[#allocation5 + $0x590] sm:$0xf0] }
 0x16f   :  { %3695 = vmatmul.bf16.vlgmr.msrb.gmra.mxu0 %v7570_v17  ;;  %v1940_v38 = vadd.f32 %v1939_v1, %v1927_v0  ;;  %v6039_v0 = vor.u32 %v7109_v59, %v6036_v60  ;;  %v6212_v59 = vld [vmem:[#allocation5 + $0x550] sm:$0xf0] }
 0x170   :  { %3739 = vmatpush.bf16.msra.mxu0 %v5655_v11  ;;  %3720 = vmatpush.bf16.msrb.mxu2 %v6307_v20  ;;  %v7219_v11 = vld [vmem:[#allocation5 + $0x74c] sm:$0xf0] }
 0x171   :  { %v6467_v13 = vor.u32 %v7219_v11, %v6466_v10  ;;  %v5799_v10 = vor.u32 %v7049_v62, %v5796_v63  ;;  %v7105_v11 = vld [vmem:[#allocation5 + $0x3c4] sm:$0xf] }
 0x172   :  { %3752 = vmatpush.bf16.msra.mxu1 %v5783_v19  ;;  %v5572_v19 = vld [vmem:[#allocation5 + $0x50] sm:$0xf0] }
 0x173   :  { %v5575_v21 = vor.u32 %v6993_v9, %v5572_v19  ;;  %3731 = vmatpush.bf16.msrb.mxu3 %v6467_v13  ;;  %v6276_v9 = vld [vmem:[#allocation5 + $0x5d0] sm:$0xf0] }
 0x174   :  { %3765 = vmatpush.bf16.msra.mxu2 %v5911_v52  ;;  %3740 = vmatpush.bf16.msra.mxu0 %v5639_v24  ;;  %v5828_v52 = vld [vmem:[#allocation5 + $0x250] sm:$0xf0]  ;;  %v6989_v24 = vld [vmem:[#allocation5 + $0x24] sm:$0xf]  ;;  %v1928_v31 = vpop.f32.mrf.mxu0 }
 0x175   :  { %v1952_v14 = vpop.f32.mrf.mxu2  ;;  %v5831_v56 = vor.u32 %v7057_v16, %v5828_v52  ;;  %v5559_v41 = vor.u32 %v6989_v24, %v5556_v28  ;;  %v6020_v19 = vld [vmem:[#allocation5 + $0x3d0] sm:$0xf0]  ;;  %v7165_v16 = vld [vmem:[#allocation5 + $0x5a4] sm:$0xf] }
 0x176   :  { %3753 = vmatpush.bf16.msra.mxu1 %v5767_v25  ;;  %v1953_v18 = vadd.f32 %v1952_v14, %v1940_v38  ;;  %v6450_v25 = vld [vmem:[#allocation5 + $0x720] sm:$0xf]  ;;  %v7137_v38 = vld [vmem:[#allocation5 + $0x4c4] sm:$0xf]  ;;  %v6023_v12 = vor.u32 %v7105_v11, %v6020_v19  ;;  %v6260_v52 = vld [vmem:[#allocation5 + $0x5b0] sm:$0xf0] }
 0x177   :  { %v1965_v20 = vpop.f32.mrf.mxu3  ;;  %v6451_v33 = vor.u32 %v7215_v26, %v6450_v25  ;;  %v7133_v14 = vld [vmem:[#allocation5 + $0x4a4] sm:$0xf]  ;;  %v6263_v24 = vor.u32 %v7165_v16, %v6260_v52  ;;  %v6116_v28 = vld [vmem:[#allocation5 + $0x490] sm:$0xf0] }
 0x178   :  { %3766 = vmatpush.bf16.msra.mxu2 %v5895_v34  ;;  %3741 = vmatpush.bf16.msra.mxu0 %v5623_v58  ;;  %v1966_v27 = vadd.f32 %v1965_v20, %v1953_v18  ;;  %v1941_v34 = vpop.f32.mrf.mxu1  ;;  %v6985_v58 = vld [vmem:[#allocation5 + $0x4] sm:$0xf]  ;;  %v6004_v18 = vld [vmem:[#allocation5 + $0x3b0] sm:$0xf0] }
 0x179   :  { %3732 = vmatpush.bf16.msrb.mxu3 %v6451_v33  ;;  %v6132_v20 = vld [vmem:[#allocation5 + $0x4b0] sm:$0xf0]  ;;  %v7129_v25 = vld [vmem:[#allocation5 + $0x484] sm:$0xf]  ;;  %v353_v33 = vperm.slane %v7567_v5, 6 }
 0x17a   :  { %3754 = vmatpush.bf16.msra.mxu1 %v5751_v36  ;;  %v2078_v35 = vmax.f32 %v1966_v27, 0.0  ;;  %v5540_v36 = vld [vmem:[#allocation5 + $0x10] sm:$0xf0]  ;;  %v7097_v26 = vld [vmem:[#allocation5 + $0x384] sm:$0xf]  ;;  %v6119_v34 = vor.u32 %v7129_v25, %v6116_v28 }
 0x17b   :  { %v5543_v1 = vor.u32 %v6985_v58, %v5540_v36  ;;  %v5988_v27 = vld [vmem:[#allocation5 + $0x390] sm:$0xf0]  ;;  %v7093_v58 = vld [vmem:[#allocation5 + $0x364] sm:$0xf]  ;;  %v5786_v28 = vld [vmem:[#allocation5 + $0x1e8] sm:$0xf] }
 0x17c   :  { %3767 = vmatpush.bf16.msra.mxu2 %v5879_v50  ;;  %3742 = vmatpush.bf16.msra.mxu0 %v5607_v8  ;;  %v7574_v50 = vpack.c.bf16 %v2078_v35, %v2078_v35  ;;  %v7211_v8 = vld [vmem:[#allocation5 + $0x70c] sm:$0xf0]  ;;  %v5991_v31 = vor.u32 %v7097_v26, %v5988_v27  ;;  %v7125_v35 = vld [vmem:[#allocation5 + $0x464] sm:$0xf]  ;;  %v5972_v36 = vld [vmem:[#allocation5 + $0x370] sm:$0xf0] }
 0x17d   :  { %v1954_v32 = vpop.f32.mrf.mxu2  ;;  %v6435_v57 = vor.u32 %v7211_v8, %v6434_v45  ;;  %v7089_v8 = vld [vmem:[#allocation5 + $0x344] sm:$0xf]  ;;  %v7016_v27 = vld [vmem:[#allocation5 + $0xf4] sm:$0xf0] }
 0x17e   :  { %3755 = vmatpush.bf16.msra.mxu1 %v5735_v51  ;;  %v6292_v51 = vld [vmem:[#allocation5 + $0x5f0] sm:$0xf0]  ;;  %v7205_v19 = vld [vmem:[#allocation5 + $0x6e4] sm:$0xf] }
 0x17f   :  { %3708 = vmatmul.bf16.vlgmr.msrb.gmra.mxu1 %v7574_v50  ;;  %v1967_v61 = vpop.f32.mrf.mxu3  ;;  %v6295_v4 = vor.u32 %v7173_v47, %v6292_v51  ;;  %3733 = vmatpush.bf16.msrb.mxu3 %v6435_v57  ;;  %v7121_v47 = vld [vmem:[#allocation5 + $0x444] sm:$0xf]  ;;  %v5956_v51 = vld [vmem:[#allocation5 + $0x350] sm:$0xf0] }
 0x180   :  { %3768 = vmatpush.bf16.msra.mxu2 %v5863_v2  ;;  %3743 = vmatpush.bf16.msra.mxu0 %v5591_v6  ;;  %v5671_v2 = vor.u32 %v7017_v37, %v5668_v43  ;;  %v6148_v6 = vld [vmem:[#allocation5 + $0x4d0] sm:$0xf0]  ;;  %v7153_v57 = vld [vmem:[#allocation5 + $0x544] sm:$0xf]  ;;  %v5959_v60 = vor.u32 %v7089_v8, %v5956_v51  ;;  %v5626_v8 = vld [vmem:[#allocation5 + $0xa8] sm:$0xf] }
 0x181   :  { %v6151_v22 = vor.u32 %v7137_v38, %v6148_v6  ;;  %v6100_v37 = vld [vmem:[#allocation5 + $0x470] sm:$0xf0]  ;;  %v7149_v6 = vld [vmem:[#allocation5 + $0x524] sm:$0xf] }
 0x182   :  { %3756 = vmatpush.bf16.msra.mxu1 %v5719_v7  ;;  %v7169_v7 = vld [vmem:[#allocation5 + $0x5c4] sm:$0xf]  ;;  %v6103_v45 = vor.u32 %v7125_v35, %v6100_v37  ;;  %v6068_v38 = vld [vmem:[#allocation5 + $0x430] sm:$0xf0] }
 0x183   :  { %3778 = vmatpush.bf16.msra.mxu3 %v6039_v0  ;;  %v6279_v13 = vor.u32 %v7169_v7, %v6276_v9  ;;  %v6196_v7 = vld [vmem:[#allocation5 + $0x530] sm:$0xf0]  ;;  %v7145_v16 = vld [vmem:[#allocation5 + $0x504] sm:$0xf] }
 0x184   :  { %3769 = vmatpush.bf16.msra.mxu2 %v5847_v15  ;;  %3744 = vmatpush.bf16.msra.mxu0 %v5575_v21  ;;  %v7101_v15 = vld [vmem:[#allocation5 + $0x3a4] sm:$0xf] }
 0x185   :  { %v6007_v21 = vor.u32 %v7101_v15, %v6004_v18  ;;  %v7081_v52 = vld [vmem:[#allocation5 + $0x304] sm:$0xf] }
 0x186   :  { %3757 = vmatpush.bf16.msra.mxu1 %v5703_v23  ;;  %v6135_v23 = vor.u32 %v7133_v14, %v6132_v20  ;;  %v6052_v14 = vld [vmem:[#allocation5 + $0x410] sm:$0xf0]  ;;  %v6199_v20 = vor.u32 %v7149_v6, %v6196_v7 }
 0x187   :  { %3779 = vmatpush.bf16.msra.mxu3 %v6023_v12  ;;  %v6420_v12 = vld [vmem:[#allocation5 + $0x6f0] sm:$0xf0] }
 0x188   :  { %3770 = vmatpush.bf16.msra.mxu2 %v5831_v56  ;;  %3745 = vmatpush.bf16.msra.mxu0 %v5559_v41  ;;  %v6247_v56 = vor.u32 %v7161_v29, %v6244_v30  ;;  %v5975_v41 = vor.u32 %v7093_v58, %v5972_v36  ;;  %v6423_v26 = vor.u32 %v7205_v19, %v6420_v12  ;;  %v7048_v29 = vld [vmem:[#allocation5 + $0x1f4] sm:$0xf0]  ;;  %v6356_v6 = vld [vmem:[#allocation5 + $0x670] sm:$0xf0]  ;;  %v5722_v19 = vld [vmem:[#allocation5 + $0x168] sm:$0xf] }
 0x189   :  { %v5787_v37 = vor.u32 %v7048_v29, %v5786_v28  ;;  %v7032_v12 = vld [vmem:[#allocation5 + $0x174] sm:$0xf0]  ;;  %v7181_v28 = vld [vmem:[#allocation5 + $0x624] sm:$0xf]  ;;  %v6324_v29 = vld [vmem:[#allocation5 + $0x630] sm:$0xf0] }
 0x18a   :  { %3758 = vmatpush.bf16.msra.mxu1 %v5687_v42 }
 0x18b   :  { %3780 = vmatpush.bf16.msra.mxu3 %v6007_v21  ;;  %v1978_v42 = vpop.f32.mrf.mxu0  ;;  %v6180_v21 = vld [vmem:[#allocation5 + $0x510] sm:$0xf0] }
 0x18c   :  { %3771 = vmatpush.bf16.msra.mxu2 %v5815_v55  ;;  %3746 = vmatpush.bf16.msra.mxu0 %v5543_v1  ;;  %v1979_v43 = vadd.f32 %v1978_v42, %v353_v33  ;;  %v6084_v55 = vld [vmem:[#allocation5 + $0x450] sm:$0xf0]  ;;  %v6215_v1 = vor.u32 %v7153_v57, %v6212_v59  ;;  %v7201_v33 = vld [vmem:[#allocation5 + $0x6c4] sm:$0xf]  ;;  %v6183_v35 = vor.u32 %v7145_v16, %v6180_v21  ;;  %v5770_v42 = vld [vmem:[#allocation5 + $0x1c8] sm:$0xf] }
 0x18d   :  { %v1991_v44 = vpop.f32.mrf.mxu1  ;;  %v6087_v0 = vor.u32 %v7121_v47, %v6084_v55  ;;  %v5754_v55 = vld [vmem:[#allocation5 + $0x1a8] sm:$0xf]  ;;  %v7040_v57 = vld [vmem:[#allocation5 + $0x1b4] sm:$0xf0]  ;;  %v7193_v59 = vld [vmem:[#allocation5 + $0x684] sm:$0xf]  ;;  %v5723_v16 = vor.u32 %v7032_v12, %v5722_v19 }
 0x18e   :  { %3759 = vmatpush.bf16.msra.mxu1 %v5671_v2  ;;  %v1992_v32 = vadd.f32 %v1991_v44, %v1979_v43  ;;  %v7117_v2 = vld [vmem:[#allocation5 + $0x424] sm:$0xf]  ;;  %v7044_v43 = vld [vmem:[#allocation5 + $0x1d4] sm:$0xf0] }
 0x18f   :  { %3747 = vmatmul.bf16.vlgmr.msra.gmra.mxu0 %v7552_v48  ;;  %3781 = vmatpush.bf16.msra.mxu3 %v5991_v31  ;;  %v6071_v18 = vor.u32 %v7117_v2, %v6068_v38  ;;  %v7197_v44 = vld [vmem:[#allocation5 + $0x6a4] sm:$0xf]  ;;  %v5771_v47 = vor.u32 %v7044_v43, %v5770_v42  ;;  %v5738_v2 = vld [vmem:[#allocation5 + $0x188] sm:$0xf]  ;;  %v6996_v21 = vld [vmem:[#allocation5 + $0x54] sm:$0xf0] }
 0x190   :  { %3791 = vmatpush.bf16.msrb.mxu0 %v6167_v3  ;;  %3772 = vmatpush.bf16.msra.mxu2 %v5799_v10  ;;  %v7085_v3 = vld [vmem:[#allocation5 + $0x324] sm:$0xf]  ;;  %v6308_v43 = vld [vmem:[#allocation5 + $0x610] sm:$0xf0]  ;;  %v7076_v19 = vld [vmem:[#allocation5 + $0x2d4] sm:$0xf0] }
 0x191   :  { %3760 = vmatmul.bf16.vlgmr.msra.gmra.mxu1 %v7554_v49  ;;  %v7189_v38 = vld [vmem:[#allocation5 + $0x664] sm:$0xf] }
 0x192   :  { %3804 = vmatpush.bf16.msrb.mxu1 %v6295_v4  ;;  %v5940_v4 = vld [vmem:[#allocation5 + $0x330] sm:$0xf0]  ;;  %v7177_v42 = vld [vmem:[#allocation5 + $0x604] sm:$0xf] }
 0x193   :  { %3782 = vmatpush.bf16.msra.mxu3 %v5975_v41  ;;  %v5943_v9 = vor.u32 %v7085_v3, %v5940_v4  ;;  %v1980_v11 = vpop.f32.mrf.mxu0  ;;  %v7012_v41 = vld [vmem:[#allocation5 + $0xd4] sm:$0xf0]  ;;  %v354_v4 = vperm.slane %v7567_v5, 7 }
 0x194   :  { %3792 = vmatpush.bf16.msrb.mxu0 %v6151_v22  ;;  %v7036_v3 = vld [vmem:[#allocation5 + $0x194] sm:$0xf0] }
 0x195   :  { %v2004_v61 = vpop.f32.mrf.mxu2  ;;  %v1993_v22 = vpop.f32.mrf.mxu1  ;;  %v7000_v11 = vld [vmem:[#allocation5 + $0x74] sm:$0xf0] }
 0x196   :  { %3805 = vmatpush.bf16.msrb.mxu1 %v6279_v13  ;;  %v2005_v62 = vadd.f32 %v2004_v61, %v1992_v32  ;;  %v7113_v13 = vld [vmem:[#allocation5 + $0x404] sm:$0xf]  ;;  %v7008_v32 = vld [vmem:[#allocation5 + $0xb4] sm:$0xf0] }
 0x197   :  { %v2017_v63 = vpop.f32.mrf.mxu3  ;;  %3783 = vmatpush.bf16.msra.mxu3 %v5959_v60  ;;  %v6372_v60 = vld [vmem:[#allocation5 + $0x690] sm:$0xf0]  ;;  %v5627_v61 = vor.u32 %v7008_v32, %v5626_v8  ;;  %v7080_v32 = vld [vmem:[#allocation5 + $0x2f4] sm:$0xf0] }
 0x198   :  { %3793 = vmatpush.bf16.msrb.mxu0 %v6135_v23  ;;  %v2018_v10 = vadd.f32 %v2017_v63, %v2005_v62  ;;  %v5658_v23 = vld [vmem:[#allocation5 + $0xe8] sm:$0xf]  ;;  %v5755_v62 = vor.u32 %v7040_v57, %v5754_v55  ;;  %v6988_v57 = vld [vmem:[#allocation5 + $0x14] sm:$0xf0] }
 0x199   :  { %v5659_v36 = vor.u32 %v7016_v27, %v5658_v23  ;;  %v5610_v63 = vld [vmem:[#allocation5 + $0x88] sm:$0xf] }
 0x19a   :  { %3806 = vmatpush.bf16.msrb.mxu1 %v6263_v24  ;;  %v2079_v15 = vmax.f32 %v2018_v10, 0.0  ;;  %v5924_v24 = vld [vmem:[#allocation5 + $0x310] sm:$0xf0]  ;;  %v5594_v10 = vld [vmem:[#allocation5 + $0x68] sm:$0xf] }
 0x19b   :  { %3784 = vmatpush.bf16.msra.mxu3 %v5943_v9  ;;  %v5927_v30 = vor.u32 %v7081_v52, %v5924_v24  ;;  %v5739_v9 = vor.u32 %v7036_v3, %v5738_v2  ;;  %v5595_v5 = vor.u32 %v7000_v11, %v5594_v10  ;;  %v5578_v52 = vld [vmem:[#allocation5 + $0x48] sm:$0xf]  ;;  %v7028_v24 = vld [vmem:[#allocation5 + $0x154] sm:$0xf0]  ;;  %v6532_v10 = vld [vmem:[#allocation5 + $0x7d0] sm:$0xf0] }
 0x19c   :  { %3794 = vmatpush.bf16.msrb.mxu0 %v6119_v34  ;;  %v7580_v25 = vpack.c.bf16 %v2079_v15, %v2079_v15  ;;  %v6404_v34 = vld [vmem:[#allocation5 + $0x6d0] sm:$0xf0]  ;;  %v5706_v23 = vld [vmem:[#allocation5 + $0x148] sm:$0xf] }
 0x19d   :  { %v2006_v31 = vpop.f32.mrf.mxu2  ;;  %v6407_v40 = vor.u32 %v7201_v33, %v6404_v34  ;;  %v5562_v33 = vld [vmem:[#allocation5 + $0x28] sm:$0xf] }
 0x19e   :  { %3807 = vmatpush.bf16.msrb.mxu1 %v6247_v56  ;;  %v6055_v56 = vor.u32 %v7113_v13, %v6052_v14  ;;  %3721 = vmatmul.bf16.vlgmr.msrb.gmra.mxu2 %v7580_v25  ;;  %v6359_v14 = vor.u32 %v7189_v38, %v6356_v6  ;;  %v5707_v31 = vor.u32 %v7028_v24, %v5706_v23  ;;  %v5546_v55 = vld [vmem:[#allocation5 + $0x8] sm:$0xf]  ;;  %v7233_v38 = vld [vmem:[#allocation5 + $0x7c4] sm:$0xf]  ;;  %v6516_v23 = vld [vmem:[#allocation5 + $0x7b0] sm:$0xf0] }
 0x19f   :  { %v2019_v58 = vpop.f32.mrf.mxu3  ;;  %3785 = vmatpush.bf16.msra.mxu3 %v5927_v30  ;;  %3817 = vmatpush.bf16.msrb.mxu2 %v6423_v26  ;;  %v5579_v30 = vor.u32 %v6996_v21, %v5578_v52  ;;  %v6298_v3 = vld [vmem:[#allocation5 + $0x5e8] sm:$0xf]  ;;  %v7172_v52 = vld [vmem:[#allocation5 + $0x5d4] sm:$0xf0]  ;;  %v7229_v21 = vld [vmem:[#allocation5 + $0x7a4] sm:$0xf] }
 0x1a0   :  { %3795 = vmatpush.bf16.msrb.mxu0 %v6103_v45  ;;  %v6388_v45 = vld [vmem:[#allocation5 + $0x6b0] sm:$0xf0]  ;;  %v5690_v58 = vld [vmem:[#allocation5 + $0x128] sm:$0xf] }
 0x1a1   :  { %v6391_v51 = vor.u32 %v7197_v44, %v6388_v45  ;;  %v7237_v44 = vld [vmem:[#allocation5 + $0x7e4] sm:$0xf]  ;;  %v6548_v45 = vld [vmem:[#allocation5 + $0x7f0] sm:$0xf0]  ;;  %v5898_v11 = vld [vmem:[#allocation5 + $0x2c8] sm:$0xf] }
 0x1a2   :  { %3808 = vmatpush.bf16.msrb.mxu1 %v6231_v46  ;;  %v5643_v46 = vor.u32 %v7012_v41, %v5642_v39  ;;  %v6327_v41 = vor.u32 %v7181_v28, %v6324_v29  ;;  %v5882_v24 = vld [vmem:[#allocation5 + $0x2a8] sm:$0xf] }
 0x1a3   :  { %3818 = vmatpush.bf16.msrb.mxu2 %v6407_v40  ;;  %v6138_v29 = vld [vmem:[#allocation5 + $0x4a8] sm:$0xf] }
 0x1a4   :  { %3796 = vmatpush.bf16.msrb.mxu0 %v6087_v0  ;;  %v6375_v0 = vor.u32 %v7193_v59, %v6372_v60  ;;  %v5674_v59 = vld [vmem:[#allocation5 + $0x108] sm:$0xf]  ;;  %v7020_v60 = vld [vmem:[#allocation5 + $0x114] sm:$0xf0] }
 0x1a6   :  { %3809 = vmatpush.bf16.msrb.mxu1 %v6215_v1  ;;  %v7004_v1 = vld [vmem:[#allocation5 + $0x94] sm:$0xf0] }
 0x1a7   :  { %3819 = vmatpush.bf16.msrb.mxu2 %v6391_v51  ;;  %v5611_v7 = vor.u32 %v7004_v1, %v5610_v63  ;;  %v5914_v51 = vld [vmem:[#allocation5 + $0x2e8] sm:$0xf]  ;;  %v6551_v1 = vor.u32 %v7237_v44, %v6548_v45  ;;  %v7132_v44 = vld [vmem:[#allocation5 + $0x494] sm:$0xf0] }
 0x1a8   :  { %3797 = vmatpush.bf16.msrb.mxu0 %v6071_v18  ;;  %v7185_v18 = vld [vmem:[#allocation5 + $0x644] sm:$0xf]  ;;  %v6170_v63 = vld [vmem:[#allocation5 + $0x4e8] sm:$0xf]  ;;  %v5915_v2 = vor.u32 %v7080_v32, %v5914_v51  ;;  %v6484_v32 = vld [vmem:[#allocation5 + $0x770] sm:$0xf0] }
 0x1a9   :  { %v7221_v51 = vld [vmem:[#allocation5 + $0x764] sm:$0xf] }
 0x1aa   :  { %3810 = vmatpush.bf16.msrb.mxu1 %v6199_v20  ;;  %v6340_v20 = vld [vmem:[#allocation5 + $0x650] sm:$0xf0] }
 0x1ab   :  { %3820 = vmatpush.bf16.msrb.mxu2 %v6375_v0  ;;  %v6343_v27 = vor.u32 %v7185_v18, %v6340_v20  ;;  %v7144_v0 = vld [vmem:[#allocation5 + $0x4f4] sm:$0xf0]  ;;  %v6535_v20 = vor.u32 %v7233_v38, %v6532_v10  ;;  %v5834_v10 = vld [vmem:[#allocation5 + $0x248] sm:$0xf] }
 0x1ac   :  { %3798 = vmatpush.bf16.msrb.mxu0 %v6055_v56  ;;  %v2030_v22 = vpop.f32.mrf.mxu0  ;;  %v7140_v18 = vld [vmem:[#allocation5 + $0x4d4] sm:$0xf0] }
 0x1ad   :  { %v2031_v15 = vadd.f32 %v2030_v22, %v354_v4  ;;  %v7176_v4 = vld [vmem:[#allocation5 + $0x5f4] sm:$0xf0] }
 0x1ae   :  { %3811 = vmatpush.bf16.msrb.mxu1 %v6183_v35  ;;  %v2043_v13 = vpop.f32.mrf.mxu1  ;;  %3773 = vmatmul.bf16.vlgmr.msra.gmra.mxu2 %v7556_v53  ;;  %v6992_v35 = vld [vmem:[#allocation5 + $0x34] sm:$0xf0] }
 0x1af   :  { %3799 = vmatmul.bf16.vlgmr.msrb.gmra.mxu0 %v7570_v17  ;;  %v2044_v26 = vadd.f32 %v2043_v13, %v2031_v15  ;;  %3821 = vmatpush.bf16.msrb.mxu2 %v6359_v14  ;;  %v6171_v13 = vor.u32 %v7144_v0, %v6170_v63  ;;  %v6299_v14 = vor.u32 %v7176_v4, %v6298_v3  ;;  %v6154_v15 = vld [vmem:[#allocation5 + $0x4c8] sm:$0xf]  ;;  %v7160_v3 = vld [vmem:[#allocation5 + $0x574] sm:$0xf0]  ;;  %v7217_v4 = vld [vmem:[#allocation5 + $0x744] sm:$0xf] }
 0x1b0   :  { %3843 = vmatpush.bf16.msra.mxu0 %v5659_v36  ;;  %v7024_v36 = vld [vmem:[#allocation5 + $0x134] sm:$0xf0]  ;;  %v6487_v0 = vor.u32 %v7221_v51, %v6484_v32  ;;  %v6058_v32 = vld [vmem:[#allocation5 + $0x408] sm:$0xf] }
 0x1b1   :  { %3812 = vmatmul.bf16.vlgmr.msrb.gmra.mxu1 %v7574_v50  ;;  %v5691_v8 = vor.u32 %v7024_v36, %v5690_v58  ;;  %v7594_v58 = vld [vmem:[%s7690_s4] sm:$0xf]  ;;  %v6500_v36 = vld [vmem:[#allocation5 + $0x790] sm:$0xf0] }
 0x1b2   :  { %3856 = vmatpush.bf16.msra.mxu1 %v5787_v37 }
 0x1b3   :  { %3822 = vmatpush.bf16.msrb.mxu2 %v6343_v27  ;;  %v6155_v27 = vor.u32 %v7140_v18, %v6154_v15 }
 0x1b4   :  { %3844 = vmatpush.bf16.msra.mxu0 %v5643_v46  ;;  %v2032_v39 = vpop.f32.mrf.mxu0 }
 0x1b5   :  { %v7068_v39 = vld [vmem:[#allocation5 + $0x294] sm:$0xf0] }
 0x1b6   :  { %3857 = vmatpush.bf16.msra.mxu1 %v5771_v47  ;;  %v2056_v34 = vpop.f32.mrf.mxu2  ;;  %v2045_v40 = vpop.f32.mrf.mxu1  ;;  %v5563_v47 = vor.u32 %v6992_v35, %v5562_v33  ;;  %v6519_v33 = vor.u32 %v7229_v21, %v6516_v23  ;;  %v7225_v35 = vld [vmem:[#allocation5 + $0x784] sm:$0xf]  ;;  %v5818_v21 = vld [vmem:[#allocation5 + $0x228] sm:$0xf]  ;;  %v7056_v23 = vld [vmem:[#allocation5 + $0x234] sm:$0xf0] }
 0x1b7   :  { %v2057_v37 = vadd.f32 %v2056_v34, %v2044_v26  ;;  %3823 = vmatpush.bf16.msrb.mxu2 %v6327_v41  ;;  %v7072_v26 = vld [vmem:[#allocation5 + $0x2b4] sm:$0xf0]  ;;  %v6503_v45 = vor.u32 %v7225_v35, %v6500_v36  ;;  %v7209_v35 = vld [vmem:[#allocation5 + $0x704] sm:$0xf]  ;;  %v6436_v36 = vld [vmem:[#allocation5 + $0x710] sm:$0xf0] }
 0x1b8   :  { %3845 = vmatpush.bf16.msra.mxu0 %v5627_v61  ;;  %v2069_v56 = vpop.f32.mrf.mxu3  ;;  %v5883_v34 = vor.u32 %v7072_v26, %v5882_v24 }
 0x1b9   :  { %v2070_v46 = vadd.f32 %v2069_v56, %v2057_v37  ;;  %v7168_v56 = vld [vmem:[#allocation5 + $0x5b4] sm:$0xf0]  ;;  %v5866_v37 = vld [vmem:[#allocation5 + $0x288] sm:$0xf] }
 0x1ba   :  { %3858 = vmatpush.bf16.msra.mxu1 %v5755_v62  ;;  %v6311_v62 = vor.u32 %v7177_v42, %v6308_v43  ;;  %v2347_v42 = vperm.slane %v7594_v58, 0  ;;  %v6122_v43 = vld [vmem:[#allocation5 + $0x488] sm:$0xf] }
 0x1bb   :  { %v2080_v61 = vmax.f32 %v2070_v46, 0.0  ;;  %v5867_v46 = vor.u32 %v7068_v39, %v5866_v37 }
 0x1bc   :  { %3846 = vmatpush.bf16.msra.mxu0 %v5611_v7  ;;  %v5547_v7 = vor.u32 %v6988_v57, %v5546_v55  ;;  %3824 = vmatpush.bf16.msrb.mxu2 %v6311_v62  ;;  %v5850_v55 = vld [vmem:[#allocation5 + $0x268] sm:$0xf]  ;;  %v7064_v57 = vld [vmem:[#allocation5 + $0x274] sm:$0xf0] }
 0x1bd   :  { %v7587_v6 = vpack.c.bf16 %v2080_v61, %v2080_v61  ;;  %v6106_v61 = vld [vmem:[#allocation5 + $0x468] sm:$0xf]  ;;  %v7128_v62 = vld [vmem:[#allocation5 + $0x474] sm:$0xf0] }
 0x1be   :  { %3859 = vmatpush.bf16.msra.mxu1 %v5739_v9  ;;  %v5675_v9 = vor.u32 %v7020_v60, %v5674_v59  ;;  %v2058_v12 = vpop.f32.mrf.mxu2  ;;  %v6123_v59 = vor.u32 %v7132_v44, %v6122_v43 }
 0x1bf   :  { %3734 = vmatmul.bf16.vlgmr.msrb.gmra.mxu3 %v7587_v6  ;;  %3825 = vmatmul.bf16.vlgmr.msrb.gmra.mxu2 %v7580_v25 }
 0x1c0   :  { %3847 = vmatpush.bf16.msra.mxu0 %v5595_v5  ;;  %v2071_v22 = vpop.f32.mrf.mxu3  ;;  %3830 = vmatpush.bf16.msrb.mxu3 %v6551_v1  ;;  %v5899_v5 = vor.u32 %v7076_v19, %v5898_v11  ;;  %v5851_v1 = vor.u32 %v7064_v57, %v5850_v55  ;;  %v7060_v11 = vld [vmem:[#allocation5 + $0x254] sm:$0xf0]  ;;  %v6107_v19 = vor.u32 %v7128_v62, %v6106_v61 }
 0x1c1   :  { %3869 = vmatpush.bf16.msra.mxu2 %v5915_v2  ;;  %v6234_v2 = vld [vmem:[#allocation5 + $0x568] sm:$0xf]  ;;  %v5835_v18 = vor.u32 %v7060_v11, %v5834_v10  ;;  %v7116_v55 = vld [vmem:[#allocation5 + $0x414] sm:$0xf0]  ;;  %v6439_v57 = vor.u32 %v7209_v35, %v6436_v36 }
 0x1c2   :  { %3860 = vmatpush.bf16.msra.mxu1 %v5723_v16  ;;  %v6282_v16 = vld [vmem:[#allocation5 + $0x5c8] sm:$0xf]  ;;  %v6235_v22 = vor.u32 %v7160_v3, %v6234_v2  ;;  %v7148_v61 = vld [vmem:[#allocation5 + $0x514] sm:$0xf0]  ;;  %v7046_v2 = vld [vmem:[#allocation5 + $0x1ec] sm:$0xf]  ;;  %v6059_v3 = vor.u32 %v7116_v55, %v6058_v32 }
 0x1c3   :  { %v6283_v28 = vor.u32 %v7172_v52, %v6282_v16  ;;  %v7213_v16 = vld [vmem:[#allocation5 + $0x724] sm:$0xf]  ;;  %v6452_v52 = vld [vmem:[#allocation5 + $0x730] sm:$0xf0]  ;;  %v6410_v10 = vld [vmem:[#allocation5 + $0x6c8] sm:$0xf] }
 0x1c4   :  { %3848 = vmatpush.bf16.msra.mxu0 %v5579_v30  ;;  %v7136_v30 = vld [vmem:[#allocation5 + $0x4b4] sm:$0xf0]  ;;  %3831 = vmatpush.bf16.msrb.mxu3 %v6535_v20  ;;  %v6218_v20 = vld [vmem:[#allocation5 + $0x548] sm:$0xf] }
 0x1c5   :  { %3870 = vmatpush.bf16.msra.mxu2 %v5899_v5  ;;  %v6139_v40 = vor.u32 %v7136_v30, %v6138_v29  ;;  %v7156_v5 = vld [vmem:[#allocation5 + $0x554] sm:$0xf0]  ;;  %v6202_v29 = vld [vmem:[#allocation5 + $0x528] sm:$0xf] }
 0x1c6   :  { %3861 = vmatpush.bf16.msra.mxu1 %v5707_v31  ;;  %v6266_v31 = vld [vmem:[#allocation5 + $0x5a8] sm:$0xf]  ;;  %v6219_v26 = vor.u32 %v7156_v5, %v6218_v20  ;;  %v7204_v11 = vld [vmem:[#allocation5 + $0x6d4] sm:$0xf0]  ;;  %v5772_v5 = vld [vmem:[#allocation5 + $0x1d8] sm:$0xf0] }
 0x1c7   :  { %v6267_v41 = vor.u32 %v7168_v56, %v6266_v31  ;;  %v7152_v56 = vld [vmem:[#allocation5 + $0x534] sm:$0xf0]  ;;  %v6411_v20 = vor.u32 %v7204_v11, %v6410_v10  ;;  %v6378_v36 = vld [vmem:[#allocation5 + $0x688] sm:$0xf] }
 0x1c8   :  { %3849 = vmatpush.bf16.msra.mxu0 %v5563_v47  ;;  %3832 = vmatpush.bf16.msrb.mxu3 %v6519_v33  ;;  %v6250_v47 = vld [vmem:[#allocation5 + $0x588] sm:$0xf]  ;;  %v6455_v33 = vor.u32 %v7213_v16, %v6452_v52  ;;  %v6203_v51 = vor.u32 %v7152_v56, %v6202_v29  ;;  %v7104_v52 = vld [vmem:[#allocation5 + $0x3b4] sm:$0xf0]  ;;  %v7006_v29 = vld [vmem:[#allocation5 + $0xac] sm:$0xf] }
 0x1c9   :  { %3871 = vmatpush.bf16.msra.mxu2 %v5883_v34  ;;  %v5819_v34 = vor.u32 %v7056_v23, %v5818_v21  ;;  %v6010_v16 = vld [vmem:[#allocation5 + $0x3a8] sm:$0xf]  ;;  %v7100_v35 = vld [vmem:[#allocation5 + $0x394] sm:$0xf0] }
 0x1ca   :  { %3862 = vmatpush.bf16.msra.mxu1 %v5691_v8  ;;  %v7164_v8 = vld [vmem:[#allocation5 + $0x594] sm:$0xf0]  ;;  %v6394_v23 = vld [vmem:[#allocation5 + $0x6a8] sm:$0xf] }
 0x1cb   :  { %v6251_v60 = vor.u32 %v7164_v8, %v6250_v47  ;;  %v7208_v47 = vld [vmem:[#allocation5 + $0x6f4] sm:$0xf0]  ;;  %v5994_v56 = vld [vmem:[#allocation5 + $0x388] sm:$0xf] }
 0x1cc   :  { %3850 = vmatpush.bf16.msra.mxu0 %v5547_v7  ;;  %3833 = vmatpush.bf16.msrb.mxu3 %v6503_v45  ;;  %v3644_v63 = vpop.f32.mrf.mxu0  ;;  %v7112_v45 = vld [vmem:[#allocation5 + $0x3f4] sm:$0xf0]  ;;  %v6362_v32 = vld [vmem:[#allocation5 + $0x668] sm:$0xf] }
 0x1cd   :  { %3872 = vmatpush.bf16.msra.mxu2 %v5867_v46  ;;  %v3645_v38 = vadd.f32 %v3644_v63, %v2347_v42  ;;  %v6042_v42 = vld [vmem:[#allocation5 + $0x3e8] sm:$0xf]  ;;  %v7192_v55 = vld [vmem:[#allocation5 + $0x674] sm:$0xf0] }
 0x1ce   :  { %3863 = vmatpush.bf16.msra.mxu1 %v5675_v9  ;;  %v3657_v7 = vpop.f32.mrf.mxu1  ;;  %v6468_v9 = vld [vmem:[#allocation5 + $0x750] sm:$0xf0]  ;;  %v6426_v46 = vld [vmem:[#allocation5 + $0x6e8] sm:$0xf]  ;;  %v6043_v62 = vor.u32 %v7112_v45, %v6042_v42  ;;  %v7002_v42 = vld [vmem:[#allocation5 + $0x8c] sm:$0xf] }
 0x1cf   :  { %3851 = vmatmul.bf16.vlgmr.msra.gmra.mxu0 %v7552_v48  ;;  %v3658_v12 = vadd.f32 %v3657_v7, %v3645_v38  ;;  %3786 = vmatmul.bf16.vlgmr.msra.gmra.mxu3 %v7558_v54  ;;  %v6471_v15 = vor.u32 %v7217_v4, %v6468_v9  ;;  %v6427_v63 = vor.u32 %v7208_v47, %v6426_v46  ;;  %v5788_v4 = vld [vmem:[#allocation5 + $0x1f8] sm:$0xf0]  ;;  %v6026_v38 = vld [vmem:[#allocation5 + $0x3c8] sm:$0xf]  ;;  %v7108_v7 = vld [vmem:[#allocation5 + $0x3d4] sm:$0xf0] }
 0x1d0   :  { %3895 = vmatpush.bf16.msrb.mxu0 %v6171_v13  ;;  %v6090_v13 = vld [vmem:[#allocation5 + $0x448] sm:$0xf]  ;;  %3834 = vmatpush.bf16.msrb.mxu3 %v6487_v0  ;;  %v7014_v0 = vld [vmem:[#allocation5 + $0xec] sm:$0xf]  ;;  %v5740_v46 = vld [vmem:[#allocation5 + $0x198] sm:$0xf0] }
 0x1d1   :  { %3864 = vmatmul.bf16.vlgmr.msra.gmra.mxu1 %v7554_v49  ;;  %3873 = vmatpush.bf16.msra.mxu2 %v5851_v1  ;;  %v5660_v1 = vld [vmem:[#allocation5 + $0xf8] sm:$0xf0]  ;;  %v5978_v47 = vld [vmem:[#allocation5 + $0x368] sm:$0xf] }
 0x1d2   :  { %3908 = vmatpush.bf16.msrb.mxu1 %v6299_v14  ;;  %v7124_v14 = vld [vmem:[#allocation5 + $0x454] sm:$0xf0] }
 0x1d3   :  { %v6091_v24 = vor.u32 %v7124_v14, %v6090_v13  ;;  %v6027_v13 = vor.u32 %v7108_v7, %v6026_v38  ;;  %v7010_v14 = vld [vmem:[#allocation5 + $0xcc] sm:$0xf]  ;;  %v6346_v7 = vld [vmem:[#allocation5 + $0x648] sm:$0xf] }
 0x1d4   :  { %3896 = vmatpush.bf16.msrb.mxu0 %v6155_v27  ;;  %v6074_v27 = vld [vmem:[#allocation5 + $0x428] sm:$0xf]  ;;  %3835 = vmatpush.bf16.msrb.mxu3 %v6471_v15  ;;  %v3646_v31 = vpop.f32.mrf.mxu0  ;;  %v5644_v15 = vld [vmem:[#allocation5 + $0xd8] sm:$0xf0] }
 0x1d5   :  { %3874 = vmatpush.bf16.msra.mxu2 %v5835_v18  ;;  %v7042_v18 = vld [vmem:[#allocation5 + $0x1cc] sm:$0xf] }
 0x1d6   :  { %3909 = vmatpush.bf16.msrb.mxu1 %v6283_v28  ;;  %v7120_v28 = vld [vmem:[#allocation5 + $0x434] sm:$0xf0]  ;;  %v3670_v30 = vpop.f32.mrf.mxu2  ;;  %v3659_v39 = vpop.f32.mrf.mxu1  ;;  %v7038_v31 = vld [vmem:[#allocation5 + $0x1ac] sm:$0xf] }
 0x1d7   :  { %v3671_v37 = vadd.f32 %v3670_v30, %v3658_v12  ;;  %v6075_v44 = vor.u32 %v7120_v28, %v6074_v27  ;;  %v5663_v12 = vor.u32 %v7014_v0, %v5660_v1  ;;  %v5775_v27 = vor.u32 %v7042_v18, %v5772_v5  ;;  %v5628_v30 = vld [vmem:[#allocation5 + $0xb8] sm:$0xf0]  ;;  %v5946_v18 = vld [vmem:[#allocation5 + $0x328] sm:$0xf] }
 0x1d8   :  { %3897 = vmatpush.bf16.msrb.mxu0 %v6139_v40  ;;  %v5802_v40 = vld [vmem:[#allocation5 + $0x208] sm:$0xf]  ;;  %v3683_v43 = vpop.f32.mrf.mxu3  ;;  %3836 = vmatpush.bf16.msrb.mxu3 %v6455_v33  ;;  %v6011_v28 = vor.u32 %v7104_v52, %v6010_v16  ;;  %v5631_v39 = vor.u32 %v7006_v29, %v5628_v30  ;;  %v6363_v1 = vor.u32 %v7192_v55, %v6362_v32  ;;  %v7184_v16 = vld [vmem:[#allocation5 + $0x634] sm:$0xf0]  ;;  %v6990_v52 = vld [vmem:[#allocation5 + $0x2c] sm:$0xf] }
 0x1d9   :  { %v7600_v8 = vadd.f32 %v3683_v43, %v3671_v37  ;;  %3875 = vmatpush.bf16.msra.mxu2 %v5819_v34  ;;  %v5756_v34 = vld [vmem:[#allocation5 + $0x1b8] sm:$0xf0]  ;;  %v7196_v37 = vld [vmem:[#allocation5 + $0x694] sm:$0xf0]  ;;  %v6330_v5 = vld [vmem:[#allocation5 + $0x628] sm:$0xf] }
 0x1da   :  { %3910 = vmatpush.bf16.msrb.mxu1 %v6267_v41  ;;  %v7052_v41 = vld [vmem:[#allocation5 + $0x214] sm:$0xf0]  ;;  %v5612_v43 = vld [vmem:[#allocation5 + $0x98] sm:$0xf0]  ;;  %v6379_v45 = vor.u32 %v7196_v37, %v6378_v36  ;;  %v5930_v29 = vld [vmem:[#allocation5 + $0x308] sm:$0xf] }
 0x1db   :  { %v7084_v30 = vld [vmem:[#allocation5 + $0x314] sm:$0xf0]  ;;  %v7078_v37 = vld [vmem:[#allocation5 + $0x2ec] sm:$0xf]  ;;  %v6172_v32 = vld [vmem:[#allocation5 + $0x4f8] sm:$0xf0] }
 0x1dc   :  { %3898 = vmatpush.bf16.msrb.mxu0 %v6123_v59  ;;  %v5803_v59 = vor.u32 %v7052_v41, %v5802_v40  ;;  %3837 = vmatpush.bf16.msrb.mxu3 %v6439_v57  ;;  %v5759_v40 = vor.u32 %v7038_v31, %v5756_v34  ;;  %v5995_v41 = vor.u32 %v7100_v35, %v5994_v56  ;;  %v6314_v31 = vld [vmem:[#allocation5 + $0x608] sm:$0xf]  ;;  %v7180_v34 = vld [vmem:[#allocation5 + $0x614] sm:$0xf0] }
 0x1dd   :  { %v5615_v57 = vor.u32 %v7002_v42, %v5612_v43  ;;  %v6554_v56 = vld [vmem:[#allocation5 + $0x7e8] sm:$0xf]  ;;  %v7240_v35 = vld [vmem:[#allocation5 + $0x7f4] sm:$0xf0]  ;;  %v6986_v42 = vld [vmem:[#allocation5 + $0xc] sm:$0xf] }
 0x1de   :  { %3911 = vmatpush.bf16.msrb.mxu1 %v6251_v60  ;;  %v6186_v60 = vld [vmem:[#allocation5 + $0x508] sm:$0xf]  ;;  %3876 = vmatpush.bf16.msra.mxu2 %v5803_v59  ;;  %v5548_v43 = vld [vmem:[#allocation5 + $0x18] sm:$0xf0] }
 0x1df   :  { %v6187_v9 = vor.u32 %v7148_v61, %v6186_v60  ;;  %3838 = vmatmul.bf16.vlgmr.msrb.gmra.mxu3 %v7587_v6  ;;  %v6998_v61 = vld [vmem:[#allocation5 + $0x6c] sm:$0xf] }
 0x1e0   :  { %3899 = vmatpush.bf16.msrb.mxu0 %v6107_v19  ;;  %v3672_v19 = vpop.f32.mrf.mxu2  ;;  %3882 = vmatpush.bf16.msra.mxu3 %v6043_v62  ;;  %v3685_v21 = vpop.f32.mrf.mxu3  ;;  %v5596_v62 = vld [vmem:[#allocation5 + $0x78] sm:$0xf0] }
 0x1e1   :  { %3877 = vmatmul.bf16.vlgmr.msra.gmra.mxu2 %v7556_v53  ;;  %v5599_v10 = vor.u32 %v6998_v61, %v5596_v62  ;;  %v5551_v61 = vor.u32 %v6986_v42, %v5548_v43  ;;  %v7236_v62 = vld [vmem:[#allocation5 + $0x7d4] sm:$0xf0]  ;;  %v7126_v42 = vld [vmem:[#allocation5 + $0x46c] sm:$0xf]  ;;  %v6108_v43 = vld [vmem:[#allocation5 + $0x478] sm:$0xf0] }
 0x1e2   :  { %3912 = vmatpush.bf16.msrb.mxu1 %v6235_v22  ;;  %3921 = vmatpush.bf16.msrb.mxu2 %v6427_v63  ;;  %v5791_v22 = vor.u32 %v7046_v2, %v5788_v4  ;;  %v7030_v63 = vld [vmem:[#allocation5 + $0x16c] sm:$0xf]  ;;  %v5724_v2 = vld [vmem:[#allocation5 + $0x178] sm:$0xf0]  ;;  %v7092_v4 = vld [vmem:[#allocation5 + $0x354] sm:$0xf0] }
 0x1e3   :  { %v5727_v11 = vor.u32 %v7030_v63, %v5724_v2  ;;  %v7074_v63 = vld [vmem:[#allocation5 + $0x2cc] sm:$0xf] }
 0x1e4   :  { %3900 = vmatpush.bf16.msrb.mxu0 %v6091_v24  ;;  %v7200_v24 = vld [vmem:[#allocation5 + $0x6b4] sm:$0xf0]  ;;  %3883 = vmatpush.bf16.msra.mxu3 %v6027_v13  ;;  %v7026_v13 = vld [vmem:[#allocation5 + $0x14c] sm:$0xf] }
 0x1e5   :  { %v6395_v33 = vor.u32 %v7200_v24, %v6394_v23  ;;  %v5564_v24 = vld [vmem:[#allocation5 + $0x38] sm:$0xf0] }
 0x1e6   :  { %3913 = vmatpush.bf16.msrb.mxu1 %v6219_v26  ;;  %v5647_v26 = vor.u32 %v7010_v14, %v5644_v15  ;;  %3922 = vmatpush.bf16.msrb.mxu2 %v6411_v20  ;;  %v5708_v15 = vld [vmem:[#allocation5 + $0x158] sm:$0xf0]  ;;  %v7088_v20 = vld [vmem:[#allocation5 + $0x334] sm:$0xf0]  ;;  %v5567_v36 = vor.u32 %v6990_v52, %v5564_v24  ;;  %v6506_v24 = vld [vmem:[#allocation5 + $0x788] sm:$0xf] }
 0x1e7   :  { %v5711_v21 = vor.u32 %v7026_v13, %v5708_v15  ;;  %v5947_v23 = vor.u32 %v7088_v20, %v5946_v18  ;;  %v7070_v13 = vld [vmem:[#allocation5 + $0x2ac] sm:$0xf] }
 0x1e8   :  { %3901 = vmatpush.bf16.msrb.mxu0 %v6075_v44  ;;  %3884 = vmatpush.bf16.msra.mxu3 %v6011_v28  ;;  %v7034_v44 = vld [vmem:[#allocation5 + $0x18c] sm:$0xf]  ;;  %v6331_v28 = vor.u32 %v7184_v16, %v6330_v5  ;;  %v6140_v5 = vld [vmem:[#allocation5 + $0x4b8] sm:$0xf0] }
 0x1e9   :  { %v5743_v59 = vor.u32 %v7034_v44, %v5740_v46  ;;  %v7018_v44 = vld [vmem:[#allocation5 + $0x10c] sm:$0xf]  ;;  %v6555_v46 = vor.u32 %v7240_v35, %v6554_v56 }
 0x1ea   :  { %3914 = vmatpush.bf16.msrb.mxu1 %v6203_v51  ;;  %3923 = vmatpush.bf16.msrb.mxu2 %v6395_v33  ;;  %v7096_v51 = vld [vmem:[#allocation5 + $0x374] sm:$0xf0]  ;;  %v7134_v20 = vld [vmem:[#allocation5 + $0x4ac] sm:$0xf] }
 0x1eb   :  { %v5979_v60 = vor.u32 %v7096_v51, %v5978_v47  ;;  %v5676_v47 = vld [vmem:[#allocation5 + $0x118] sm:$0xf0]  ;;  %v7142_v51 = vld [vmem:[#allocation5 + $0x4ec] sm:$0xf] }
 0x1ec   :  { %3902 = vmatpush.bf16.msrb.mxu0 %v6059_v3  ;;  %3885 = vmatpush.bf16.msra.mxu3 %v5995_v41  ;;  %v3696_v0 = vpop.f32.mrf.mxu0  ;;  %v5962_v3 = vld [vmem:[#allocation5 + $0x348] sm:$0xf]  ;;  %v5931_v41 = vor.u32 %v7084_v30, %v5930_v29  ;;  %v6175_v2 = vor.u32 %v7142_v51, %v6172_v32  ;;  %v5868_v29 = vld [vmem:[#allocation5 + $0x298] sm:$0xf0]  ;;  %v6143_v30 = vor.u32 %v7134_v20, %v6140_v5  ;;  %v7158_v51 = vld [vmem:[#allocation5 + $0x56c] sm:$0xf] }
 0x1ed   :  { %v7607_v38 = vadd.f32 %v3696_v0, %v7600_v8  ;;  %v5963_v19 = vor.u32 %v7092_v4, %v5962_v3  ;;  %v5900_v0 = vld [vmem:[#allocation5 + $0x2d8] sm:$0xf0]  ;;  %v7138_v4 = vld [vmem:[#allocation5 + $0x4cc] sm:$0xf] }
 0x1ee   :  { %3915 = vmatpush.bf16.msrb.mxu1 %v6187_v9  ;;  %3924 = vmatpush.bf16.msrb.mxu2 %v6379_v45  ;;  %v7188_v9 = vld [vmem:[#allocation5 + $0x654] sm:$0xf0]  ;;  %v6315_v45 = vor.u32 %v7180_v34, %v6314_v31  ;;  %v6124_v34 = vld [vmem:[#allocation5 + $0x498] sm:$0xf0] }
 0x1ef   :  { %3903 = vmatmul.bf16.vlgmr.msrb.gmra.mxu0 %v7570_v17  ;;  %v6347_v14 = vor.u32 %v7188_v9, %v6346_v7  ;;  %v6156_v7 = vld [vmem:[#allocation5 + $0x4d8] sm:$0xf0] }
 0x1f0   :  { %3947 = vmatpush.bf16.msra.mxu0 %v5663_v12  ;;  %3886 = vmatpush.bf16.msra.mxu3 %v5979_v60  ;;  %v6994_v12 = vld [vmem:[#allocation5 + $0x4c] sm:$0xf]  ;;  %v6538_v60 = vld [vmem:[#allocation5 + $0x7c8] sm:$0xf]  ;;  %v6159_v15 = vor.u32 %v7138_v4, %v6156_v7  ;;  %v6236_v32 = vld [vmem:[#allocation5 + $0x578] sm:$0xf0] }
 0x1f1   :  { %3916 = vmatmul.bf16.vlgmr.msrb.gmra.mxu1 %v7574_v50  ;;  %v6539_v9 = vor.u32 %v7236_v62, %v6538_v60  ;;  %v5836_v60 = vld [vmem:[#allocation5 + $0x258] sm:$0xf0]  ;;  %v6111_v62 = vor.u32 %v7126_v42, %v6108_v43  ;;  %v7154_v4 = vld [vmem:[#allocation5 + $0x54c] sm:$0xf] }
 0x1f2   :  { %3960 = vmatpush.bf16.msra.mxu1 %v5791_v22  ;;  %v5580_v22 = vld [vmem:[#allocation5 + $0x58] sm:$0xf0]  ;;  %3925 = vmatpush.bf16.msrb.mxu2 %v6363_v1  ;;  %v5679_v1 = vor.u32 %v7018_v44, %v5676_v47  ;;  %v7202_v43 = vld [vmem:[#allocation5 + $0x6cc] sm:$0xf] }
 0x1f3   :  { %v5583_v8 = vor.u32 %v6994_v12, %v5580_v22  ;;  %v6522_v12 = vld [vmem:[#allocation5 + $0x7a8] sm:$0xf]  ;;  %v7232_v22 = vld [vmem:[#allocation5 + $0x7b4] sm:$0xf0]  ;;  %v6220_v7 = vld [vmem:[#allocation5 + $0x558] sm:$0xf0] }
 0x1f4   :  { %3948 = vmatpush.bf16.msra.mxu0 %v5647_v26  ;;  %3887 = vmatpush.bf16.msra.mxu3 %v5963_v19  ;;  %v7022_v26 = vld [vmem:[#allocation5 + $0x12c] sm:$0xf]  ;;  %v3698_v33 = vpop.f32.mrf.mxu0  ;;  %v6284_v19 = vld [vmem:[#allocation5 + $0x5d8] sm:$0xf0]  ;;  %v6523_v16 = vor.u32 %v7232_v22, %v6522_v12 }
 0x1f5   :  { %v7130_v33 = vld [vmem:[#allocation5 + $0x48c] sm:$0xf]  ;;  %v6028_v42 = vld [vmem:[#allocation5 + $0x3d8] sm:$0xf0] }
 0x1f6   :  { %3961 = vmatpush.bf16.msra.mxu1 %v5775_v27  ;;  %v5692_v27 = vld [vmem:[#allocation5 + $0x138] sm:$0xf0]  ;;  %3926 = vmatpush.bf16.msrb.mxu2 %v6347_v14 }
 0x1f7   :  { %v5884_v14 = vld [vmem:[#allocation5 + $0x2b8] sm:$0xf0] }
 0x1f8   :  { %3949 = vmatpush.bf16.msra.mxu0 %v5631_v39  ;;  %v5916_v39 = vld [vmem:[#allocation5 + $0x2f8] sm:$0xf0]  ;;  %3888 = vmatpush.bf16.msra.mxu3 %v5947_v23 }
 0x1f9   :  { %v5919_v55 = vor.u32 %v7078_v37, %v5916_v39  ;;  %v6268_v23 = vld [vmem:[#allocation5 + $0x5b8] sm:$0xf0]  ;;  %v6490_v37 = vld [vmem:[#allocation5 + $0x768] sm:$0xf]  ;;  %v7062_v39 = vld [vmem:[#allocation5 + $0x26c] sm:$0xf] }
 0x1fa   :  { %3962 = vmatpush.bf16.msra.mxu1 %v5759_v40  ;;  %v5695_v40 = vor.u32 %v7022_v26, %v5692_v27  ;;  %3927 = vmatpush.bf16.msrb.mxu2 %v6331_v28  ;;  %v7228_v27 = vld [vmem:[#allocation5 + $0x794] sm:$0xf0]  ;;  %v7066_v28 = vld [vmem:[#allocation5 + $0x28c] sm:$0xf] }
 0x1fb   :  { %v6507_v56 = vor.u32 %v7228_v27, %v6506_v24  ;;  %v5871_v35 = vor.u32 %v7066_v28, %v5868_v29  ;;  %v7050_v27 = vld [vmem:[#allocation5 + $0x20c] sm:$0xf]  ;;  %v5804_v28 = vld [vmem:[#allocation5 + $0x218] sm:$0xf0] }
 0x1fc   :  { %3950 = vmatpush.bf16.msra.mxu0 %v5615_v57  ;;  %v7174_v57 = vld [vmem:[#allocation5 + $0x5ec] sm:$0xf]  ;;  %3889 = vmatpush.bf16.msra.mxu3 %v5931_v41  ;;  %v3709_v52 = vpop.f32.mrf.mxu1 }
 0x1fd   :  { %v7614_v26 = vadd.f32 %v3709_v52, %v7607_v38  ;;  %v5852_v38 = vld [vmem:[#allocation5 + $0x278] sm:$0xf0]  ;;  %v7110_v29 = vld [vmem:[#allocation5 + $0x3ec] sm:$0xf] }
 0x1fe   :  { %3963 = vmatpush.bf16.msra.mxu1 %v5743_v59  ;;  %v6300_v59 = vld [vmem:[#allocation5 + $0x5f8] sm:$0xf0]  ;;  %3928 = vmatpush.bf16.msrb.mxu2 %v6315_v45 }
 0x1ff   :  { %v6303_v3 = vor.u32 %v7174_v57, %v6300_v59  ;;  %3890 = vmatmul.bf16.vlgmr.msra.gmra.mxu3 %v7558_v54  ;;  %v7220_v57 = vld [vmem:[#allocation5 + $0x754] sm:$0xf0]  ;;  %v7058_v59 = vld [vmem:[#allocation5 + $0x24c] sm:$0xf]  ;;  %v6204_v52 = vld [vmem:[#allocation5 + $0x538] sm:$0xf0] }
 0x200   :  { %3951 = vmatpush.bf16.msra.mxu0 %v5599_v10  ;;  %3934 = vmatpush.bf16.msrb.mxu3 %v6555_v46  ;;  %v5903_v10 = vor.u32 %v7074_v63, %v5900_v0  ;;  %v5855_v46 = vor.u32 %v7062_v39, %v5852_v38  ;;  %v6239_v63 = vor.u32 %v7158_v51, %v6236_v32  ;;  %v7122_v0 = vld [vmem:[#allocation5 + $0x44c] sm:$0xf] }
 0x201   :  { %3929 = vmatmul.bf16.vlgmr.msrb.gmra.mxu2 %v7580_v25  ;;  %v7146_v38 = vld [vmem:[#allocation5 + $0x50c] sm:$0xf] }
 0x202   :  { %3964 = vmatpush.bf16.msra.mxu1 %v5727_v11  ;;  %3973 = vmatpush.bf16.msra.mxu2 %v5919_v55  ;;  %v7170_v11 = vld [vmem:[#allocation5 + $0x5cc] sm:$0xf]  ;;  %v6474_v55 = vld [vmem:[#allocation5 + $0x748] sm:$0xf] }
 0x203   :  { %v6287_v18 = vor.u32 %v7170_v11, %v6284_v19  ;;  %v7054_v11 = vld [vmem:[#allocation5 + $0x22c] sm:$0xf]  ;;  %v5820_v19 = vld [vmem:[#allocation5 + $0x238] sm:$0xf0] }
 0x204   :  { %3952 = vmatpush.bf16.msra.mxu0 %v5583_v8  ;;  %3935 = vmatpush.bf16.msrb.mxu3 %v6539_v9  ;;  %v5887_v8 = vor.u32 %v7070_v13, %v5884_v14  ;;  %v3711_v47 = vpop.f32.mrf.mxu1  ;;  %v6458_v9 = vld [vmem:[#allocation5 + $0x728] sm:$0xf]  ;;  %v6223_v13 = vor.u32 %v7154_v4, %v6220_v7  ;;  %v7118_v14 = vld [vmem:[#allocation5 + $0x42c] sm:$0xf]  ;;  %v7247_v4 = vld [vmem:[#allocation7 + $0x30] sm:$0xff] }
 0x206   :  { %3965 = vmatpush.bf16.msra.mxu1 %v5711_v21  ;;  %3974 = vmatpush.bf16.msra.mxu2 %v5903_v10  ;;  %v7166_v21 = vld [vmem:[#allocation5 + $0x5ac] sm:$0xf]  ;;  %v7216_v10 = vld [vmem:[#allocation5 + $0x734] sm:$0xf0] }
 0x207   :  { %v6271_v31 = vor.u32 %v7166_v21, %v6268_v23  ;;  %v6459_v5 = vor.u32 %v7216_v10, %v6458_v9  ;;  %v6442_v21 = vld [vmem:[#allocation5 + $0x708] sm:$0xf]  ;;  %v7212_v23 = vld [vmem:[#allocation5 + $0x714] sm:$0xf0]  ;;  %v7094_v9 = vld [vmem:[#allocation5 + $0x36c] sm:$0xf] }
 0x208   :  { %3953 = vmatpush.bf16.msra.mxu0 %v5567_v36  ;;  %3936 = vmatpush.bf16.msrb.mxu3 %v6523_v16  ;;  %v7162_v36 = vld [vmem:[#allocation5 + $0x58c] sm:$0xf]  ;;  %v5823_v16 = vor.u32 %v7054_v11, %v5820_v19  ;;  %v5980_v10 = vld [vmem:[#allocation5 + $0x378] sm:$0xf0] }
 0x209   :  { %v7190_v11 = vld [vmem:[#allocation5 + $0x66c] sm:$0xf]  ;;  %v6364_v19 = vld [vmem:[#allocation5 + $0x678] sm:$0xf0] }
 0x20a   :  { %3966 = vmatpush.bf16.msra.mxu1 %v5695_v40  ;;  %3975 = vmatpush.bf16.msra.mxu2 %v5887_v8  ;;  %v6127_v40 = vor.u32 %v7130_v33, %v6124_v34  ;;  %v6428_v33 = vld [vmem:[#allocation5 + $0x6f8] sm:$0xf0] }
 0x20c   :  { %3954 = vmatpush.bf16.msra.mxu0 %v5551_v61  ;;  %3937 = vmatpush.bf16.msrb.mxu3 %v6507_v56  ;;  %v3748_v44 = vpop.f32.mrf.mxu0  ;;  %v2348_v61 = vperm.slane %v7594_v58, 1 }
 0x20e   :  { %3967 = vmatpush.bf16.msra.mxu1 %v5679_v1  ;;  %3976 = vmatpush.bf16.msra.mxu2 %v5871_v35  ;;  %v6092_v1 = vld [vmem:[#allocation5 + $0x458] sm:$0xf0]  ;;  %v3749_v12 = vadd.f32 %v3748_v44, %v2348_v61  ;;  %v3761_v8 = vpop.f32.mrf.mxu1  ;;  %v6443_v35 = vor.u32 %v7212_v23, %v6442_v21  ;;  %v7086_v21 = vld [vmem:[#allocation5 + $0x32c] sm:$0xf] }
 0x20f   :  { %3955 = vmatmul.bf16.vlgmr.msra.gmra.mxu0 %v7552_v48  ;;  %v6252_v48 = vld [vmem:[#allocation5 + $0x598] sm:$0xf0]  ;;  %v6095_v22 = vor.u32 %v7122_v0, %v6092_v1  ;;  %v7098_v0 = vld [vmem:[#allocation5 + $0x38c] sm:$0xf] }
 0x210   :  { %3999 = vmatpush.bf16.msrb.mxu0 %v6175_v2  ;;  %v6255_v41 = vor.u32 %v7162_v36, %v6252_v48  ;;  %v6475_v2 = vor.u32 %v7220_v57, %v6474_v55  ;;  %v7617_v24 = vadd.f32 %v3761_v8, %v3749_v12  ;;  %v5807_v36 = vor.u32 %v7050_v27, %v5804_v28  ;;  %v7114_v48 = vld [vmem:[#allocation5 + $0x40c] sm:$0xf]  ;;  %v6412_v44 = vld [vmem:[#allocation5 + $0x6d8] sm:$0xf0] }
 0x211   :  { %3968 = vmatmul.bf16.vlgmr.msra.gmra.mxu1 %v7554_v49  ;;  %v7224_v49 = vld [vmem:[#allocation5 + $0x774] sm:$0xf0]  ;;  %v6415_v32 = vor.u32 %v7202_v43, %v6412_v44  ;;  %v7102_v55 = vld [vmem:[#allocation5 + $0x3ac] sm:$0xf]  ;;  %v6012_v57 = vld [vmem:[#allocation5 + $0x3b8] sm:$0xf0] }
 0x212   :  { %4012 = vmatpush.bf16.msrb.mxu1 %v6303_v3  ;;  %v6491_v45 = vor.u32 %v7224_v49, %v6490_v37  ;;  %3977 = vmatpush.bf16.msra.mxu2 %v5855_v46  ;;  %v5839_v3 = vor.u32 %v7058_v59, %v5836_v60  ;;  %v6060_v37 = vld [vmem:[#allocation5 + $0x418] sm:$0xf0]  ;;  %v7198_v59 = vld [vmem:[#allocation5 + $0x6ac] sm:$0xf] }
 0x213   :  { %v6396_v60 = vld [vmem:[#allocation5 + $0x6b8] sm:$0xf0]  ;;  %v7246_v12 = vld [vmem:[#allocation7 + $0x28] sm:$0xff] }
 0x214   :  { %4000 = vmatpush.bf16.msrb.mxu0 %v6159_v15  ;;  %3938 = vmatpush.bf16.msrb.mxu3 %v6491_v45  ;;  %v6076_v15 = vld [vmem:[#allocation5 + $0x438] sm:$0xf0]  ;;  %v3750_v20 = vpop.f32.mrf.mxu0  ;;  %v6063_v45 = vor.u32 %v7114_v48, %v6060_v37  ;;  %v7182_v27 = vld [vmem:[#allocation5 + $0x62c] sm:$0xf] }
 0x215   :  { %v6079_v34 = vor.u32 %v7118_v14, %v6076_v15  ;;  %v7248_v61 = vld [vmem:[#allocation7 + $0x38] sm:$0xff]  ;;  %v5983_v14 = vor.u32 %v7094_v9, %v5980_v10  ;;  %v7090_v15 = vld [vmem:[#allocation5 + $0x34c] sm:$0xf]  ;;  %v7251_v9 = vld [vmem:[#allocation7 + $0x50] sm:$0xff] }
 0x216   :  { %4013 = vmatpush.bf16.msrb.mxu1 %v6287_v18  ;;  %v7150_v18 = vld [vmem:[#allocation5 + $0x52c] sm:$0xf]  ;;  %3978 = vmatpush.bf16.msra.mxu2 %v5839_v3  ;;  %v3763_v47 = vpop.f32.mrf.mxu1  ;;  %v5996_v1 = vld [vmem:[#allocation5 + $0x398] sm:$0xf0] }
 0x217   :  { %v6207_v56 = vor.u32 %v7150_v18, %v6204_v52  ;;  %v6380_v3 = vld [vmem:[#allocation5 + $0x698] sm:$0xf0]  ;;  %v5999_v7 = vor.u32 %v7098_v0, %v5996_v1  ;;  %v7186_v20 = vld [vmem:[#allocation5 + $0x64c] sm:$0xf] }
 0x218   :  { %4001 = vmatpush.bf16.msrb.mxu0 %v6143_v30  ;;  %3939 = vmatpush.bf16.msrb.mxu3 %v6475_v2  ;;  %v6044_v30 = vld [vmem:[#allocation5 + $0x3f8] sm:$0xf0]  ;;  %v7194_v2 = vld [vmem:[#allocation5 + $0x68c] sm:$0xf] }
 0x219   :  { %v6047_v49 = vor.u32 %v7110_v29, %v6044_v30  ;;  %v5948_v23 = vld [vmem:[#allocation5 + $0x338] sm:$0xf0]  ;;  %v7178_v48 = vld [vmem:[#allocation5 + $0x60c] sm:$0xf] }
 0x21a   :  { %4014 = vmatpush.bf16.msrb.mxu1 %v6271_v31  ;;  %v7206_v31 = vld [vmem:[#allocation5 + $0x6ec] sm:$0xf]  ;;  %3979 = vmatpush.bf16.msra.mxu2 %v5823_v16  ;;  %v7245_v16 = vld [vmem:[#allocation7 + $0x20] sm:$0xff]  ;;  %v6332_v28 = vld [vmem:[#allocation5 + $0x638] sm:$0xf0] }
 0x21b   :  { %v6431_v39 = vor.u32 %v7206_v31, %v6428_v33  ;;  %v7244_v29 = vld [vmem:[#allocation7 + $0x18] sm:$0xff] }
 0x21c   :  { %4002 = vmatpush.bf16.msrb.mxu0 %v6127_v40  ;;  %3940 = vmatpush.bf16.msrb.mxu3 %v6459_v5  ;;  %v6188_v40 = vld [vmem:[#allocation5 + $0x518] sm:$0xf0] }
 0x21d   :  { %v6191_v46 = vor.u32 %v7146_v38, %v6188_v40  ;;  %v6348_v5 = vld [vmem:[#allocation5 + $0x658] sm:$0xf0]  ;;  %v7255_v38 = vld [vmem:[#allocation7 + $0x70] sm:$0xff]  ;;  %v7238_v40 = vld [vmem:[#allocation5 + $0x7ec] sm:$0xf] }
 0x21e   :  { %4015 = vmatpush.bf16.msrb.mxu1 %v6255_v41  ;;  %v7106_v41 = vld [vmem:[#allocation5 + $0x3cc] sm:$0xf]  ;;  %3980 = vmatpush.bf16.msra.mxu2 %v5807_v36  ;;  %v6351_v52 = vor.u32 %v7186_v20, %v6348_v5  ;;  %v7256_v30 = vld [vmem:[#allocation7 + $0x78] sm:$0xff] }
 0x21f   :  { %v6031_v51 = vor.u32 %v7106_v41, %v6028_v42  ;;  %v5932_v36 = vld [vmem:[#allocation5 + $0x318] sm:$0xf0] }
 0x220   :  { %4003 = vmatpush.bf16.msrb.mxu0 %v6111_v62  ;;  %3941 = vmatpush.bf16.msrb.mxu3 %v6443_v35  ;;  %v6015_v62 = vor.u32 %v7102_v55, %v6012_v57  ;;  %v7082_v35 = vld [vmem:[#allocation5 + $0x30c] sm:$0xf]  ;;  %v6556_v41 = vld [vmem:[#allocation5 + $0x7f8] sm:$0xf0]  ;;  %v7241_v57 = vld [vmem:[#allocation7] sm:$0xff] }
 0x221   :  { %3981 = vmatmul.bf16.vlgmr.msra.gmra.mxu2 %v7556_v53  ;;  %v6383_v53 = vor.u32 %v7194_v2, %v6380_v3  ;;  %v7627_v18 = vpop.f32.mrf.mxu2  ;;  %v5935_v42 = vor.u32 %v7082_v35, %v5932_v36  ;;  %v6559_v44 = vor.u32 %v7238_v40, %v6556_v41  ;;  %v6540_v47 = vld [vmem:[#allocation5 + $0x7d8] sm:$0xf0] }
 0x222   :  { %4016 = vmatpush.bf16.msrb.mxu1 %v6239_v63  ;;  %4025 = vmatpush.bf16.msrb.mxu2 %v6431_v39  ;;  %v6399_v63 = vor.u32 %v7198_v59, %v6396_v60  ;;  %v7243_v39 = vld [vmem:[#allocation7 + $0x10] sm:$0xff]  ;;  %v7230_v59 = vld [vmem:[#allocation5 + $0x7ac] sm:$0xf]  ;;  %v6524_v60 = vld [vmem:[#allocation5 + $0x7b8] sm:$0xf0] }
 0x223   :  { %3942 = vmatmul.bf16.vlgmr.msrb.gmra.mxu3 %v7587_v6  ;;  %v6508_v0 = vld [vmem:[#allocation5 + $0x798] sm:$0xf0] }
 0x224   :  { %4004 = vmatpush.bf16.msrb.mxu0 %v6095_v22  ;;  %3986 = vmatpush.bf16.msra.mxu3 %v6047_v49  ;;  %v6316_v49 = vld [vmem:[#allocation5 + $0x618] sm:$0xf0] }
 0x225   :  { %v6319_v43 = vor.u32 %v7178_v48, %v6316_v49  ;;  %v7252_v1 = vld [vmem:[#allocation7 + $0x58] sm:$0xff] }
 0x226   :  { %4017 = vmatpush.bf16.msrb.mxu1 %v6223_v13  ;;  %4026 = vmatpush.bf16.msrb.mxu2 %v6415_v32 }
 0x228   :  { %4005 = vmatpush.bf16.msrb.mxu0 %v6079_v34  ;;  %3987 = vmatpush.bf16.msra.mxu3 %v6031_v51  ;;  %v5951_v34 = vor.u32 %v7086_v21, %v5948_v23  ;;  %v7254_v51 = vld [vmem:[#allocation7 + $0x68] sm:$0xff]  ;;  %v7249_v21 = vld [vmem:[#allocation7 + $0x40] sm:$0xff] }
 0x229   :  { %v3724_v37 = vpop.f32.mrf.mxu2 }
 0x22a   :  { %4018 = vmatpush.bf16.msrb.mxu1 %v6207_v56  ;;  %4027 = vmatpush.bf16.msrb.mxu2 %v6399_v63  ;;  %v6335_v56 = vor.u32 %v7182_v27, %v6332_v28  ;;  %v7226_v63 = vld [vmem:[#allocation5 + $0x78c] sm:$0xf] }
 0x22b   :  { %v6511_v3 = vor.u32 %v7226_v63, %v6508_v0  ;;  %v7210_v28 = vld [vmem:[#allocation5 + $0x70c] sm:$0xf] }
 0x22c   :  { %4006 = vmatpush.bf16.msrb.mxu0 %v6063_v45  ;;  %3988 = vmatpush.bf16.msra.mxu3 %v6015_v62  ;;  %v7623_v22 = vpop.f32.mrf.mxu0  ;;  %v7242_v45 = vld [vmem:[#allocation7 + $0x8] sm:$0xff]  ;;  %v6527_v62 = vor.u32 %v7230_v59, %v6524_v60 }
 0x22d   :  { %v7258_v60 = vld [vmem:[#allocation7 + $0x88] sm:$0xff] }
 0x22e   :  { %4019 = vmatpush.bf16.msrb.mxu1 %v6191_v46  ;;  %4028 = vmatpush.bf16.msrb.mxu2 %v6383_v53  ;;  %v7625_v13 = vpop.f32.mrf.mxu1  ;;  %v7234_v46 = vld [vmem:[#allocation5 + $0x7cc] sm:$0xf]  ;;  %v2349_v53 = vperm.slane %v7594_v58, 2 }
 0x22f   :  { %4007 = vmatmul.bf16.vlgmr.msrb.gmra.mxu0 %v7570_v17  ;;  %v6367_v17 = vor.u32 %v7190_v11, %v6364_v19  ;;  %v6543_v55 = vor.u32 %v7234_v46, %v6540_v47  ;;  %v7218_v19 = vld [vmem:[#allocation5 + $0x74c] sm:$0xf]  ;;  %v7263_v47 = vld [vmem:[#allocation7 + $0xb0] sm:$0xff] }
 0x230   :  { %4319 = vmatpush.bf16.msra.mxu0 %v7248_v61  ;;  %3989 = vmatpush.bf16.msra.mxu3 %v5999_v7  ;;  %v7253_v61 = vld [vmem:[#allocation7 + $0x60] sm:$0xff]  ;;  %v6492_v7 = vld [vmem:[#allocation5 + $0x778] sm:$0xf0] }
 0x231   :  { %4020 = vmatmul.bf16.vlgmr.msrb.gmra.mxu1 %v7574_v50  ;;  %v5964_v50 = vld [vmem:[#allocation5 + $0x358] sm:$0xf0]  ;;  %v3774_v32 = vpop.f32.mrf.mxu2 }
 0x232   :  { %4029 = vmatpush.bf16.msrb.mxu2 %v6367_v17  ;;  %v5967_v8 = vor.u32 %v7090_v15, %v5964_v50  ;;  %4332 = vmatpush.bf16.msra.mxu1 %v7256_v30  ;;  %v7250_v15 = vld [vmem:[#allocation7 + $0x48] sm:$0xff] }
 0x234   :  { %4320 = vmatpush.bf16.msra.mxu0 %v7247_v4  ;;  %3990 = vmatpush.bf16.msra.mxu3 %v5983_v14  ;;  %v3802_v31 = vpop.f32.mrf.mxu0  ;;  %v7222_v4 = vld [vmem:[#allocation5 + $0x76c] sm:$0xf] }
 0x236   :  { %4030 = vmatpush.bf16.msrb.mxu2 %v6351_v52  ;;  %v3815_v33 = vpop.f32.mrf.mxu1  ;;  %4333 = vmatpush.bf16.msra.mxu1 %v7255_v38  ;;  %v6460_v52 = vld [vmem:[#allocation5 + $0x738] sm:$0xf0] }
 0x238   :  { %4321 = vmatpush.bf16.msra.mxu0 %v7246_v12  ;;  %3991 = vmatpush.bf16.msra.mxu3 %v5967_v8  ;;  %v6476_v12 = vld [vmem:[#allocation5 + $0x758] sm:$0xf0]  ;;  %v7214_v8 = vld [vmem:[#allocation5 + $0x72c] sm:$0xf] }
 0x239   :  { %v3776_v2 = vpop.f32.mrf.mxu2  ;;  %v6479_v58 = vor.u32 %v7218_v19, %v6476_v12 }
 0x23a   :  { %4031 = vmatpush.bf16.msrb.mxu2 %v6335_v56  ;;  %4334 = vmatpush.bf16.msra.mxu1 %v7254_v51  ;;  %v3775_v56 = vadd.f32 %v3774_v32, %v7617_v24  ;;  %v7260_v32 = vld [vmem:[#allocation7 + $0x98] sm:$0xff] }
 0x23c   :  { %4322 = vmatpush.bf16.msra.mxu0 %v7245_v16  ;;  %3992 = vmatpush.bf16.msra.mxu3 %v5951_v34 }
 0x23e   :  { %4032 = vmatpush.bf16.msrb.mxu2 %v6319_v43  ;;  %4335 = vmatpush.bf16.msra.mxu1 %v7253_v61  ;;  %v7264_v43 = vld [vmem:[#allocation7 + $0xb8] sm:$0xff] }
 0x240   :  { %4323 = vmatpush.bf16.msra.mxu0 %v7244_v29  ;;  %3993 = vmatpush.bf16.msra.mxu3 %v5935_v42  ;;  %v6444_v29 = vld [vmem:[#allocation5 + $0x718] sm:$0xf0] }
 0x241   :  { %4033 = vmatmul.bf16.vlgmr.msrb.gmra.mxu2 %v7580_v25  ;;  %v3723_v25 = vadd.f32 %v7627_v18, %v7614_v26  ;;  %v6463_v18 = vor.u32 %v7214_v8, %v6460_v52  ;;  %v6447_v33 = vor.u32 %v7210_v28, %v6444_v29  ;;  %v7271_v8 = vld [vmem:[#allocation7 + $0xf0] sm:$0xff]  ;;  %v7266_v29 = vld [vmem:[#allocation7 + $0xc8] sm:$0xff] }
 0x242   :  { %4336 = vmatpush.bf16.msra.mxu1 %v7252_v1  ;;  %v3735_v17 = vpop.f32.mrf.mxu3  ;;  %v3826_v5 = vpop.f32.mrf.mxu2  ;;  %4345 = vmatpush.bf16.msra.mxu2 %v7264_v43  ;;  %v7267_v28 = vld [vmem:[#allocation7 + $0xd0] sm:$0xff] }
 0x243   :  { %3994 = vmatmul.bf16.vlgmr.msra.gmra.mxu3 %v7558_v54  ;;  %v6495_v54 = vor.u32 %v7222_v4, %v6492_v7  ;;  %v3736_v50 = vadd.f32 %v3735_v17, %v3723_v25 }
 0x244   :  { %4324 = vmatpush.bf16.msra.mxu0 %v7243_v39  ;;  %4038 = vmatpush.bf16.msrb.mxu3 %v6559_v44 }
 0x245   :  { %v4051_v16 = vmax.f32 %v3736_v50, 0.0 }
 0x246   :  { %4337 = vmatpush.bf16.msra.mxu1 %v7251_v9  ;;  %4346 = vmatpush.bf16.msra.mxu2 %v7263_v47 }
 0x247   :  { %v4055_v26 = vpack.c.bf16 %v4051_v16, %v4051_v16 }
 0x248   :  { %4325 = vmatpush.bf16.msra.mxu0 %v7242_v45  ;;  %4039 = vmatpush.bf16.msrb.mxu3 %v6543_v55  ;;  %v7259_v55 = vld [vmem:[#allocation7 + $0x90] sm:$0xff] }
 0x24a   :  { %4338 = vmatpush.bf16.msra.mxu1 %v7250_v15  ;;  %v3737_v30 = vpop.f32.mrf.mxu3  ;;  %v3828_v31 = vpop.f32.mrf.mxu2 }
 0x24c   :  { %4326 = vmatpush.bf16.msra.mxu0 %v7241_v57  ;;  %4040 = vmatpush.bf16.msrb.mxu3 %v6527_v62  ;;  %v3852_v10 = vpop.f32.mrf.mxu0  ;;  %v7297_v57 = vld [vmem:[%s7690_s4] sm:$0xf] }
 0x24d   :  { %v3853_v14 = vadd.f32 %v3852_v10, %v2349_v53  ;;  %v2350_v59 = vperm.slane %v7297_v57, 3  ;;  %v7275_v57 = vld [vmem:[%s7693_s7 + $0x10] sm:$0xff] }
 0x24e   :  { %v3865_v11 = vpop.f32.mrf.mxu1  ;;  %4339 = vmatpush.bf16.msra.mxu1 %v7249_v21 }
 0x24f   :  { %v7634_v20 = vadd.f32 %v3865_v11, %v3853_v14  ;;  %4327 = vmatmul.bf16.vlgmr.msra.gmra.mxu0 %v4055_v26  ;;  %v7270_v26 = vld [vmem:[#allocation7 + $0xe8] sm:$0xff] }
 0x250   :  { %4041 = vmatpush.bf16.msrb.mxu3 %v6511_v3  ;;  %v7257_v3 = vld [vmem:[#allocation7 + $0x80] sm:$0xff] }
 0x252   :  { %v3787_v34 = vpop.f32.mrf.mxu3 }
 0x253   :  { %v3788_v35 = vadd.f32 %v3787_v34, %v3775_v56 }
 0x254   :  { %4042 = vmatpush.bf16.msrb.mxu3 %v6495_v54  ;;  %v3854_v23 = vpop.f32.mrf.mxu0 }
 0x255   :  { %v3801_v36 = vadd.f32 %v7623_v22, %v3788_v35  ;;  %v7262_v22 = vld [vmem:[#allocation7 + $0xa8] sm:$0xff]  ;;  %v7269_v23 = vld [vmem:[#allocation7 + $0xe0] sm:$0xff] }
 0x256   :  { %v3867_v27 = vpop.f32.mrf.mxu1  ;;  %4347 = vmatpush.bf16.msra.mxu2 %v7262_v22  ;;  %v7280_v22 = vld [vmem:[%s7693_s7 + $0x38] sm:$0xff] }
 0x257   :  { %v3814_v37 = vadd.f32 %v7625_v13, %v3801_v36  ;;  %v7261_v13 = vld [vmem:[#allocation7 + $0xa0] sm:$0xff]  ;;  %v7268_v27 = vld [vmem:[#allocation7 + $0xd8] sm:$0xff]  ;;  %4441 = vmatpush.bf16.msrb.mxu0 %v7280_v22 }
 0x258   :  { %4043 = vmatpush.bf16.msrb.mxu3 %v6479_v58 }
 0x259   :  { %v3827_v40 = vadd.f32 %v3826_v5, %v3814_v37  ;;  %v7272_v5 = vld [vmem:[#allocation7 + $0xf8] sm:$0xff] }
 0x25a   :  { %v3789_v48 = vpop.f32.mrf.mxu3  ;;  %4348 = vmatpush.bf16.msra.mxu2 %v7261_v13  ;;  %v7278_v13 = vld [vmem:[%s7693_s7 + $0x28] sm:$0xff] }
 0x25c   :  { %4044 = vmatpush.bf16.msrb.mxu3 %v6463_v18 }
 0x25e   :  { %4349 = vmatpush.bf16.msra.mxu2 %v7260_v32  ;;  %v7277_v32 = vld [vmem:[%s7693_s7 + $0x20] sm:$0xff] }
 0x260   :  { %4045 = vmatpush.bf16.msrb.mxu3 %v6447_v33  ;;  %v7265_v33 = vld [vmem:[#allocation7 + $0xc0] sm:$0xff] }
 0x262   :  { %v3839_v41 = vpop.f32.mrf.mxu3  ;;  %4350 = vmatpush.bf16.msra.mxu2 %v7259_v55  ;;  %v7276_v55 = vld [vmem:[%s7693_s7 + $0x18] sm:$0xff] }
 0x263   :  { %4046 = vmatmul.bf16.vlgmr.msrb.gmra.mxu3 %v7587_v6  ;;  %v3840_v42 = vadd.f32 %v3839_v41, %v3827_v40 }
 0x264   :  { %v3878_v38 = vpop.f32.mrf.mxu2  ;;  %4358 = vmatpush.bf16.msra.mxu3 %v7272_v5 }
 0x265   :  { %v4052_v44 = vmax.f32 %v3840_v42, 0.0  ;;  %v3879_v54 = vadd.f32 %v3878_v38, %v7634_v20 }
 0x266   :  { %4351 = vmatpush.bf16.msra.mxu2 %v7258_v60 }
 0x267   :  { %v4056_v46 = vpack.c.bf16 %v4052_v44, %v4052_v44 }
 0x268   :  { %4359 = vmatpush.bf16.msra.mxu3 %v7271_v8 }
 0x269   :  { %4340 = vmatmul.bf16.vlgmr.msra.gmra.mxu1 %v4056_v46 }
 0x26a   :  { %v3841_v51 = vpop.f32.mrf.mxu3  ;;  %4352 = vmatpush.bf16.msra.mxu2 %v7257_v3 }
 0x26b   :  { %v7279_v51 = vld [vmem:[%s7693_s7 + $0x30] sm:$0xff] }
 0x26c   :  { %v3904_v49 = vpop.f32.mrf.mxu0  ;;  %v3880_v6 = vpop.f32.mrf.mxu2  ;;  %4360 = vmatpush.bf16.msra.mxu3 %v7270_v26  ;;  %4442 = vmatpush.bf16.msrb.mxu0 %v7279_v51 }
 0x26e   :  { %v3917_v39 = vpop.f32.mrf.mxu1 }
 0x270   :  { %4361 = vmatpush.bf16.msra.mxu3 %v7269_v23  ;;  %4443 = vmatpush.bf16.msrb.mxu0 %v7278_v13 }
 0x274   :  { %v3906_v45 = vpop.f32.mrf.mxu0  ;;  %4362 = vmatpush.bf16.msra.mxu3 %v7268_v27  ;;  %4444 = vmatpush.bf16.msrb.mxu0 %v7277_v32 }
 0x275   :  { %v7293_v45 = vld [vmem:[%s7692_s6] ss:$0 sm:$0xff] }
 0x276   :  { %v3919_v24 = vpop.f32.mrf.mxu1 }
 0x278   :  { %4363 = vmatpush.bf16.msra.mxu3 %v7267_v28  ;;  %4445 = vmatpush.bf16.msrb.mxu0 %v7276_v55 }
 0x27c   :  { %4364 = vmatpush.bf16.msra.mxu3 %v7266_v29  ;;  %4446 = vmatpush.bf16.msrb.mxu0 %v7275_v57 }
 0x280   :  { %4365 = vmatpush.bf16.msra.mxu3 %v7265_v33 }
 0x282   :  { %v3891_v0 = vpop.f32.mrf.mxu3 }
 0x283   :  { %v3892_v25 = vadd.f32 %v3891_v0, %v3879_v54  ;;  %v7281_v0 = vld [vmem:[%s7695_s9] sm:$0xff] }
 0x284   :  { %v3930_v2 = vpop.f32.mrf.mxu2 }
 0x285   :  { %v3905_v10 = vadd.f32 %v3904_v49, %v3892_v25 }
 0x287   :  { %v3918_v11 = vadd.f32 %v3917_v39, %v3905_v10 }
 0x289   :  { %v3931_v14 = vadd.f32 %v3930_v2, %v3918_v11 }
 0x28a   :  { %v3893_v53 = vpop.f32.mrf.mxu3 }
 0x28c   :  { %v3956_v61 = vpop.f32.mrf.mxu0  ;;  %v3932_v9 = vpop.f32.mrf.mxu2 }
 0x28d   :  { %v3957_v63 = vadd.f32 %v3956_v61, %v2350_v59  ;;  %v7274_v61 = vld [vmem:[%s7693_s7 + $0x8] sm:$0xff]  ;;  %v7294_v9 = vld [vmem:[%s7694_s8] ss:$0 sm:$0xff] }
 0x28e   :  { %v3969_v62 = vpop.f32.mrf.mxu1  ;;  %4447 = vmatpush.bf16.msrb.mxu0 %v7274_v61 }
 0x28f   :  { %v3970_v1 = vadd.f32 %v3969_v62, %v3957_v63  ;;  %v7273_v62 = vld [vmem:[%s7693_s7] sm:$0xff]  ;;  %v7282_v63 = vld [vmem:[%s7695_s9 + $0x8] sm:$0xff] }
 0x290   :  { %4486 = vmatpush.bf16.msrb.mxu1 %v7282_v63 }
 0x292   :  { %4448 = vmatpush.bf16.msrb.mxu0 %v7273_v62 }
 0x294   :  { %v3958_v4 = vpop.f32.mrf.mxu0  ;;  %4487 = vmatpush.bf16.msrb.mxu1 %v7281_v0 }
 0x296   :  { %v3971_v7 = vpop.f32.mrf.mxu1 }
 0x2a4   :  { %v3982_v15 = vpop.f32.mrf.mxu2 }
 0x2a5   :  { %v3983_v36 = vadd.f32 %v3982_v15, %v3970_v1 }
 0x2a6   :  { %v3943_v17 = vpop.f32.mrf.mxu3 }
 0x2a7   :  { %v3944_v50 = vadd.f32 %v3943_v17, %v3931_v14 }
 0x2a9   :  { %v4053_v58 = vmax.f32 %v3944_v50, 0.0 }
 0x2ab   :  { %v4057_v16 = vpack.c.bf16 %v4053_v58, %v4053_v58 }
 0x2ac   :  { %v4008_v19 = vpop.f32.mrf.mxu0  ;;  %v3984_v18 = vpop.f32.mrf.mxu2 }
 0x2ad   :  { %4353 = vmatmul.bf16.vlgmr.msra.gmra.mxu2 %v4057_v16 }
 0x2ae   :  { %v4021_v12 = vpop.f32.mrf.mxu1  ;;  %v3945_v20 = vpop.f32.mrf.mxu3 }
 0x2b4   :  { %v4010_v52 = vpop.f32.mrf.mxu0 }
 0x2b6   :  { %v4023_v21 = vpop.f32.mrf.mxu1 }
 0x2c4   :  { %v4034_v31 = vpop.f32.mrf.mxu2 }
 0x2c6   :  { %v3995_v30 = vpop.f32.mrf.mxu3 }
 0x2c7   :  { %v3996_v48 = vadd.f32 %v3995_v30, %v3983_v36 }
 0x2c9   :  { %v4009_v37 = vadd.f32 %v4008_v19, %v3996_v48 }
 0x2cb   :  { %v4022_v39 = vadd.f32 %v4021_v12, %v4009_v37  ;;  %v7295_v12 = vld [vmem:[%s7696_s10] ss:$0 sm:$0xff] }
 0x2cc   :  { %v4036_v56 = vpop.f32.mrf.mxu2  ;;  %v4328_v35 = vpop.f32.mrf.mxu0 }
 0x2cd   :  { %v4035_v38 = vadd.f32 %v4034_v31, %v4022_v39  ;;  %v4329_v46 = vadd.f32 %v7293_v45, %v4328_v35 }
 0x2ce   :  { %v3997_v34 = vpop.f32.mrf.mxu3 }
 0x2d4   :  { %v4330_v49 = vpop.f32.mrf.mxu0 }
 0x2e6   :  { %v4047_v40 = vpop.f32.mrf.mxu3  ;;  %v4341_v24 = vpop.f32.mrf.mxu1 }
 0x2e7   :  { %v4048_v41 = vadd.f32 %v4047_v40, %v4035_v38  ;;  %v4342_v47 = vadd.f32 %v4341_v24, %v4329_v46 }
 0x2e9   :  { %v4054_v42 = vmax.f32 %v4048_v41, 0.0 }
 0x2eb   :  { %v4058_v43 = vpack.c.bf16 %v4054_v42, %v4054_v42 }
 0x2ed   :  { %4366 = vmatmul.bf16.vlgmr.msra.gmra.mxu3 %v4058_v43 }
 0x2ee   :  { %v4049_v44 = vpop.f32.mrf.mxu3  ;;  %v4343_v6 = vpop.f32.mrf.mxu1 }
 0x330   :  { %v4354_v59 = vpop.f32.mrf.mxu2 }
 0x331   :  { %v4355_v1 = vadd.f32 %v4354_v59, %v4342_v47 }
 0x338   :  { %v4356_v60 = vpop.f32.mrf.mxu2 }
 0x370   :  { %v4367_v2 = vpop.f32.mrf.mxu3 }
 0x371   :  { %v4368_v3 = vadd.f32 %v4367_v2, %v4355_v1 }
 0x373   :  { %v4371_v4 = vmax.f32 %v4368_v3, 0.0 }
 0x375   :  { %v4372_v7 = vpack.c.bf16 %v4371_v4, %v4371_v4 }
 0x377   :  { %4449 = vmatmul.bf16.vlgmr.msrb.gmra.mxu0 %v4372_v7 }
 0x378   :  { %v4369_v53 = vpop.f32.mrf.mxu3 }
 0x3f4   :  { %v4450_v54 = vpop.f32.mrf.mxu0 }
 0x3f5   :  { %v4451_v25 = vadd.f32 %v7294_v9, %v4450_v54 }
 0x3f7   :  { %v4454_v10 = vmax.f32 %v4451_v25, 0.0 }
 0x3f9   :  { %v4455_v11 = vpack.c.bf16 %v4454_v10, %v4454_v10 }
 0x3fb   :  { %6728 = vmatmul.msk.bf16.vlgmr.msrb.gmra.mxu1 %vm4476_vm0, %v4455_v11 }
 0x3fc   :  { %v4452_v19 = vpop.f32.mrf.mxu0 }
 0x478   :  { %v4489_v14 = vpop.f32.mrf.mxu1 }
 0x479   :  { %v4490_v17 = vadd.f32 %v7295_v12, %v4489_v14 }
 0x47b   :  { %4493 = vst [vmem:[#allocation8] sm:$0xff] %v4490_v17 }
 0x47c   :  { %4504 = dma.vmem_to_hbm [thread:$0]  %s4500_s25, 128, %s4502_s27, [#allocation4]  }
 0x480   :  { %v4491_v15 = vpop.f32.mrf.mxu1 }
 0x481   :  { %7398 = dma.done.wait [#allocation4], 128  }
 0x482   :  { %7399 = vsyncadd [#allocation4], 4294967168 }
 0x483   :  { %4509 = vsyncpa [#allocation3], 1 }
 0x484   :  { %4510 = vsyncpa [#allocation6], 1 }
 0x485   :  { %4511 = vsyncpa [#allocation4], 1 }

</bundles_post_ra>
